<compile_context>
chip_gen: v7x
topology: tpu7x:2x2x1
jax: 0.10.0
libtpu: 0.0.40
codegen_flags: <defaults>
</compile_context>

<pallas_src>
import math

import jax
import jax.numpy as jnp
import numpy as np
from jax import lax
from jax.experimental import pallas as pl
from jax.experimental.pallas import tpu as pltpu


def _round_up(x, m):
    return ((x + m - 1) // m) * m


# -----------------------------------------------------------------------------
# The fused kernel (one grid step == one image)
# -----------------------------------------------------------------------------
def _build_kernel(C8, Wp2, L2p, M):
    """C8: padded channel count; Wp2: padded half-res width; L2p: padded flat
    frame length (multiple of 128); M: lane margin (multiple of 128)."""

    # ---- static scatter maps (python ints only) -------------------------------
    def _full_map(a_src, b_src):
        # full-res 3x3 conv in phase space: source phase (a_src,b_src) fills
        # 9 (dst-phase, tap) slots with half-res shifts sh,sw in {-1,0,+1}.
        out = []
        for a in range(2):
            for kh in range(3):
                u = a + kh - 1
                if u % 2 != a_src:
                    continue
                sh = u // 2
                for b in range(2):
                    for kw in range(3):
                        v = b + kw - 1
                        if v % 2 != b_src:
                            continue
                        sw = v // 2
                        out.append((2 * a + b, kh * 3 + kw, sh * Wp2 + sw))
        return out

    def _down0_map(a_src, b_src):
        # stride-2 3x3 conv on the full-res input == output phase (0,0) only.
        out = []
        for kh in range(3):
            u = kh - 1
            if u % 2 != a_src:
                continue
            sh = u // 2
            for kw in range(3):
                v = kw - 1
                if v % 2 != b_src:
                    continue
                sw = v // 2
                out.append((kh * 3 + kw, sh * Wp2 + sw))
        return out

    FULL_MAP = [_full_map(a, b) for a in range(2) for b in range(2)]
    DOWN0_MAP = [_down0_map(a, b) for a in range(2) for b in range(2)]

    def scatter_half(v, ref, slab):
        # plain half-res 3x3 stride-1 conv: tap (kh,kw) == lane shift d.
        for kh in range(3):
            for kw in range(3):
                t = kh * 3 + kw
                d = (kh - 1) * Wp2 + (kw - 1)
                ref[slab, C8 * t:C8 * (t + 1), M - d:M - d + L2p] = v

    def scatter_full(v, src_phase, ref):
        for slab, t, d in FULL_MAP[src_phase]:
            ref[slab, C8 * t:C8 * (t + 1), M - d:M - d + L2p] = v

    def scatter_down0(v, src_phase, ref, slab):
        for t, d in DOWN0_MAP[src_phase]:
            ref[slab, C8 * t:C8 * (t + 1), M - d:M - d + L2p] = v

    def kernel(x_ref, mask_ref, wc_ref, wdw_ref, aff_ref, wt_ref, bt_ref,
               out_ref, stk_dn, stk_u1, stk_u2):
        interior = mask_ref[...] > 0.5                      # (C8, L2p) bool

        def msk(v):
            # where-based masking: kills garbage/NaN from never-initialised
            # scratch margins (only ring/dead lanes can ever see them).
            return jnp.where(interior, v, 0.0)

        def operand(ref, slab):                             # aligned (9*C8, L2p)
            return ref[slab, :, M:M + L2p]

        def conv(s, ref, slab):                             # one MXU matmul
            return jnp.dot(wc_ref[s], operand(ref, slab),
                           preferred_element_type=jnp.float32)

        def dw_tower(s, ref, slab):                         # depthwise on MXU
            return jnp.dot(wdw_ref[s], operand(ref, slab),
                           preferred_element_type=jnp.float32)

        def frelu(y_m, tw, s):
            t = (tw + aff_ref[s, 0]) * aff_ref[s, 1] + aff_ref[s, 2]
            return msk(jnp.maximum(y_m, t))

        xs = [x_ref[0, ph] for ph in range(4)]              # input phase planes

        # ---------------- down path (half res, single plane) ------------------
        for ph in range(4):
            scatter_down0(xs[ph], ph, stk_dn, 0)            # stride-2 operand

        def half_stage(s, src_slab, dst_slab, scatter_f):
            y = msk(conv(s, stk_dn, src_slab))
            scatter_half(y, stk_dn, dst_slab)               # tower operand
            f = frelu(y, dw_tower(s, stk_dn, dst_slab), s)
            if scatter_f:
                scatter_half(f, stk_dn, dst_slab)           # exact overwrite ->
            return f                                        # next conv operand

        half_stage(0, 0, 1, True)          # down[0] Conv(c_in->hid, s2)+FReLU
        half_stage(1, 1, 2, True)          # down[1] Conv(hid->hid)     +FReLU
        f2 = half_stage(2, 2, 0, False)    # down[2] Conv(hid->c_out)   +FReLU

        # ---------- up[0]: ConvTranspose2d(c_out->hid, k2, s2) + bias ---------
        # k == s == 2 (non-overlapping): each output phase is a channel mix.
        for ph in range(4):
            u = jnp.dot(wt_ref[ph], f2, preferred_element_type=jnp.float32)
            scatter_full(msk(u + bt_ref[...]), ph, stk_u1)

        # ---------------- up path (full-res convs in phase space) -------------
        def full_stage(s, src, dst, scatter_f):
            ys = [msk(conv(s, src, ph)) for ph in range(4)]
            for ph in range(4):
                scatter_full(ys[ph], ph, dst)               # tower operands
            fs = [frelu(ys[ph], dw_tower(s, dst, ph), s) for ph in range(4)]
            if scatter_f:
                for ph in range(4):
                    scatter_full(fs[ph], ph, dst)           # exact overwrite
            return fs

        full_stage(3, stk_u1, stk_u2, True)                 # up[1]
        f_u2 = full_stage(4, stk_u2, stk_u1, False)         # up[2] (stk_u1 = scratch)

        # ------------- fused residual + lane-dense aligned output -------------
        for ph in range(4):
            out_ref[0, ph] = f_u2[ph] + xs[ph]

    return kernel


# -----------------------------------------------------------------------------
# Wrapper: layout plumbing (space-to-depth, param packing) + pallas_call
# -----------------------------------------------------------------------------
def symmetric_block_forward(x, params):
    n, c_in, H, W = x.shape
    if H % 2 or W % 2:
        raise ValueError("SymmetricBlock needs even spatial dims (2x down/up).")
    c_out, hid = params["upT_w"].shape[0], params["upT_w"].shape[1]

    C8 = _round_up(max(c_in, hid, c_out), 8)
    H2, W2 = H // 2, W // 2
    Hp2, Wp2 = H2 + 2, W2 + 2
    L2 = Hp2 * Wp2
    L2p = _round_up(L2, 128)                 # lane-dense padded frame length
    M = _round_up(Wp2 + 1, 128)              # lane margin (>= max |shift|)
    W2e = 2 * M + L2p                        # stacked-operand buffer width
    K9 = 9 * C8
    f32 = jnp.float32

    # ---- pack the five Conv blocks into 3 arrays -------------------------------
    def pack_conv(blk):
        w = blk["w"].astype(f32)                              # (co, ci, 3, 3)
        co, ci = w.shape[:2]
        w = jnp.pad(w, ((0, C8 - co), (0, C8 - ci), (0, 0), (0, 0)))
        w = jnp.transpose(w, (0, 2, 3, 1)).reshape(C8, K9)    # [o, t*C8 + c]
        dw = blk["dw"][:, 0].astype(f32)                      # (co, 3, 3)
        bd = dw[:, :, :, None] * jnp.eye(co, dtype=f32)[:, None, None, :]
        bd = jnp.pad(bd, ((0, C8 - co), (0, 0), (0, 0), (0, C8 - co)))
        bd = bd.reshape(C8, K9)                               # block-diag depthwise
        aff = jnp.stack([jnp.pad(blk["dwb"].astype(f32), (0, C8 - co)),
                         jnp.pad(blk["scale"].astype(f32), (0, C8 - co)),
                         jnp.pad(blk["shift"].astype(f32), (0, C8 - co))])
        return w, bd, aff[:, :, None]                         # (3, C8, 1)

    stages = [params["down0"], params["down1"], params["down2"],
              params["up1"], params["up2"]]
    packed = [pack_conv(b) for b in stages]
    wc = jnp.stack([p[0] for p in packed])                    # (5, C8, 9*C8)
    wdw = jnp.stack([p[1] for p in packed])                   # (5, C8, 9*C8)
    aff = jnp.stack([p[2] for p in packed])                   # (5, 3, C8, 1)

    wt = jnp.pad(params["upT_w"].astype(f32),
                 ((0, C8 - c_out), (0, C8 - hid), (0, 0), (0, 0)))
    wt = jnp.transpose(wt, (2, 3, 1, 0)).reshape(4, C8, C8)   # [t, o, c]
    bt = jnp.pad(params["upT_b"].astype(f32), (0, C8 - hid))[:, None]

    # interior mask of the padded half-res frame (shared by every stage)
    mask_np = np.zeros((C8, L2p), np.float32)
    core = np.zeros((Hp2, Wp2), np.float32)
    core[1:1 + H2, 1:1 + W2] = 1.0
    mask_np[:, :L2] = core.reshape(1, L2)
    maskj = jnp.asarray(mask_np)

    # ---- input: space-to-depth into 4 padded half-res phase planes -------------
    xr = x.astype(f32).reshape(n, c_in, H2, 2, W2, 2)
    ph = jnp.transpose(xr, (0, 3, 5, 1, 2, 4)).reshape(n, 4, c_in, H2, W2)
    ph = jnp.pad(ph, ((0, 0), (0, 0), (0, C8 - c_in), (1, 1), (1, 1)))
    x_ph = jnp.pad(ph.reshape(n, 4, C8, L2),
                   ((0, 0), (0, 0), (0, 0), (0, L2p - L2)))

    const_arrs = [maskj, wc, wdw, aff, wt, bt]
    in_specs = [pl.BlockSpec((1, 4, C8, L2p), lambda i: (i, 0, 0, 0))]
    for a in const_arrs:
        in_specs.append(pl.BlockSpec(a.shape, lambda i, _n=a.ndim: (0,) * _n))

    kernel = _build_kernel(C8, Wp2, L2p, M)

    out = pl.pallas_call(
        kernel,
        out_shape=jax.ShapeDtypeStruct((n, 4, C8, L2p), f32),
        grid=(n,),
        in_specs=in_specs,
        out_specs=pl.BlockSpec((1, 4, C8, L2p), lambda i: (i, 0, 0, 0)),
        scratch_shapes=[
            pltpu.VMEM((3, K9, W2e), f32),   # down-path stacked operands
            pltpu.VMEM((4, K9, W2e), f32),   # up[1] stacked operands / scratch
            pltpu.VMEM((4, K9, W2e), f32),   # up[2] stacked operands
        ],
        compiler_params=pltpu.CompilerParams(
            dimension_semantics=("parallel",),
            vmem_limit_bytes=32 * 1024 * 1024,
        ),
    )(x_ph, *const_arrs)

    # ---- output: strip the ring and re-interleave phases (layout plumbing) -----
    o = out[:, :, :c_in, :L2].reshape(n, 2, 2, c_in, Hp2, Wp2)
    o = o[:, :, :, :, 1:1 + H2, 1:1 + W2]
    o = jnp.transpose(o, (0, 3, 4, 1, 5, 2)).reshape(n, c_in, H, W)
    return o


# -----------------------------------------------------------------------------
# Pure-XLA reference (numerical self-check only)
# -----------------------------------------------------------------------------
def _conv2d_ref(x, w, stride, pad, groups=1):
    return lax.conv_general_dilated(
        x, w, window_strides=(stride, stride),
        padding=((pad, pad), (pad, pad)),
        dimension_numbers=("NCHW", "OIHW", "NCHW"),
        feature_group_count=groups,
        precision=lax.Precision.HIGHEST)


def _conv_block_ref(x, p, stride):
    y = _conv2d_ref(x, p["w"], stride, 1)
    c = y.shape[1]
    t = _conv2d_ref(y, p["dw"], 1, 1, groups=c) + p["dwb"].reshape(1, c, 1, 1)
    t = t * p["scale"].reshape(1, c, 1, 1) + p["shift"].reshape(1, c, 1, 1)
    return jnp.maximum(y, t)


def symmetric_block_reference(x, params):
    out = _conv_block_ref(x, params["down0"], 2)
    out = _conv_block_ref(out, params["down1"], 1)
    out = _conv_block_ref(out, params["down2"], 1)
    w, b = params["upT_w"], params["upT_b"]
    nb, _, h2, w2 = out.shape
    co = w.shape[1]
    y = jnp.einsum("nihw,iokl->nohkwl", out, w, precision=lax.Precision.HIGHEST)
    out = y.reshape(nb, co, 2 * h2, 2 * w2) + b.reshape(1, co, 1, 1)
    out = _conv_block_ref(out, params["up1"], 1)
    out = _conv_block_ref(out, params["up2"], 1)
    return out + x


# -----------------------------------------------------------------------------
# Parameters (deterministic, synthetic: kaiming_normal * 0.1, zero conv bias)
# -----------------------------------------------------------------------------
def make_conv_block_params(key, cin, cout):
    k1, k2 = jax.random.split(key)
    w = jax.random.normal(k1, (cout, cin, 3, 3), jnp.float32) * (
        math.sqrt(2.0 / (cin * 9)) * 0.1)
    dw = jax.random.normal(k2, (cout, 1, 3, 3), jnp.float32) * (
        math.sqrt(2.0 / 9) * 0.1)
    dwb = jnp.zeros((cout,), jnp.float32)
    eps = 1e-5
    scale = jnp.full((cout,), 1.0 / math.sqrt(1.0 + eps), jnp.float32)
    shift = jnp.zeros((cout,), jnp.float32)
    return dict(w=w, dw=dw, dwb=dwb, scale=scale, shift=shift)


def make_symmetric_block_params(key, in_channels, out_channels, expand_factor=0.5):
    hidden = int(out_channels * expand_factor)
    keys = jax.random.split(key, 7)
    return dict(
        down0=make_conv_block_params(keys[0], in_channels, hidden),
        down1=make_conv_block_params(keys[1], hidden, hidden),
        down2=make_conv_block_params(keys[2], hidden, out_channels),
        upT_w=jax.random.normal(keys[3], (out_channels, hidden, 2, 2),
                                jnp.float32) * 0.1,
        upT_b=jax.random.normal(keys[4], (hidden,), jnp.float32) * 0.01,
        up1=make_conv_block_params(keys[5], hidden, hidden),
        up2=make_conv_block_params(keys[6], hidden, in_channels),
    )


if __name__ == "__main__":
    key = jax.random.PRNGKey(0)
    k_x, k_p = jax.random.split(key)

    N, C_in, H, W = 2, 4, 16, 16
    C_out = 8                                  # hidden = int(8 * 0.5) = 4
    x = jax.random.normal(k_x, (N, C_in, H, W), jnp.float32)
    params = make_symmetric_block_params(k_p, C_in, C_out)

    fwd = jax.jit(symmetric_block_forward)
    out = jax.block_until_ready(fwd(x, params))

    assert out.shape == (N, C_in, H, W), out.shape
    assert bool(jnp.all(jnp.isfinite(out)))

    # Self-check vs. an f32 XLA reference (tolerance tightened vs. previous rev).
    ref = jax.block_until_ready(jax.jit(symmetric_block_reference)(x, params))
    dp = out - x
    dr = ref - x
    err = float(jnp.max(jnp.abs(dp - dr)))
    scl = float(jnp.max(jnp.abs(dr)))
    assert err <= 5e-2 * scl + 1e-5, (err, scl)

    print("KERNEL_OK")
</pallas_src>

<mosaic_0001>
module attributes {stable_mosaic.version = 11 : i64} {
  func.func @kernel(%arg0: i32, %arg1: memref<1x4x8x128xf32, #tpu.memory_space<vmem>>, %arg2: memref<8x128xf32, #tpu.memory_space<vmem>>, %arg3: memref<5x8x72xf32, #tpu.memory_space<vmem>>, %arg4: memref<5x8x72xf32, #tpu.memory_space<vmem>>, %arg5: memref<5x3x8x1xf32, #tpu.memory_space<vmem>>, %arg6: memref<4x8x8xf32, #tpu.memory_space<vmem>>, %arg7: memref<8x1xf32, #tpu.memory_space<vmem>>, %arg8: memref<1x4x8x128xf32, #tpu.memory_space<vmem>>, %arg9: memref<3x72x384xf32, #tpu.memory_space<vmem>>, %arg10: memref<4x72x384xf32, #tpu.memory_space<vmem>>, %arg11: memref<4x72x384xf32, #tpu.memory_space<vmem>>) attributes {dimension_semantics = [#tpu.dimension_semantics<parallel>], iteration_bounds = array<i64: 2>, scalar_prefetch = 0 : i64, scratch_operands = 3 : i64, tpu.core_type = #tpu.core_type<tc>, window_params = [{transform_indices = @transform_0, window_bounds = array<i64: 1, 4, 8, 128>}, {pipeline_mode = #tpu.pipeline_mode<synchronous>, transform_indices = @transform_1, window_bounds = array<i64: 8, 128>}, {pipeline_mode = #tpu.pipeline_mode<synchronous>, transform_indices = @transform_2, window_bounds = array<i64: 5, 8, 72>}, {pipeline_mode = #tpu.pipeline_mode<synchronous>, transform_indices = @transform_3, window_bounds = array<i64: 5, 8, 72>}, {pipeline_mode = #tpu.pipeline_mode<synchronous>, transform_indices = @transform_4, window_bounds = array<i64: 5, 3, 8, 1>}, {pipeline_mode = #tpu.pipeline_mode<synchronous>, transform_indices = @transform_5, window_bounds = array<i64: 4, 8, 8>}, {pipeline_mode = #tpu.pipeline_mode<synchronous>, transform_indices = @transform_6, window_bounds = array<i64: 8, 1>}, {transform_indices = @transform_7, window_bounds = array<i64: 1, 4, 8, 128>}]} {
    %c0 = arith.constant 0 : index
    %c0_0 = arith.constant 0 : index
    %0 = vector.load %arg2[%c0, %c0_0] : memref<8x128xf32, #tpu.memory_space<vmem>>, vector<8x128xf32>
    %cst = arith.constant 5.000000e-01 : f32
    %1 = vector.broadcast %cst : f32 to vector<8x128xf32>
    %2 = arith.cmpf ogt, %0, %1 : vector<8x128xf32>
    %c0_1 = arith.constant 0 : index
    %c0_2 = arith.constant 0 : index
    %c0_3 = arith.constant 0 : index
    %c0_4 = arith.constant 0 : index
    %3 = vector.load %arg1[%c0_1, %c0_2, %c0_3, %c0_4] : memref<1x4x8x128xf32, #tpu.memory_space<vmem>>, vector<1x1x8x128xf32>
    %4 = vector.shape_cast %3 : vector<1x1x8x128xf32> to vector<8x128xf32>
    %c0_5 = arith.constant 0 : index
    %c1 = arith.constant 1 : index
    %c0_6 = arith.constant 0 : index
    %c0_7 = arith.constant 0 : index
    %5 = vector.load %arg1[%c0_5, %c1, %c0_6, %c0_7] : memref<1x4x8x128xf32, #tpu.memory_space<vmem>>, vector<1x1x8x128xf32>
    %6 = vector.shape_cast %5 : vector<1x1x8x128xf32> to vector<8x128xf32>
    %c0_8 = arith.constant 0 : index
    %c2 = arith.constant 2 : index
    %c0_9 = arith.constant 0 : index
    %c0_10 = arith.constant 0 : index
    %7 = vector.load %arg1[%c0_8, %c2, %c0_9, %c0_10] : memref<1x4x8x128xf32, #tpu.memory_space<vmem>>, vector<1x1x8x128xf32>
    %8 = vector.shape_cast %7 : vector<1x1x8x128xf32> to vector<8x128xf32>
    %c0_11 = arith.constant 0 : index
    %c3 = arith.constant 3 : index
    %c0_12 = arith.constant 0 : index
    %c0_13 = arith.constant 0 : index
    %9 = vector.load %arg1[%c0_11, %c3, %c0_12, %c0_13] : memref<1x4x8x128xf32, #tpu.memory_space<vmem>>, vector<1x1x8x128xf32>
    %10 = vector.shape_cast %9 : vector<1x1x8x128xf32> to vector<8x128xf32>
    %c0_14 = arith.constant 0 : index
    %c32 = arith.constant 32 : index
    %c128 = arith.constant 128 : index
    %11 = vector.load %arg9[%c0_14, %c32, %c128] : memref<3x72x384xf32, #tpu.memory_space<vmem>>, vector<1x8x128xf32>
    %12 = vector.shape_cast %11 : vector<1x8x128xf32> to vector<8x128xf32>
    %13 = vector.shape_cast %4 : vector<8x128xf32> to vector<1x8x128xf32>
    tpu.vector_store %arg9[%c0_14, %c32, %c128], %13 {strides = array<i32>} : memref<3x72x384xf32, #tpu.memory_space<vmem>>, vector<1x8x128xf32>,
    %c0_15 = arith.constant 0 : index
    %c24 = arith.constant 24 : index
    %c129 = arith.constant 129 : index
    %14 = vector.load %arg9[%c0_15, %c24, %c129] : memref<3x72x384xf32, #tpu.memory_space<vmem>>, vector<1x8x128xf32>
    %15 = vector.shape_cast %14 : vector<1x8x128xf32> to vector<8x128xf32>
    %16 = vector.shape_cast %6 : vector<8x128xf32> to vector<1x8x128xf32>
    tpu.vector_store %arg9[%c0_15, %c24, %c129], %16 {strides = array<i32>} : memref<3x72x384xf32, #tpu.memory_space<vmem>>, vector<1x8x128xf32>,
    %c0_16 = arith.constant 0 : index
    %c40 = arith.constant 40 : index
    %c128_17 = arith.constant 128 : index
    %17 = vector.load %arg9[%c0_16, %c40, %c128_17] : memref<3x72x384xf32, #tpu.memory_space<vmem>>, vector<1x8x128xf32>
    %18 = vector.shape_cast %17 : vector<1x8x128xf32> to vector<8x128xf32>
    %19 = vector.shape_cast %6 : vector<8x128xf32> to vector<1x8x128xf32>
    tpu.vector_store %arg9[%c0_16, %c40, %c128_17], %19 {strides = array<i32>} : memref<3x72x384xf32, #tpu.memory_space<vmem>>, vector<1x8x128xf32>,
    %c0_18 = arith.constant 0 : index
    %c8 = arith.constant 8 : index
    %c138 = arith.constant 138 : index
    %20 = vector.load %arg9[%c0_18, %c8, %c138] : memref<3x72x384xf32, #tpu.memory_space<vmem>>, vector<1x8x128xf32>
    %21 = vector.shape_cast %20 : vector<1x8x128xf32> to vector<8x128xf32>
    %22 = vector.shape_cast %8 : vector<8x128xf32> to vector<1x8x128xf32>
    tpu.vector_store %arg9[%c0_18, %c8, %c138], %22 {strides = array<i32>} : memref<3x72x384xf32, #tpu.memory_space<vmem>>, vector<1x8x128xf32>,
    %c0_19 = arith.constant 0 : index
    %c56 = arith.constant 56 : index
    %c128_20 = arith.constant 128 : index
    %23 = vector.load %arg9[%c0_19, %c56, %c128_20] : memref<3x72x384xf32, #tpu.memory_space<vmem>>, vector<1x8x128xf32>
    %24 = vector.shape_cast %23 : vector<1x8x128xf32> to vector<8x128xf32>
    %25 = vector.shape_cast %8 : vector<8x128xf32> to vector<1x8x128xf32>
    tpu.vector_store %arg9[%c0_19, %c56, %c128_20], %25 {strides = array<i32>} : memref<3x72x384xf32, #tpu.memory_space<vmem>>, vector<1x8x128xf32>,
    %c0_21 = arith.constant 0 : index
    %c0_22 = arith.constant 0 : index
    %c139 = arith.constant 139 : index
    %26 = vector.load %arg9[%c0_21, %c0_22, %c139] : memref<3x72x384xf32, #tpu.memory_space<vmem>>, vector<1x8x128xf32>
    %27 = vector.shape_cast %26 : vector<1x8x128xf32> to vector<8x128xf32>
    %28 = vector.shape_cast %10 : vector<8x128xf32> to vector<1x8x128xf32>
    tpu.vector_store %arg9[%c0_21, %c0_22, %c139], %28 {strides = array<i32>} : memref<3x72x384xf32, #tpu.memory_space<vmem>>, vector<1x8x128xf32>,
    %c0_23 = arith.constant 0 : index
    %c16 = arith.constant 16 : index
    %c138_24 = arith.constant 138 : index
    %29 = vector.load %arg9[%c0_23, %c16, %c138_24] : memref<3x72x384xf32, #tpu.memory_space<vmem>>, vector<1x8x128xf32>
    %30 = vector.shape_cast %29 : vector<1x8x128xf32> to vector<8x128xf32>
    %31 = vector.shape_cast %10 : vector<8x128xf32> to vector<1x8x128xf32>
    tpu.vector_store %arg9[%c0_23, %c16, %c138_24], %31 {strides = array<i32>} : memref<3x72x384xf32, #tpu.memory_space<vmem>>, vector<1x8x128xf32>,
    %c0_25 = arith.constant 0 : index
    %c48 = arith.constant 48 : index
    %c129_26 = arith.constant 129 : index
    %32 = vector.load %arg9[%c0_25, %c48, %c129_26] : memref<3x72x384xf32, #tpu.memory_space<vmem>>, vector<1x8x128xf32>
    %33 = vector.shape_cast %32 : vector<1x8x128xf32> to vector<8x128xf32>
    %34 = vector.shape_cast %10 : vector<8x128xf32> to vector<1x8x128xf32>
    tpu.vector_store %arg9[%c0_25, %c48, %c129_26], %34 {strides = array<i32>} : memref<3x72x384xf32, #tpu.memory_space<vmem>>, vector<1x8x128xf32>,
    %c0_27 = arith.constant 0 : index
    %c64 = arith.constant 64 : index
    %c128_28 = arith.constant 128 : index
    %35 = vector.load %arg9[%c0_27, %c64, %c128_28] : memref<3x72x384xf32, #tpu.memory_space<vmem>>, vector<1x8x128xf32>
    %36 = vector.shape_cast %35 : vector<1x8x128xf32> to vector<8x128xf32>
    %37 = vector.shape_cast %10 : vector<8x128xf32> to vector<1x8x128xf32>
    tpu.vector_store %arg9[%c0_27, %c64, %c128_28], %37 {strides = array<i32>} : memref<3x72x384xf32, #tpu.memory_space<vmem>>, vector<1x8x128xf32>,
    %c0_29 = arith.constant 0 : index
    %c0_30 = arith.constant 0 : index
    %c0_31 = arith.constant 0 : index
    %38 = vector.load %arg3[%c0_29, %c0_30, %c0_31] : memref<5x8x72xf32, #tpu.memory_space<vmem>>, vector<1x8x72xf32>
    %39 = vector.shape_cast %38 : vector<1x8x72xf32> to vector<8x72xf32>
    %c0_32 = arith.constant 0 : index
    %c0_33 = arith.constant 0 : index
    %c128_34 = arith.constant 128 : index
    %40 = vector.load %arg9[%c0_32, %c0_33, %c128_34] : memref<3x72x384xf32, #tpu.memory_space<vmem>>, vector<1x72x128xf32>
    %41 = vector.shape_cast %40 : vector<1x72x128xf32> to vector<72x128xf32>
    %cst_35 = arith.constant dense<0.000000e+00> : vector<8x128xf32>
    %42 = tpu.matmul %39, %41, %cst_35 {dimension_numbers = #tpu.dot_dimension_numbers<[1], [0], [0], [1], [0, 0, 1, 1], [], []>} : vector<8x72xf32>, vector<72x128xf32>, vector<8x128xf32> -> vector<8x128xf32>
    %cst_36 = arith.constant 0.000000e+00 : f32
    %43 = vector.broadcast %cst_36 : f32 to vector<8x128xf32>
    %44 = arith.select %2, %42, %43 : vector<8x128xi1>, vector<8x128xf32>
    %c1_37 = arith.constant 1 : index
    %c0_38 = arith.constant 0 : index
    %c139_39 = arith.constant 139 : index
    %45 = vector.load %arg9[%c1_37, %c0_38, %c139_39] : memref<3x72x384xf32, #tpu.memory_space<vmem>>, vector<1x8x128xf32>
    %46 = vector.shape_cast %45 : vector<1x8x128xf32> to vector<8x128xf32>
    %47 = vector.shape_cast %44 : vector<8x128xf32> to vector<1x8x128xf32>
    tpu.vector_store %arg9[%c1_37, %c0_38, %c139_39], %47 {strides = array<i32>} : memref<3x72x384xf32, #tpu.memory_space<vmem>>, vector<1x8x128xf32>,
    %c1_40 = arith.constant 1 : index
    %c8_41 = arith.constant 8 : index
    %c138_42 = arith.constant 138 : index
    %48 = vector.load %arg9[%c1_40, %c8_41, %c138_42] : memref<3x72x384xf32, #tpu.memory_space<vmem>>, vector<1x8x128xf32>
    %49 = vector.shape_cast %48 : vector<1x8x128xf32> to vector<8x128xf32>
    %50 = vector.shape_cast %44 : vector<8x128xf32> to vector<1x8x128xf32>
    tpu.vector_store %arg9[%c1_40, %c8_41, %c138_42], %50 {strides = array<i32>} : memref<3x72x384xf32, #tpu.memory_space<vmem>>, vector<1x8x128xf32>,
    %c1_43 = arith.constant 1 : index
    %c16_44 = arith.constant 16 : index
    %c137 = arith.constant 137 : index
    %51 = vector.load %arg9[%c1_43, %c16_44, %c137] : memref<3x72x384xf32, #tpu.memory_space<vmem>>, vector<1x8x128xf32>
    %52 = vector.shape_cast %51 : vector<1x8x128xf32> to vector<8x128xf32>
    %53 = vector.shape_cast %44 : vector<8x128xf32> to vector<1x8x128xf32>
    tpu.vector_store %arg9[%c1_43, %c16_44, %c137], %53 {strides = array<i32>} : memref<3x72x384xf32, #tpu.memory_space<vmem>>, vector<1x8x128xf32>,
    %c1_45 = arith.constant 1 : index
    %c24_46 = arith.constant 24 : index
    %c129_47 = arith.constant 129 : index
    %54 = vector.load %arg9[%c1_45, %c24_46, %c129_47] : memref<3x72x384xf32, #tpu.memory_space<vmem>>, vector<1x8x128xf32>
    %55 = vector.shape_cast %54 : vector<1x8x128xf32> to vector<8x128xf32>
    %56 = vector.shape_cast %44 : vector<8x128xf32> to vector<1x8x128xf32>
    tpu.vector_store %arg9[%c1_45, %c24_46, %c129_47], %56 {strides = array<i32>} : memref<3x72x384xf32, #tpu.memory_space<vmem>>, vector<1x8x128xf32>,
    %c1_48 = arith.constant 1 : index
    %c32_49 = arith.constant 32 : index
    %c128_50 = arith.constant 128 : index
    %57 = vector.load %arg9[%c1_48, %c32_49, %c128_50] : memref<3x72x384xf32, #tpu.memory_space<vmem>>, vector<1x8x128xf32>
    %58 = vector.shape_cast %57 : vector<1x8x128xf32> to vector<8x128xf32>
    %59 = vector.shape_cast %44 : vector<8x128xf32> to vector<1x8x128xf32>
    tpu.vector_store %arg9[%c1_48, %c32_49, %c128_50], %59 {strides = array<i32>} : memref<3x72x384xf32, #tpu.memory_space<vmem>>, vector<1x8x128xf32>,
    %c1_51 = arith.constant 1 : index
    %c40_52 = arith.constant 40 : index
    %c127 = arith.constant 127 : index
    %60 = vector.load %arg9[%c1_51, %c40_52, %c127] : memref<3x72x384xf32, #tpu.memory_space<vmem>>, vector<1x8x128xf32>
    %61 = vector.shape_cast %60 : vector<1x8x128xf32> to vector<8x128xf32>
    %62 = vector.shape_cast %44 : vector<8x128xf32> to vector<1x8x128xf32>
    tpu.vector_store %arg9[%c1_51, %c40_52, %c127], %62 {strides = array<i32>} : memref<3x72x384xf32, #tpu.memory_space<vmem>>, vector<1x8x128xf32>,
    %c1_53 = arith.constant 1 : index
    %c48_54 = arith.constant 48 : index
    %c119 = arith.constant 119 : index
    %63 = vector.load %arg9[%c1_53, %c48_54, %c119] : memref<3x72x384xf32, #tpu.memory_space<vmem>>, vector<1x8x128xf32>
    %64 = vector.shape_cast %63 : vector<1x8x128xf32> to vector<8x128xf32>
    %65 = vector.shape_cast %44 : vector<8x128xf32> to vector<1x8x128xf32>
    tpu.vector_store %arg9[%c1_53, %c48_54, %c119], %65 {strides = array<i32>} : memref<3x72x384xf32, #tpu.memory_space<vmem>>, vector<1x8x128xf32>,
    %c1_55 = arith.constant 1 : index
    %c56_56 = arith.constant 56 : index
    %c118 = arith.constant 118 : index
    %66 = vector.load %arg9[%c1_55, %c56_56, %c118] : memref<3x72x384xf32, #tpu.memory_space<vmem>>, vector<1x8x128xf32>
    %67 = vector.shape_cast %66 : vector<1x8x128xf32> to vector<8x128xf32>
    %68 = vector.shape_cast %44 : vector<8x128xf32> to vector<1x8x128xf32>
    tpu.vector_store %arg9[%c1_55, %c56_56, %c118], %68 {strides = array<i32>} : memref<3x72x384xf32, #tpu.memory_space<vmem>>, vector<1x8x128xf32>,
    %c1_57 = arith.constant 1 : index
    %c64_58 = arith.constant 64 : index
    %c117 = arith.constant 117 : index
    %69 = vector.load %arg9[%c1_57, %c64_58, %c117] : memref<3x72x384xf32, #tpu.memory_space<vmem>>, vector<1x8x128xf32>
    %70 = vector.shape_cast %69 : vector<1x8x128xf32> to vector<8x128xf32>
    %71 = vector.shape_cast %44 : vector<8x128xf32> to vector<1x8x128xf32>
    tpu.vector_store %arg9[%c1_57, %c64_58, %c117], %71 {strides = array<i32>} : memref<3x72x384xf32, #tpu.memory_space<vmem>>, vector<1x8x128xf32>,
    %c0_59 = arith.constant 0 : index
    %c0_60 = arith.constant 0 : index
    %c0_61 = arith.constant 0 : index
    %72 = vector.load %arg4[%c0_59, %c0_60, %c0_61] : memref<5x8x72xf32, #tpu.memory_space<vmem>>, vector<1x8x72xf32>
    %73 = vector.shape_cast %72 : vector<1x8x72xf32> to vector<8x72xf32>
    %c1_62 = arith.constant 1 : index
    %c0_63 = arith.constant 0 : index
    %c128_64 = arith.constant 128 : index
    %74 = vector.load %arg9[%c1_62, %c0_63, %c128_64] : memref<3x72x384xf32, #tpu.memory_space<vmem>>, vector<1x72x128xf32>
    %75 = vector.shape_cast %74 : vector<1x72x128xf32> to vector<72x128xf32>
    %cst_65 = arith.constant dense<0.000000e+00> : vector<8x128xf32>
    %76 = tpu.matmul %73, %75, %cst_65 {dimension_numbers = #tpu.dot_dimension_numbers<[1], [0], [0], [1], [0, 0, 1, 1], [], []>} : vector<8x72xf32>, vector<72x128xf32>, vector<8x128xf32> -> vector<8x128xf32>
    %c0_66 = arith.constant 0 : index
    %c0_67 = arith.constant 0 : index
    %c0_68 = arith.constant 0 : index
    %c0_69 = arith.constant 0 : index
    %77 = vector.load %arg5[%c0_66, %c0_67, %c0_68, %c0_69] : memref<5x3x8x1xf32, #tpu.memory_space<vmem>>, vector<1x1x8x1xf32>
    %78 = vector.shape_cast %77 : vector<1x1x8x1xf32> to vector<8x1xf32>
    %79 = vector.broadcast %78 : vector<8x1xf32> to vector<8x128xf32>
    %80 = arith.addf %76, %79 : vector<8x128xf32>
    %c0_70 = arith.constant 0 : index
    %c1_71 = arith.constant 1 : index
    %c0_72 = arith.constant 0 : index
    %c0_73 = arith.constant 0 : index
    %81 = vector.load %arg5[%c0_70, %c1_71, %c0_72, %c0_73] : memref<5x3x8x1xf32, #tpu.memory_space<vmem>>, vector<1x1x8x1xf32>
    %82 = vector.shape_cast %81 : vector<1x1x8x1xf32> to vector<8x1xf32>
    %83 = vector.broadcast %82 : vector<8x1xf32> to vector<8x128xf32>
    %84 = arith.mulf %80, %83 : vector<8x128xf32>
    %c0_74 = arith.constant 0 : index
    %c2_75 = arith.constant 2 : index
    %c0_76 = arith.constant 0 : index
    %c0_77 = arith.constant 0 : index
    %85 = vector.load %arg5[%c0_74, %c2_75, %c0_76, %c0_77] : memref<5x3x8x1xf32, #tpu.memory_space<vmem>>, vector<1x1x8x1xf32>
    %86 = vector.shape_cast %85 : vector<1x1x8x1xf32> to vector<8x1xf32>
    %87 = vector.broadcast %86 : vector<8x1xf32> to vector<8x128xf32>
    %88 = arith.addf %84, %87 : vector<8x128xf32>
    %89 = arith.maximumf %44, %88 : vector<8x128xf32>
    %cst_78 = arith.constant 0.000000e+00 : f32
    %90 = vector.broadcast %cst_78 : f32 to vector<8x128xf32>
    %91 = arith.select %2, %89, %90 : vector<8x128xi1>, vector<8x128xf32>
    %c1_79 = arith.constant 1 : index
    %c0_80 = arith.constant 0 : index
    %c139_81 = arith.constant 139 : index
    %92 = vector.load %arg9[%c1_79, %c0_80, %c139_81] : memref<3x72x384xf32, #tpu.memory_space<vmem>>, vector<1x8x128xf32>
    %93 = vector.shape_cast %92 : vector<1x8x128xf32> to vector<8x128xf32>
    %94 = vector.shape_cast %91 : vector<8x128xf32> to vector<1x8x128xf32>
    tpu.vector_store %arg9[%c1_79, %c0_80, %c139_81], %94 {strides = array<i32>} : memref<3x72x384xf32, #tpu.memory_space<vmem>>, vector<1x8x128xf32>,
    %c1_82 = arith.constant 1 : index
    %c8_83 = arith.constant 8 : index
    %c138_84 = arith.constant 138 : index
    %95 = vector.load %arg9[%c1_82, %c8_83, %c138_84] : memref<3x72x384xf32, #tpu.memory_space<vmem>>, vector<1x8x128xf32>
    %96 = vector.shape_cast %95 : vector<1x8x128xf32> to vector<8x128xf32>
    %97 = vector.shape_cast %91 : vector<8x128xf32> to vector<1x8x128xf32>
    tpu.vector_store %arg9[%c1_82, %c8_83, %c138_84], %97 {strides = array<i32>} : memref<3x72x384xf32, #tpu.memory_space<vmem>>, vector<1x8x128xf32>,
    %c1_85 = arith.constant 1 : index
    %c16_86 = arith.constant 16 : index
    %c137_87 = arith.constant 137 : index
    %98 = vector.load %arg9[%c1_85, %c16_86, %c137_87] : memref<3x72x384xf32, #tpu.memory_space<vmem>>, vector<1x8x128xf32>
    %99 = vector.shape_cast %98 : vector<1x8x128xf32> to vector<8x128xf32>
    %100 = vector.shape_cast %91 : vector<8x128xf32> to vector<1x8x128xf32>
    tpu.vector_store %arg9[%c1_85, %c16_86, %c137_87], %100 {strides = array<i32>} : memref<3x72x384xf32, #tpu.memory_space<vmem>>, vector<1x8x128xf32>,
    %c1_88 = arith.constant 1 : index
    %c24_89 = arith.constant 24 : index
    %c129_90 = arith.constant 129 : index
    %101 = vector.load %arg9[%c1_88, %c24_89, %c129_90] : memref<3x72x384xf32, #tpu.memory_space<vmem>>, vector<1x8x128xf32>
    %102 = vector.shape_cast %101 : vector<1x8x128xf32> to vector<8x128xf32>
    %103 = vector.shape_cast %91 : vector<8x128xf32> to vector<1x8x128xf32>
    tpu.vector_store %arg9[%c1_88, %c24_89, %c129_90], %103 {strides = array<i32>} : memref<3x72x384xf32, #tpu.memory_space<vmem>>, vector<1x8x128xf32>,
    %c1_91 = arith.constant 1 : index
    %c32_92 = arith.constant 32 : index
    %c128_93 = arith.constant 128 : index
    %104 = vector.load %arg9[%c1_91, %c32_92, %c128_93] : memref<3x72x384xf32, #tpu.memory_space<vmem>>, vector<1x8x128xf32>
    %105 = vector.shape_cast %104 : vector<1x8x128xf32> to vector<8x128xf32>
    %106 = vector.shape_cast %91 : vector<8x128xf32> to vector<1x8x128xf32>
    tpu.vector_store %arg9[%c1_91, %c32_92, %c128_93], %106 {strides = array<i32>} : memref<3x72x384xf32, #tpu.memory_space<vmem>>, vector<1x8x128xf32>,
    %c1_94 = arith.constant 1 : index
    %c40_95 = arith.constant 40 : index
    %c127_96 = arith.constant 127 : index
    %107 = vector.load %arg9[%c1_94, %c40_95, %c127_96] : memref<3x72x384xf32, #tpu.memory_space<vmem>>, vector<1x8x128xf32>
    %108 = vector.shape_cast %107 : vector<1x8x128xf32> to vector<8x128xf32>
    %109 = vector.shape_cast %91 : vector<8x128xf32> to vector<1x8x128xf32>
    tpu.vector_store %arg9[%c1_94, %c40_95, %c127_96], %109 {strides = array<i32>} : memref<3x72x384xf32, #tpu.memory_space<vmem>>, vector<1x8x128xf32>,
    %c1_97 = arith.constant 1 : index
    %c48_98 = arith.constant 48 : index
    %c119_99 = arith.constant 119 : index
    %110 = vector.load %arg9[%c1_97, %c48_98, %c119_99] : memref<3x72x384xf32, #tpu.memory_space<vmem>>, vector<1x8x128xf32>
    %111 = vector.shape_cast %110 : vector<1x8x128xf32> to vector<8x128xf32>
    %112 = vector.shape_cast %91 : vector<8x128xf32> to vector<1x8x128xf32>
    tpu.vector_store %arg9[%c1_97, %c48_98, %c119_99], %112 {strides = array<i32>} : memref<3x72x384xf32, #tpu.memory_space<vmem>>, vector<1x8x128xf32>,
    %c1_100 = arith.constant 1 : index
    %c56_101 = arith.constant 56 : index
    %c118_102 = arith.constant 118 : index
    %113 = vector.load %arg9[%c1_100, %c56_101, %c118_102] : memref<3x72x384xf32, #tpu.memory_space<vmem>>, vector<1x8x128xf32>
    %114 = vector.shape_cast %113 : vector<1x8x128xf32> to vector<8x128xf32>
    %115 = vector.shape_cast %91 : vector<8x128xf32> to vector<1x8x128xf32>
    tpu.vector_store %arg9[%c1_100, %c56_101, %c118_102], %115 {strides = array<i32>} : memref<3x72x384xf32, #tpu.memory_space<vmem>>, vector<1x8x128xf32>,
    %c1_103 = arith.constant 1 : index
    %c64_104 = arith.constant 64 : index
    %c117_105 = arith.constant 117 : index
    %116 = vector.load %arg9[%c1_103, %c64_104, %c117_105] : memref<3x72x384xf32, #tpu.memory_space<vmem>>, vector<1x8x128xf32>
    %117 = vector.shape_cast %116 : vector<1x8x128xf32> to vector<8x128xf32>
    %118 = vector.shape_cast %91 : vector<8x128xf32> to vector<1x8x128xf32>
    tpu.vector_store %arg9[%c1_103, %c64_104, %c117_105], %118 {strides = array<i32>} : memref<3x72x384xf32, #tpu.memory_space<vmem>>, vector<1x8x128xf32>,
    %c1_106 = arith.constant 1 : index
    %c0_107 = arith.constant 0 : index
    %c0_108 = arith.constant 0 : index
    %119 = vector.load %arg3[%c1_106, %c0_107, %c0_108] : memref<5x8x72xf32, #tpu.memory_space<vmem>>, vector<1x8x72xf32>
    %120 = vector.shape_cast %119 : vector<1x8x72xf32> to vector<8x72xf32>
    %c1_109 = arith.constant 1 : index
    %c0_110 = arith.constant 0 : index
    %c128_111 = arith.constant 128 : index
    %121 = vector.load %arg9[%c1_109, %c0_110, %c128_111] : memref<3x72x384xf32, #tpu.memory_space<vmem>>, vector<1x72x128xf32>
    %122 = vector.shape_cast %121 : vector<1x72x128xf32> to vector<72x128xf32>
    %cst_112 = arith.constant dense<0.000000e+00> : vector<8x128xf32>
    %123 = tpu.matmul %120, %122, %cst_112 {dimension_numbers = #tpu.dot_dimension_numbers<[1], [0], [0], [1], [0, 0, 1, 1], [], []>} : vector<8x72xf32>, vector<72x128xf32>, vector<8x128xf32> -> vector<8x128xf32>
    %cst_113 = arith.constant 0.000000e+00 : f32
    %124 = vector.broadcast %cst_113 : f32 to vector<8x128xf32>
    %125 = arith.select %2, %123, %124 : vector<8x128xi1>, vector<8x128xf32>
    %c2_114 = arith.constant 2 : index
    %c0_115 = arith.constant 0 : index
    %c139_116 = arith.constant 139 : index
    %126 = vector.load %arg9[%c2_114, %c0_115, %c139_116] : memref<3x72x384xf32, #tpu.memory_space<vmem>>, vector<1x8x128xf32>
    %127 = vector.shape_cast %126 : vector<1x8x128xf32> to vector<8x128xf32>
    %128 = vector.shape_cast %125 : vector<8x128xf32> to vector<1x8x128xf32>
    tpu.vector_store %arg9[%c2_114, %c0_115, %c139_116], %128 {strides = array<i32>} : memref<3x72x384xf32, #tpu.memory_space<vmem>>, vector<1x8x128xf32>,
    %c2_117 = arith.constant 2 : index
    %c8_118 = arith.constant 8 : index
    %c138_119 = arith.constant 138 : index
    %129 = vector.load %arg9[%c2_117, %c8_118, %c138_119] : memref<3x72x384xf32, #tpu.memory_space<vmem>>, vector<1x8x128xf32>
    %130 = vector.shape_cast %129 : vector<1x8x128xf32> to vector<8x128xf32>
    %131 = vector.shape_cast %125 : vector<8x128xf32> to vector<1x8x128xf32>
    tpu.vector_store %arg9[%c2_117, %c8_118, %c138_119], %131 {strides = array<i32>} : memref<3x72x384xf32, #tpu.memory_space<vmem>>, vector<1x8x128xf32>,
    %c2_120 = arith.constant 2 : index
    %c16_121 = arith.constant 16 : index
    %c137_122 = arith.constant 137 : index
    %132 = vector.load %arg9[%c2_120, %c16_121, %c137_122] : memref<3x72x384xf32, #tpu.memory_space<vmem>>, vector<1x8x128xf32>
    %133 = vector.shape_cast %132 : vector<1x8x128xf32> to vector<8x128xf32>
    %134 = vector.shape_cast %125 : vector<8x128xf32> to vector<1x8x128xf32>
    tpu.vector_store %arg9[%c2_120, %c16_121, %c137_122], %134 {strides = array<i32>} : memref<3x72x384xf32, #tpu.memory_space<vmem>>, vector<1x8x128xf32>,
    %c2_123 = arith.constant 2 : index
    %c24_124 = arith.constant 24 : index
    %c129_125 = arith.constant 129 : index
    %135 = vector.load %arg9[%c2_123, %c24_124, %c129_125] : memref<3x72x384xf32, #tpu.memory_space<vmem>>, vector<1x8x128xf32>
    %136 = vector.shape_cast %135 : vector<1x8x128xf32> to vector<8x128xf32>
    %137 = vector.shape_cast %125 : vector<8x128xf32> to vector<1x8x128xf32>
    tpu.vector_store %arg9[%c2_123, %c24_124, %c129_125], %137 {strides = array<i32>} : memref<3x72x384xf32, #tpu.memory_space<vmem>>, vector<1x8x128xf32>,
    %c2_126 = arith.constant 2 : index
    %c32_127 = arith.constant 32 : index
    %c128_128 = arith.constant 128 : index
    %138 = vector.load %arg9[%c2_126, %c32_127, %c128_128] : memref<3x72x384xf32, #tpu.memory_space<vmem>>, vector<1x8x128xf32>
    %139 = vector.shape_cast %138 : vector<1x8x128xf32> to vector<8x128xf32>
    %140 = vector.shape_cast %125 : vector<8x128xf32> to vector<1x8x128xf32>
    tpu.vector_store %arg9[%c2_126, %c32_127, %c128_128], %140 {strides = array<i32>} : memref<3x72x384xf32, #tpu.memory_space<vmem>>, vector<1x8x128xf32>,
    %c2_129 = arith.constant 2 : index
    %c40_130 = arith.constant 40 : index
    %c127_131 = arith.constant 127 : index
    %141 = vector.load %arg9[%c2_129, %c40_130, %c127_131] : memref<3x72x384xf32, #tpu.memory_space<vmem>>, vector<1x8x128xf32>
    %142 = vector.shape_cast %141 : vector<1x8x128xf32> to vector<8x128xf32>
    %143 = vector.shape_cast %125 : vector<8x128xf32> to vector<1x8x128xf32>
    tpu.vector_store %arg9[%c2_129, %c40_130, %c127_131], %143 {strides = array<i32>} : memref<3x72x384xf32, #tpu.memory_space<vmem>>, vector<1x8x128xf32>,
    %c2_132 = arith.constant 2 : index
    %c48_133 = arith.constant 48 : index
    %c119_134 = arith.constant 119 : index
    %144 = vector.load %arg9[%c2_132, %c48_133, %c119_134] : memref<3x72x384xf32, #tpu.memory_space<vmem>>, vector<1x8x128xf32>
    %145 = vector.shape_cast %144 : vector<1x8x128xf32> to vector<8x128xf32>
    %146 = vector.shape_cast %125 : vector<8x128xf32> to vector<1x8x128xf32>
    tpu.vector_store %arg9[%c2_132, %c48_133, %c119_134], %146 {strides = array<i32>} : memref<3x72x384xf32, #tpu.memory_space<vmem>>, vector<1x8x128xf32>,
    %c2_135 = arith.constant 2 : index
    %c56_136 = arith.constant 56 : index
    %c118_137 = arith.constant 118 : index
    %147 = vector.load %arg9[%c2_135, %c56_136, %c118_137] : memref<3x72x384xf32, #tpu.memory_space<vmem>>, vector<1x8x128xf32>
    %148 = vector.shape_cast %147 : vector<1x8x128xf32> to vector<8x128xf32>
    %149 = vector.shape_cast %125 : vector<8x128xf32> to vector<1x8x128xf32>
    tpu.vector_store %arg9[%c2_135, %c56_136, %c118_137], %149 {strides = array<i32>} : memref<3x72x384xf32, #tpu.memory_space<vmem>>, vector<1x8x128xf32>,
    %c2_138 = arith.constant 2 : index
    %c64_139 = arith.constant 64 : index
    %c117_140 = arith.constant 117 : index
    %150 = vector.load %arg9[%c2_138, %c64_139, %c117_140] : memref<3x72x384xf32, #tpu.memory_space<vmem>>, vector<1x8x128xf32>
    %151 = vector.shape_cast %150 : vector<1x8x128xf32> to vector<8x128xf32>
    %152 = vector.shape_cast %125 : vector<8x128xf32> to vector<1x8x128xf32>
    tpu.vector_store %arg9[%c2_138, %c64_139, %c117_140], %152 {strides = array<i32>} : memref<3x72x384xf32, #tpu.memory_space<vmem>>, vector<1x8x128xf32>,
    %c1_141 = arith.constant 1 : index
    %c0_142 = arith.constant 0 : index
    %c0_143 = arith.constant 0 : index
    %153 = vector.load %arg4[%c1_141, %c0_142, %c0_143] : memref<5x8x72xf32, #tpu.memory_space<vmem>>, vector<1x8x72xf32>
    %154 = vector.shape_cast %153 : vector<1x8x72xf32> to vector<8x72xf32>
    %c2_144 = arith.constant 2 : index
    %c0_145 = arith.constant 0 : index
    %c128_146 = arith.constant 128 : index
    %155 = vector.load %arg9[%c2_144, %c0_145, %c128_146] : memref<3x72x384xf32, #tpu.memory_space<vmem>>, vector<1x72x128xf32>
    %156 = vector.shape_cast %155 : vector<1x72x128xf32> to vector<72x128xf32>
    %cst_147 = arith.constant dense<0.000000e+00> : vector<8x128xf32>
    %157 = tpu.matmul %154, %156, %cst_147 {dimension_numbers = #tpu.dot_dimension_numbers<[1], [0], [0], [1], [0, 0, 1, 1], [], []>} : vector<8x72xf32>, vector<72x128xf32>, vector<8x128xf32> -> vector<8x128xf32>
    %c1_148 = arith.constant 1 : index
    %c0_149 = arith.constant 0 : index
    %c0_150 = arith.constant 0 : index
    %c0_151 = arith.constant 0 : index
    %158 = vector.load %arg5[%c1_148, %c0_149, %c0_150, %c0_151] : memref<5x3x8x1xf32, #tpu.memory_space<vmem>>, vector<1x1x8x1xf32>
    %159 = vector.shape_cast %158 : vector<1x1x8x1xf32> to vector<8x1xf32>
    %160 = vector.broadcast %159 : vector<8x1xf32> to vector<8x128xf32>
    %161 = arith.addf %157, %160 : vector<8x128xf32>
    %c1_152 = arith.constant 1 : index
    %c1_153 = arith.constant 1 : index
    %c0_154 = arith.constant 0 : index
    %c0_155 = arith.constant 0 : index
    %162 = vector.load %arg5[%c1_152, %c1_153, %c0_154, %c0_155] : memref<5x3x8x1xf32, #tpu.memory_space<vmem>>, vector<1x1x8x1xf32>
    %163 = vector.shape_cast %162 : vector<1x1x8x1xf32> to vector<8x1xf32>
    %164 = vector.broadcast %163 : vector<8x1xf32> to vector<8x128xf32>
    %165 = arith.mulf %161, %164 : vector<8x128xf32>
    %c1_156 = arith.constant 1 : index
    %c2_157 = arith.constant 2 : index
    %c0_158 = arith.constant 0 : index
    %c0_159 = arith.constant 0 : index
    %166 = vector.load %arg5[%c1_156, %c2_157, %c0_158, %c0_159] : memref<5x3x8x1xf32, #tpu.memory_space<vmem>>, vector<1x1x8x1xf32>
    %167 = vector.shape_cast %166 : vector<1x1x8x1xf32> to vector<8x1xf32>
    %168 = vector.broadcast %167 : vector<8x1xf32> to vector<8x128xf32>
    %169 = arith.addf %165, %168 : vector<8x128xf32>
    %170 = arith.maximumf %125, %169 : vector<8x128xf32>
    %cst_160 = arith.constant 0.000000e+00 : f32
    %171 = vector.broadcast %cst_160 : f32 to vector<8x128xf32>
    %172 = arith.select %2, %170, %171 : vector<8x128xi1>, vector<8x128xf32>
    %c2_161 = arith.constant 2 : index
    %c0_162 = arith.constant 0 : index
    %c139_163 = arith.constant 139 : index
    %173 = vector.load %arg9[%c2_161, %c0_162, %c139_163] : memref<3x72x384xf32, #tpu.memory_space<vmem>>, vector<1x8x128xf32>
    %174 = vector.shape_cast %173 : vector<1x8x128xf32> to vector<8x128xf32>
    %175 = vector.shape_cast %172 : vector<8x128xf32> to vector<1x8x128xf32>
    tpu.vector_store %arg9[%c2_161, %c0_162, %c139_163], %175 {strides = array<i32>} : memref<3x72x384xf32, #tpu.memory_space<vmem>>, vector<1x8x128xf32>,
    %c2_164 = arith.constant 2 : index
    %c8_165 = arith.constant 8 : index
    %c138_166 = arith.constant 138 : index
    %176 = vector.load %arg9[%c2_164, %c8_165, %c138_166] : memref<3x72x384xf32, #tpu.memory_space<vmem>>, vector<1x8x128xf32>
    %177 = vector.shape_cast %176 : vector<1x8x128xf32> to vector<8x128xf32>
    %178 = vector.shape_cast %172 : vector<8x128xf32> to vector<1x8x128xf32>
    tpu.vector_store %arg9[%c2_164, %c8_165, %c138_166], %178 {strides = array<i32>} : memref<3x72x384xf32, #tpu.memory_space<vmem>>, vector<1x8x128xf32>,
    %c2_167 = arith.constant 2 : index
    %c16_168 = arith.constant 16 : index
    %c137_169 = arith.constant 137 : index
    %179 = vector.load %arg9[%c2_167, %c16_168, %c137_169] : memref<3x72x384xf32, #tpu.memory_space<vmem>>, vector<1x8x128xf32>
    %180 = vector.shape_cast %179 : vector<1x8x128xf32> to vector<8x128xf32>
    %181 = vector.shape_cast %172 : vector<8x128xf32> to vector<1x8x128xf32>
    tpu.vector_store %arg9[%c2_167, %c16_168, %c137_169], %181 {strides = array<i32>} : memref<3x72x384xf32, #tpu.memory_space<vmem>>, vector<1x8x128xf32>,
    %c2_170 = arith.constant 2 : index
    %c24_171 = arith.constant 24 : index
    %c129_172 = arith.constant 129 : index
    %182 = vector.load %arg9[%c2_170, %c24_171, %c129_172] : memref<3x72x384xf32, #tpu.memory_space<vmem>>, vector<1x8x128xf32>
    %183 = vector.shape_cast %182 : vector<1x8x128xf32> to vector<8x128xf32>
    %184 = vector.shape_cast %172 : vector<8x128xf32> to vector<1x8x128xf32>
    tpu.vector_store %arg9[%c2_170, %c24_171, %c129_172], %184 {strides = array<i32>} : memref<3x72x384xf32, #tpu.memory_space<vmem>>, vector<1x8x128xf32>,
    %c2_173 = arith.constant 2 : index
    %c32_174 = arith.constant 32 : index
    %c128_175 = arith.constant 128 : index
    %185 = vector.load %arg9[%c2_173, %c32_174, %c128_175] : memref<3x72x384xf32, #tpu.memory_space<vmem>>, vector<1x8x128xf32>
    %186 = vector.shape_cast %185 : vector<1x8x128xf32> to vector<8x128xf32>
    %187 = vector.shape_cast %172 : vector<8x128xf32> to vector<1x8x128xf32>
    tpu.vector_store %arg9[%c2_173, %c32_174, %c128_175], %187 {strides = array<i32>} : memref<3x72x384xf32, #tpu.memory_space<vmem>>, vector<1x8x128xf32>,
    %c2_176 = arith.constant 2 : index
    %c40_177 = arith.constant 40 : index
    %c127_178 = arith.constant 127 : index
    %188 = vector.load %arg9[%c2_176, %c40_177, %c127_178] : memref<3x72x384xf32, #tpu.memory_space<vmem>>, vector<1x8x128xf32>
    %189 = vector.shape_cast %188 : vector<1x8x128xf32> to vector<8x128xf32>
    %190 = vector.shape_cast %172 : vector<8x128xf32> to vector<1x8x128xf32>
    tpu.vector_store %arg9[%c2_176, %c40_177, %c127_178], %190 {strides = array<i32>} : memref<3x72x384xf32, #tpu.memory_space<vmem>>, vector<1x8x128xf32>,
    %c2_179 = arith.constant 2 : index
    %c48_180 = arith.constant 48 : index
    %c119_181 = arith.constant 119 : index
    %191 = vector.load %arg9[%c2_179, %c48_180, %c119_181] : memref<3x72x384xf32, #tpu.memory_space<vmem>>, vector<1x8x128xf32>
    %192 = vector.shape_cast %191 : vector<1x8x128xf32> to vector<8x128xf32>
    %193 = vector.shape_cast %172 : vector<8x128xf32> to vector<1x8x128xf32>
    tpu.vector_store %arg9[%c2_179, %c48_180, %c119_181], %193 {strides = array<i32>} : memref<3x72x384xf32, #tpu.memory_space<vmem>>, vector<1x8x128xf32>,
    %c2_182 = arith.constant 2 : index
    %c56_183 = arith.constant 56 : index
    %c118_184 = arith.constant 118 : index
    %194 = vector.load %arg9[%c2_182, %c56_183, %c118_184] : memref<3x72x384xf32, #tpu.memory_space<vmem>>, vector<1x8x128xf32>
    %195 = vector.shape_cast %194 : vector<1x8x128xf32> to vector<8x128xf32>
    %196 = vector.shape_cast %172 : vector<8x128xf32> to vector<1x8x128xf32>
    tpu.vector_store %arg9[%c2_182, %c56_183, %c118_184], %196 {strides = array<i32>} : memref<3x72x384xf32, #tpu.memory_space<vmem>>, vector<1x8x128xf32>,
    %c2_185 = arith.constant 2 : index
    %c64_186 = arith.constant 64 : index
    %c117_187 = arith.constant 117 : index
    %197 = vector.load %arg9[%c2_185, %c64_186, %c117_187] : memref<3x72x384xf32, #tpu.memory_space<vmem>>, vector<1x8x128xf32>
    %198 = vector.shape_cast %197 : vector<1x8x128xf32> to vector<8x128xf32>
    %199 = vector.shape_cast %172 : vector<8x128xf32> to vector<1x8x128xf32>
    tpu.vector_store %arg9[%c2_185, %c64_186, %c117_187], %199 {strides = array<i32>} : memref<3x72x384xf32, #tpu.memory_space<vmem>>, vector<1x8x128xf32>,
    %c2_188 = arith.constant 2 : index
    %c0_189 = arith.constant 0 : index
    %c0_190 = arith.constant 0 : index
    %200 = vector.load %arg3[%c2_188, %c0_189, %c0_190] : memref<5x8x72xf32, #tpu.memory_space<vmem>>, vector<1x8x72xf32>
    %201 = vector.shape_cast %200 : vector<1x8x72xf32> to vector<8x72xf32>
    %c2_191 = arith.constant 2 : index
    %c0_192 = arith.constant 0 : index
    %c128_193 = arith.constant 128 : index
    %202 = vector.load %arg9[%c2_191, %c0_192, %c128_193] : memref<3x72x384xf32, #tpu.memory_space<vmem>>, vector<1x72x128xf32>
    %203 = vector.shape_cast %202 : vector<1x72x128xf32> to vector<72x128xf32>
    %cst_194 = arith.constant dense<0.000000e+00> : vector<8x128xf32>
    %204 = tpu.matmul %201, %203, %cst_194 {dimension_numbers = #tpu.dot_dimension_numbers<[1], [0], [0], [1], [0, 0, 1, 1], [], []>} : vector<8x72xf32>, vector<72x128xf32>, vector<8x128xf32> -> vector<8x128xf32>
    %cst_195 = arith.constant 0.000000e+00 : f32
    %205 = vector.broadcast %cst_195 : f32 to vector<8x128xf32>
    %206 = arith.select %2, %204, %205 : vector<8x128xi1>, vector<8x128xf32>
    %c0_196 = arith.constant 0 : index
    %c0_197 = arith.constant 0 : index
    %c139_198 = arith.constant 139 : index
    %207 = vector.load %arg9[%c0_196, %c0_197, %c139_198] : memref<3x72x384xf32, #tpu.memory_space<vmem>>, vector<1x8x128xf32>
    %208 = vector.shape_cast %207 : vector<1x8x128xf32> to vector<8x128xf32>
    %209 = vector.shape_cast %206 : vector<8x128xf32> to vector<1x8x128xf32>
    tpu.vector_store %arg9[%c0_196, %c0_197, %c139_198], %209 {strides = array<i32>} : memref<3x72x384xf32, #tpu.memory_space<vmem>>, vector<1x8x128xf32>,
    %c0_199 = arith.constant 0 : index
    %c8_200 = arith.constant 8 : index
    %c138_201 = arith.constant 138 : index
    %210 = vector.load %arg9[%c0_199, %c8_200, %c138_201] : memref<3x72x384xf32, #tpu.memory_space<vmem>>, vector<1x8x128xf32>
    %211 = vector.shape_cast %210 : vector<1x8x128xf32> to vector<8x128xf32>
    %212 = vector.shape_cast %206 : vector<8x128xf32> to vector<1x8x128xf32>
    tpu.vector_store %arg9[%c0_199, %c8_200, %c138_201], %212 {strides = array<i32>} : memref<3x72x384xf32, #tpu.memory_space<vmem>>, vector<1x8x128xf32>,
    %c0_202 = arith.constant 0 : index
    %c16_203 = arith.constant 16 : index
    %c137_204 = arith.constant 137 : index
    %213 = vector.load %arg9[%c0_202, %c16_203, %c137_204] : memref<3x72x384xf32, #tpu.memory_space<vmem>>, vector<1x8x128xf32>
    %214 = vector.shape_cast %213 : vector<1x8x128xf32> to vector<8x128xf32>
    %215 = vector.shape_cast %206 : vector<8x128xf32> to vector<1x8x128xf32>
    tpu.vector_store %arg9[%c0_202, %c16_203, %c137_204], %215 {strides = array<i32>} : memref<3x72x384xf32, #tpu.memory_space<vmem>>, vector<1x8x128xf32>,
    %c0_205 = arith.constant 0 : index
    %c24_206 = arith.constant 24 : index
    %c129_207 = arith.constant 129 : index
    %216 = vector.load %arg9[%c0_205, %c24_206, %c129_207] : memref<3x72x384xf32, #tpu.memory_space<vmem>>, vector<1x8x128xf32>
    %217 = vector.shape_cast %216 : vector<1x8x128xf32> to vector<8x128xf32>
    %218 = vector.shape_cast %206 : vector<8x128xf32> to vector<1x8x128xf32>
    tpu.vector_store %arg9[%c0_205, %c24_206, %c129_207], %218 {strides = array<i32>} : memref<3x72x384xf32, #tpu.memory_space<vmem>>, vector<1x8x128xf32>,
    %c0_208 = arith.constant 0 : index
    %c32_209 = arith.constant 32 : index
    %c128_210 = arith.constant 128 : index
    %219 = vector.load %arg9[%c0_208, %c32_209, %c128_210] : memref<3x72x384xf32, #tpu.memory_space<vmem>>, vector<1x8x128xf32>
    %220 = vector.shape_cast %219 : vector<1x8x128xf32> to vector<8x128xf32>
    %221 = vector.shape_cast %206 : vector<8x128xf32> to vector<1x8x128xf32>
    tpu.vector_store %arg9[%c0_208, %c32_209, %c128_210], %221 {strides = array<i32>} : memref<3x72x384xf32, #tpu.memory_space<vmem>>, vector<1x8x128xf32>,
    %c0_211 = arith.constant 0 : index
    %c40_212 = arith.constant 40 : index
    %c127_213 = arith.constant 127 : index
    %222 = vector.load %arg9[%c0_211, %c40_212, %c127_213] : memref<3x72x384xf32, #tpu.memory_space<vmem>>, vector<1x8x128xf32>
    %223 = vector.shape_cast %222 : vector<1x8x128xf32> to vector<8x128xf32>
    %224 = vector.shape_cast %206 : vector<8x128xf32> to vector<1x8x128xf32>
    tpu.vector_store %arg9[%c0_211, %c40_212, %c127_213], %224 {strides = array<i32>} : memref<3x72x384xf32, #tpu.memory_space<vmem>>, vector<1x8x128xf32>,
    %c0_214 = arith.constant 0 : index
    %c48_215 = arith.constant 48 : index
    %c119_216 = arith.constant 119 : index
    %225 = vector.load %arg9[%c0_214, %c48_215, %c119_216] : memref<3x72x384xf32, #tpu.memory_space<vmem>>, vector<1x8x128xf32>
    %226 = vector.shape_cast %225 : vector<1x8x128xf32> to vector<8x128xf32>
    %227 = vector.shape_cast %206 : vector<8x128xf32> to vector<1x8x128xf32>
    tpu.vector_store %arg9[%c0_214, %c48_215, %c119_216], %227 {strides = array<i32>} : memref<3x72x384xf32, #tpu.memory_space<vmem>>, vector<1x8x128xf32>,
    %c0_217 = arith.constant 0 : index
    %c56_218 = arith.constant 56 : index
    %c118_219 = arith.constant 118 : index
    %228 = vector.load %arg9[%c0_217, %c56_218, %c118_219] : memref<3x72x384xf32, #tpu.memory_space<vmem>>, vector<1x8x128xf32>
    %229 = vector.shape_cast %228 : vector<1x8x128xf32> to vector<8x128xf32>
    %230 = vector.shape_cast %206 : vector<8x128xf32> to vector<1x8x128xf32>
    tpu.vector_store %arg9[%c0_217, %c56_218, %c118_219], %230 {strides = array<i32>} : memref<3x72x384xf32, #tpu.memory_space<vmem>>, vector<1x8x128xf32>,
    %c0_220 = arith.constant 0 : index
    %c64_221 = arith.constant 64 : index
    %c117_222 = arith.constant 117 : index
    %231 = vector.load %arg9[%c0_220, %c64_221, %c117_222] : memref<3x72x384xf32, #tpu.memory_space<vmem>>, vector<1x8x128xf32>
    %232 = vector.shape_cast %231 : vector<1x8x128xf32> to vector<8x128xf32>
    %233 = vector.shape_cast %206 : vector<8x128xf32> to vector<1x8x128xf32>
    tpu.vector_store %arg9[%c0_220, %c64_221, %c117_222], %233 {strides = array<i32>} : memref<3x72x384xf32, #tpu.memory_space<vmem>>, vector<1x8x128xf32>,
    %c2_223 = arith.constant 2 : index
    %c0_224 = arith.constant 0 : index
    %c0_225 = arith.constant 0 : index
    %234 = vector.load %arg4[%c2_223, %c0_224, %c0_225] : memref<5x8x72xf32, #tpu.memory_space<vmem>>, vector<1x8x72xf32>
    %235 = vector.shape_cast %234 : vector<1x8x72xf32> to vector<8x72xf32>
    %c0_226 = arith.constant 0 : index
    %c0_227 = arith.constant 0 : index
    %c128_228 = arith.constant 128 : index
    %236 = vector.load %arg9[%c0_226, %c0_227, %c128_228] : memref<3x72x384xf32, #tpu.memory_space<vmem>>, vector<1x72x128xf32>
    %237 = vector.shape_cast %236 : vector<1x72x128xf32> to vector<72x128xf32>
    %cst_229 = arith.constant dense<0.000000e+00> : vector<8x128xf32>
    %238 = tpu.matmul %235, %237, %cst_229 {dimension_numbers = #tpu.dot_dimension_numbers<[1], [0], [0], [1], [0, 0, 1, 1], [], []>} : vector<8x72xf32>, vector<72x128xf32>, vector<8x128xf32> -> vector<8x128xf32>
    %c2_230 = arith.constant 2 : index
    %c0_231 = arith.constant 0 : index
    %c0_232 = arith.constant 0 : index
    %c0_233 = arith.constant 0 : index
    %239 = vector.load %arg5[%c2_230, %c0_231, %c0_232, %c0_233] : memref<5x3x8x1xf32, #tpu.memory_space<vmem>>, vector<1x1x8x1xf32>
    %240 = vector.shape_cast %239 : vector<1x1x8x1xf32> to vector<8x1xf32>
    %241 = vector.broadcast %240 : vector<8x1xf32> to vector<8x128xf32>
    %242 = arith.addf %238, %241 : vector<8x128xf32>
    %c2_234 = arith.constant 2 : index
    %c1_235 = arith.constant 1 : index
    %c0_236 = arith.constant 0 : index
    %c0_237 = arith.constant 0 : index
    %243 = vector.load %arg5[%c2_234, %c1_235, %c0_236, %c0_237] : memref<5x3x8x1xf32, #tpu.memory_space<vmem>>, vector<1x1x8x1xf32>
    %244 = vector.shape_cast %243 : vector<1x1x8x1xf32> to vector<8x1xf32>
    %245 = vector.broadcast %244 : vector<8x1xf32> to vector<8x128xf32>
    %246 = arith.mulf %242, %245 : vector<8x128xf32>
    %c2_238 = arith.constant 2 : index
    %c2_239 = arith.constant 2 : index
    %c0_240 = arith.constant 0 : index
    %c0_241 = arith.constant 0 : index
    %247 = vector.load %arg5[%c2_238, %c2_239, %c0_240, %c0_241] : memref<5x3x8x1xf32, #tpu.memory_space<vmem>>, vector<1x1x8x1xf32>
    %248 = vector.shape_cast %247 : vector<1x1x8x1xf32> to vector<8x1xf32>
    %249 = vector.broadcast %248 : vector<8x1xf32> to vector<8x128xf32>
    %250 = arith.addf %246, %249 : vector<8x128xf32>
    %251 = arith.maximumf %206, %250 : vector<8x128xf32>
    %cst_242 = arith.constant 0.000000e+00 : f32
    %252 = vector.broadcast %cst_242 : f32 to vector<8x128xf32>
    %253 = arith.select %2, %251, %252 : vector<8x128xi1>, vector<8x128xf32>
    %c0_243 = arith.constant 0 : index
    %c0_244 = arith.constant 0 : index
    %c0_245 = arith.constant 0 : index
    %254 = vector.load %arg6[%c0_243, %c0_244, %c0_245] : memref<4x8x8xf32, #tpu.memory_space<vmem>>, vector<1x8x8xf32>
    %255 = vector.shape_cast %254 : vector<1x8x8xf32> to vector<8x8xf32>
    %cst_246 = arith.constant dense<0.000000e+00> : vector<8x128xf32>
    %256 = tpu.matmul %255, %253, %cst_246 {dimension_numbers = #tpu.dot_dimension_numbers<[1], [0], [0], [1], [0, 0, 1, 1], [], []>} : vector<8x8xf32>, vector<8x128xf32>, vector<8x128xf32> -> vector<8x128xf32>
    %c0_247 = arith.constant 0 : index
    %c0_248 = arith.constant 0 : index
    %257 = vector.load %arg7[%c0_247, %c0_248] : memref<8x1xf32, #tpu.memory_space<vmem>>, vector<8x1xf32>
    %258 = vector.broadcast %257 : vector<8x1xf32> to vector<8x128xf32>
    %259 = arith.addf %256, %258 : vector<8x128xf32>
    %cst_249 = arith.constant 0.000000e+00 : f32
    %260 = vector.broadcast %cst_249 : f32 to vector<8x128xf32>
    %261 = arith.select %2, %259, %260 : vector<8x128xi1>, vector<8x128xf32>
    %c0_250 = arith.constant 0 : index
    %c32_251 = arith.constant 32 : index
    %c128_252 = arith.constant 128 : index
    %262 = vector.load %arg10[%c0_250, %c32_251, %c128_252] : memref<4x72x384xf32, #tpu.memory_space<vmem>>, vector<1x8x128xf32>
    %263 = vector.shape_cast %262 : vector<1x8x128xf32> to vector<8x128xf32>
    %264 = vector.shape_cast %261 : vector<8x128xf32> to vector<1x8x128xf32>
    tpu.vector_store %arg10[%c0_250, %c32_251, %c128_252], %264 {strides = array<i32>} : memref<4x72x384xf32, #tpu.memory_space<vmem>>, vector<1x8x128xf32>,
    %c1_253 = arith.constant 1 : index
    %c24_254 = arith.constant 24 : index
    %c128_255 = arith.constant 128 : index
    %265 = vector.load %arg10[%c1_253, %c24_254, %c128_255] : memref<4x72x384xf32, #tpu.memory_space<vmem>>, vector<1x8x128xf32>
    %266 = vector.shape_cast %265 : vector<1x8x128xf32> to vector<8x128xf32>
    %267 = vector.shape_cast %261 : vector<8x128xf32> to vector<1x8x128xf32>
    tpu.vector_store %arg10[%c1_253, %c24_254, %c128_255], %267 {strides = array<i32>} : memref<4x72x384xf32, #tpu.memory_space<vmem>>, vector<1x8x128xf32>,
    %c1_256 = arith.constant 1 : index
    %c40_257 = arith.constant 40 : index
    %c127_258 = arith.constant 127 : index
    %268 = vector.load %arg10[%c1_256, %c40_257, %c127_258] : memref<4x72x384xf32, #tpu.memory_space<vmem>>, vector<1x8x128xf32>
    %269 = vector.shape_cast %268 : vector<1x8x128xf32> to vector<8x128xf32>
    %270 = vector.shape_cast %261 : vector<8x128xf32> to vector<1x8x128xf32>
    tpu.vector_store %arg10[%c1_256, %c40_257, %c127_258], %270 {strides = array<i32>} : memref<4x72x384xf32, #tpu.memory_space<vmem>>, vector<1x8x128xf32>,
    %c2_259 = arith.constant 2 : index
    %c8_260 = arith.constant 8 : index
    %c128_261 = arith.constant 128 : index
    %271 = vector.load %arg10[%c2_259, %c8_260, %c128_261] : memref<4x72x384xf32, #tpu.memory_space<vmem>>, vector<1x8x128xf32>
    %272 = vector.shape_cast %271 : vector<1x8x128xf32> to vector<8x128xf32>
    %273 = vector.shape_cast %261 : vector<8x128xf32> to vector<1x8x128xf32>
    tpu.vector_store %arg10[%c2_259, %c8_260, %c128_261], %273 {strides = array<i32>} : memref<4x72x384xf32, #tpu.memory_space<vmem>>, vector<1x8x128xf32>,
    %c3_262 = arith.constant 3 : index
    %c0_263 = arith.constant 0 : index
    %c128_264 = arith.constant 128 : index
    %274 = vector.load %arg10[%c3_262, %c0_263, %c128_264] : memref<4x72x384xf32, #tpu.memory_space<vmem>>, vector<1x8x128xf32>
    %275 = vector.shape_cast %274 : vector<1x8x128xf32> to vector<8x128xf32>
    %276 = vector.shape_cast %261 : vector<8x128xf32> to vector<1x8x128xf32>
    tpu.vector_store %arg10[%c3_262, %c0_263, %c128_264], %276 {strides = array<i32>} : memref<4x72x384xf32, #tpu.memory_space<vmem>>, vector<1x8x128xf32>,
    %c3_265 = arith.constant 3 : index
    %c16_266 = arith.constant 16 : index
    %c127_267 = arith.constant 127 : index
    %277 = vector.load %arg10[%c3_265, %c16_266, %c127_267] : memref<4x72x384xf32, #tpu.memory_space<vmem>>, vector<1x8x128xf32>
    %278 = vector.shape_cast %277 : vector<1x8x128xf32> to vector<8x128xf32>
    %279 = vector.shape_cast %261 : vector<8x128xf32> to vector<1x8x128xf32>
    tpu.vector_store %arg10[%c3_265, %c16_266, %c127_267], %279 {strides = array<i32>} : memref<4x72x384xf32, #tpu.memory_space<vmem>>, vector<1x8x128xf32>,
    %c2_268 = arith.constant 2 : index
    %c56_269 = arith.constant 56 : index
    %c118_270 = arith.constant 118 : index
    %280 = vector.load %arg10[%c2_268, %c56_269, %c118_270] : memref<4x72x384xf32, #tpu.memory_space<vmem>>, vector<1x8x128xf32>
    %281 = vector.shape_cast %280 : vector<1x8x128xf32> to vector<8x128xf32>
    %282 = vector.shape_cast %261 : vector<8x128xf32> to vector<1x8x128xf32>
    tpu.vector_store %arg10[%c2_268, %c56_269, %c118_270], %282 {strides = array<i32>} : memref<4x72x384xf32, #tpu.memory_space<vmem>>, vector<1x8x128xf32>,
    %c3_271 = arith.constant 3 : index
    %c48_272 = arith.constant 48 : index
    %c118_273 = arith.constant 118 : index
    %283 = vector.load %arg10[%c3_271, %c48_272, %c118_273] : memref<4x72x384xf32, #tpu.memory_space<vmem>>, vector<1x8x128xf32>
    %284 = vector.shape_cast %283 : vector<1x8x128xf32> to vector<8x128xf32>
    %285 = vector.shape_cast %261 : vector<8x128xf32> to vector<1x8x128xf32>
    tpu.vector_store %arg10[%c3_271, %c48_272, %c118_273], %285 {strides = array<i32>} : memref<4x72x384xf32, #tpu.memory_space<vmem>>, vector<1x8x128xf32>,
    %c3_274 = arith.constant 3 : index
    %c64_275 = arith.constant 64 : index
    %c117_276 = arith.constant 117 : index
    %286 = vector.load %arg10[%c3_274, %c64_275, %c117_276] : memref<4x72x384xf32, #tpu.memory_space<vmem>>, vector<1x8x128xf32>
    %287 = vector.shape_cast %286 : vector<1x8x128xf32> to vector<8x128xf32>
    %288 = vector.shape_cast %261 : vector<8x128xf32> to vector<1x8x128xf32>
    tpu.vector_store %arg10[%c3_274, %c64_275, %c117_276], %288 {strides = array<i32>} : memref<4x72x384xf32, #tpu.memory_space<vmem>>, vector<1x8x128xf32>,
    %c1_277 = arith.constant 1 : index
    %c0_278 = arith.constant 0 : index
    %c0_279 = arith.constant 0 : index
    %289 = vector.load %arg6[%c1_277, %c0_278, %c0_279] : memref<4x8x8xf32, #tpu.memory_space<vmem>>, vector<1x8x8xf32>
    %290 = vector.shape_cast %289 : vector<1x8x8xf32> to vector<8x8xf32>
    %cst_280 = arith.constant dense<0.000000e+00> : vector<8x128xf32>
    %291 = tpu.matmul %290, %253, %cst_280 {dimension_numbers = #tpu.dot_dimension_numbers<[1], [0], [0], [1], [0, 0, 1, 1], [], []>} : vector<8x8xf32>, vector<8x128xf32>, vector<8x128xf32> -> vector<8x128xf32>
    %c0_281 = arith.constant 0 : index
    %c0_282 = arith.constant 0 : index
    %292 = vector.load %arg7[%c0_281, %c0_282] : memref<8x1xf32, #tpu.memory_space<vmem>>, vector<8x1xf32>
    %293 = vector.broadcast %292 : vector<8x1xf32> to vector<8x128xf32>
    %294 = arith.addf %291, %293 : vector<8x128xf32>
    %cst_283 = arith.constant 0.000000e+00 : f32
    %295 = vector.broadcast %cst_283 : f32 to vector<8x128xf32>
    %296 = arith.select %2, %294, %295 : vector<8x128xi1>, vector<8x128xf32>
    %c0_284 = arith.constant 0 : index
    %c24_285 = arith.constant 24 : index
    %c129_286 = arith.constant 129 : index
    %297 = vector.load %arg10[%c0_284, %c24_285, %c129_286] : memref<4x72x384xf32, #tpu.memory_space<vmem>>, vector<1x8x128xf32>
    %298 = vector.shape_cast %297 : vector<1x8x128xf32> to vector<8x128xf32>
    %299 = vector.shape_cast %296 : vector<8x128xf32> to vector<1x8x128xf32>
    tpu.vector_store %arg10[%c0_284, %c24_285, %c129_286], %299 {strides = array<i32>} : memref<4x72x384xf32, #tpu.memory_space<vmem>>, vector<1x8x128xf32>,
    %c0_287 = arith.constant 0 : index
    %c40_288 = arith.constant 40 : index
    %c128_289 = arith.constant 128 : index
    %300 = vector.load %arg10[%c0_287, %c40_288, %c128_289] : memref<4x72x384xf32, #tpu.memory_space<vmem>>, vector<1x8x128xf32>
    %301 = vector.shape_cast %300 : vector<1x8x128xf32> to vector<8x128xf32>
    %302 = vector.shape_cast %296 : vector<8x128xf32> to vector<1x8x128xf32>
    tpu.vector_store %arg10[%c0_287, %c40_288, %c128_289], %302 {strides = array<i32>} : memref<4x72x384xf32, #tpu.memory_space<vmem>>, vector<1x8x128xf32>,
    %c1_290 = arith.constant 1 : index
    %c32_291 = arith.constant 32 : index
    %c128_292 = arith.constant 128 : index
    %303 = vector.load %arg10[%c1_290, %c32_291, %c128_292] : memref<4x72x384xf32, #tpu.memory_space<vmem>>, vector<1x8x128xf32>
    %304 = vector.shape_cast %303 : vector<1x8x128xf32> to vector<8x128xf32>
    %305 = vector.shape_cast %296 : vector<8x128xf32> to vector<1x8x128xf32>
    tpu.vector_store %arg10[%c1_290, %c32_291, %c128_292], %305 {strides = array<i32>} : memref<4x72x384xf32, #tpu.memory_space<vmem>>, vector<1x8x128xf32>,
    %c2_293 = arith.constant 2 : index
    %c0_294 = arith.constant 0 : index
    %c129_295 = arith.constant 129 : index
    %306 = vector.load %arg10[%c2_293, %c0_294, %c129_295] : memref<4x72x384xf32, #tpu.memory_space<vmem>>, vector<1x8x128xf32>
    %307 = vector.shape_cast %306 : vector<1x8x128xf32> to vector<8x128xf32>
    %308 = vector.shape_cast %296 : vector<8x128xf32> to vector<1x8x128xf32>
    tpu.vector_store %arg10[%c2_293, %c0_294, %c129_295], %308 {strides = array<i32>} : memref<4x72x384xf32, #tpu.memory_space<vmem>>, vector<1x8x128xf32>,
    %c2_296 = arith.constant 2 : index
    %c16_297 = arith.constant 16 : index
    %c128_298 = arith.constant 128 : index
    %309 = vector.load %arg10[%c2_296, %c16_297, %c128_298] : memref<4x72x384xf32, #tpu.memory_space<vmem>>, vector<1x8x128xf32>
    %310 = vector.shape_cast %309 : vector<1x8x128xf32> to vector<8x128xf32>
    %311 = vector.shape_cast %296 : vector<8x128xf32> to vector<1x8x128xf32>
    tpu.vector_store %arg10[%c2_296, %c16_297, %c128_298], %311 {strides = array<i32>} : memref<4x72x384xf32, #tpu.memory_space<vmem>>, vector<1x8x128xf32>,
    %c3_299 = arith.constant 3 : index
    %c8_300 = arith.constant 8 : index
    %c128_301 = arith.constant 128 : index
    %312 = vector.load %arg10[%c3_299, %c8_300, %c128_301] : memref<4x72x384xf32, #tpu.memory_space<vmem>>, vector<1x8x128xf32>
    %313 = vector.shape_cast %312 : vector<1x8x128xf32> to vector<8x128xf32>
    %314 = vector.shape_cast %296 : vector<8x128xf32> to vector<1x8x128xf32>
    tpu.vector_store %arg10[%c3_299, %c8_300, %c128_301], %314 {strides = array<i32>} : memref<4x72x384xf32, #tpu.memory_space<vmem>>, vector<1x8x128xf32>,
    %c2_302 = arith.constant 2 : index
    %c48_303 = arith.constant 48 : index
    %c119_304 = arith.constant 119 : index
    %315 = vector.load %arg10[%c2_302, %c48_303, %c119_304] : memref<4x72x384xf32, #tpu.memory_space<vmem>>, vector<1x8x128xf32>
    %316 = vector.shape_cast %315 : vector<1x8x128xf32> to vector<8x128xf32>
    %317 = vector.shape_cast %296 : vector<8x128xf32> to vector<1x8x128xf32>
    tpu.vector_store %arg10[%c2_302, %c48_303, %c119_304], %317 {strides = array<i32>} : memref<4x72x384xf32, #tpu.memory_space<vmem>>, vector<1x8x128xf32>,
    %c2_305 = arith.constant 2 : index
    %c64_306 = arith.constant 64 : index
    %c118_307 = arith.constant 118 : index
    %318 = vector.load %arg10[%c2_305, %c64_306, %c118_307] : memref<4x72x384xf32, #tpu.memory_space<vmem>>, vector<1x8x128xf32>
    %319 = vector.shape_cast %318 : vector<1x8x128xf32> to vector<8x128xf32>
    %320 = vector.shape_cast %296 : vector<8x128xf32> to vector<1x8x128xf32>
    tpu.vector_store %arg10[%c2_305, %c64_306, %c118_307], %320 {strides = array<i32>} : memref<4x72x384xf32, #tpu.memory_space<vmem>>, vector<1x8x128xf32>,
    %c3_308 = arith.constant 3 : index
    %c56_309 = arith.constant 56 : index
    %c118_310 = arith.constant 118 : index
    %321 = vector.load %arg10[%c3_308, %c56_309, %c118_310] : memref<4x72x384xf32, #tpu.memory_space<vmem>>, vector<1x8x128xf32>
    %322 = vector.shape_cast %321 : vector<1x8x128xf32> to vector<8x128xf32>
    %323 = vector.shape_cast %296 : vector<8x128xf32> to vector<1x8x128xf32>
    tpu.vector_store %arg10[%c3_308, %c56_309, %c118_310], %323 {strides = array<i32>} : memref<4x72x384xf32, #tpu.memory_space<vmem>>, vector<1x8x128xf32>,
    %c2_311 = arith.constant 2 : index
    %c0_312 = arith.constant 0 : index
    %c0_313 = arith.constant 0 : index
    %324 = vector.load %arg6[%c2_311, %c0_312, %c0_313] : memref<4x8x8xf32, #tpu.memory_space<vmem>>, vector<1x8x8xf32>
    %325 = vector.shape_cast %324 : vector<1x8x8xf32> to vector<8x8xf32>
    %cst_314 = arith.constant dense<0.000000e+00> : vector<8x128xf32>
    %326 = tpu.matmul %325, %253, %cst_314 {dimension_numbers = #tpu.dot_dimension_numbers<[1], [0], [0], [1], [0, 0, 1, 1], [], []>} : vector<8x8xf32>, vector<8x128xf32>, vector<8x128xf32> -> vector<8x128xf32>
    %c0_315 = arith.constant 0 : index
    %c0_316 = arith.constant 0 : index
    %327 = vector.load %arg7[%c0_315, %c0_316] : memref<8x1xf32, #tpu.memory_space<vmem>>, vector<8x1xf32>
    %328 = vector.broadcast %327 : vector<8x1xf32> to vector<8x128xf32>
    %329 = arith.addf %326, %328 : vector<8x128xf32>
    %cst_317 = arith.constant 0.000000e+00 : f32
    %330 = vector.broadcast %cst_317 : f32 to vector<8x128xf32>
    %331 = arith.select %2, %329, %330 : vector<8x128xi1>, vector<8x128xf32>
    %c0_318 = arith.constant 0 : index
    %c8_319 = arith.constant 8 : index
    %c138_320 = arith.constant 138 : index
    %332 = vector.load %arg10[%c0_318, %c8_319, %c138_320] : memref<4x72x384xf32, #tpu.memory_space<vmem>>, vector<1x8x128xf32>
    %333 = vector.shape_cast %332 : vector<1x8x128xf32> to vector<8x128xf32>
    %334 = vector.shape_cast %331 : vector<8x128xf32> to vector<1x8x128xf32>
    tpu.vector_store %arg10[%c0_318, %c8_319, %c138_320], %334 {strides = array<i32>} : memref<4x72x384xf32, #tpu.memory_space<vmem>>, vector<1x8x128xf32>,
    %c1_321 = arith.constant 1 : index
    %c0_322 = arith.constant 0 : index
    %c138_323 = arith.constant 138 : index
    %335 = vector.load %arg10[%c1_321, %c0_322, %c138_323] : memref<4x72x384xf32, #tpu.memory_space<vmem>>, vector<1x8x128xf32>
    %336 = vector.shape_cast %335 : vector<1x8x128xf32> to vector<8x128xf32>
    %337 = vector.shape_cast %331 : vector<8x128xf32> to vector<1x8x128xf32>
    tpu.vector_store %arg10[%c1_321, %c0_322, %c138_323], %337 {strides = array<i32>} : memref<4x72x384xf32, #tpu.memory_space<vmem>>, vector<1x8x128xf32>,
    %c1_324 = arith.constant 1 : index
    %c16_325 = arith.constant 16 : index
    %c137_326 = arith.constant 137 : index
    %338 = vector.load %arg10[%c1_324, %c16_325, %c137_326] : memref<4x72x384xf32, #tpu.memory_space<vmem>>, vector<1x8x128xf32>
    %339 = vector.shape_cast %338 : vector<1x8x128xf32> to vector<8x128xf32>
    %340 = vector.shape_cast %331 : vector<8x128xf32> to vector<1x8x128xf32>
    tpu.vector_store %arg10[%c1_324, %c16_325, %c137_326], %340 {strides = array<i32>} : memref<4x72x384xf32, #tpu.memory_space<vmem>>, vector<1x8x128xf32>,
    %c0_327 = arith.constant 0 : index
    %c56_328 = arith.constant 56 : index
    %c128_329 = arith.constant 128 : index
    %341 = vector.load %arg10[%c0_327, %c56_328, %c128_329] : memref<4x72x384xf32, #tpu.memory_space<vmem>>, vector<1x8x128xf32>
    %342 = vector.shape_cast %341 : vector<1x8x128xf32> to vector<8x128xf32>
    %343 = vector.shape_cast %331 : vector<8x128xf32> to vector<1x8x128xf32>
    tpu.vector_store %arg10[%c0_327, %c56_328, %c128_329], %343 {strides = array<i32>} : memref<4x72x384xf32, #tpu.memory_space<vmem>>, vector<1x8x128xf32>,
    %c1_330 = arith.constant 1 : index
    %c48_331 = arith.constant 48 : index
    %c128_332 = arith.constant 128 : index
    %344 = vector.load %arg10[%c1_330, %c48_331, %c128_332] : memref<4x72x384xf32, #tpu.memory_space<vmem>>, vector<1x8x128xf32>
    %345 = vector.shape_cast %344 : vector<1x8x128xf32> to vector<8x128xf32>
    %346 = vector.shape_cast %331 : vector<8x128xf32> to vector<1x8x128xf32>
    tpu.vector_store %arg10[%c1_330, %c48_331, %c128_332], %346 {strides = array<i32>} : memref<4x72x384xf32, #tpu.memory_space<vmem>>, vector<1x8x128xf32>,
    %c1_333 = arith.constant 1 : index
    %c64_334 = arith.constant 64 : index
    %c127_335 = arith.constant 127 : index
    %347 = vector.load %arg10[%c1_333, %c64_334, %c127_335] : memref<4x72x384xf32, #tpu.memory_space<vmem>>, vector<1x8x128xf32>
    %348 = vector.shape_cast %347 : vector<1x8x128xf32> to vector<8x128xf32>
    %349 = vector.shape_cast %331 : vector<8x128xf32> to vector<1x8x128xf32>
    tpu.vector_store %arg10[%c1_333, %c64_334, %c127_335], %349 {strides = array<i32>} : memref<4x72x384xf32, #tpu.memory_space<vmem>>, vector<1x8x128xf32>,
    %c2_336 = arith.constant 2 : index
    %c32_337 = arith.constant 32 : index
    %c128_338 = arith.constant 128 : index
    %350 = vector.load %arg10[%c2_336, %c32_337, %c128_338] : memref<4x72x384xf32, #tpu.memory_space<vmem>>, vector<1x8x128xf32>
    %351 = vector.shape_cast %350 : vector<1x8x128xf32> to vector<8x128xf32>
    %352 = vector.shape_cast %331 : vector<8x128xf32> to vector<1x8x128xf32>
    tpu.vector_store %arg10[%c2_336, %c32_337, %c128_338], %352 {strides = array<i32>} : memref<4x72x384xf32, #tpu.memory_space<vmem>>, vector<1x8x128xf32>,
    %c3_339 = arith.constant 3 : index
    %c24_340 = arith.constant 24 : index
    %c128_341 = arith.constant 128 : index
    %353 = vector.load %arg10[%c3_339, %c24_340, %c128_341] : memref<4x72x384xf32, #tpu.memory_space<vmem>>, vector<1x8x128xf32>
    %354 = vector.shape_cast %353 : vector<1x8x128xf32> to vector<8x128xf32>
    %355 = vector.shape_cast %331 : vector<8x128xf32> to vector<1x8x128xf32>
    tpu.vector_store %arg10[%c3_339, %c24_340, %c128_341], %355 {strides = array<i32>} : memref<4x72x384xf32, #tpu.memory_space<vmem>>, vector<1x8x128xf32>,
    %c3_342 = arith.constant 3 : index
    %c40_343 = arith.constant 40 : index
    %c127_344 = arith.constant 127 : index
    %356 = vector.load %arg10[%c3_342, %c40_343, %c127_344] : memref<4x72x384xf32, #tpu.memory_space<vmem>>, vector<1x8x128xf32>
    %357 = vector.shape_cast %356 : vector<1x8x128xf32> to vector<8x128xf32>
    %358 = vector.shape_cast %331 : vector<8x128xf32> to vector<1x8x128xf32>
    tpu.vector_store %arg10[%c3_342, %c40_343, %c127_344], %358 {strides = array<i32>} : memref<4x72x384xf32, #tpu.memory_space<vmem>>, vector<1x8x128xf32>,
    %c3_345 = arith.constant 3 : index
    %c0_346 = arith.constant 0 : index
    %c0_347 = arith.constant 0 : index
    %359 = vector.load %arg6[%c3_345, %c0_346, %c0_347] : memref<4x8x8xf32, #tpu.memory_space<vmem>>, vector<1x8x8xf32>
    %360 = vector.shape_cast %359 : vector<1x8x8xf32> to vector<8x8xf32>
    %cst_348 = arith.constant dense<0.000000e+00> : vector<8x128xf32>
    %361 = tpu.matmul %360, %253, %cst_348 {dimension_numbers = #tpu.dot_dimension_numbers<[1], [0], [0], [1], [0, 0, 1, 1], [], []>} : vector<8x8xf32>, vector<8x128xf32>, vector<8x128xf32> -> vector<8x128xf32>
    %c0_349 = arith.constant 0 : index
    %c0_350 = arith.constant 0 : index
    %362 = vector.load %arg7[%c0_349, %c0_350] : memref<8x1xf32, #tpu.memory_space<vmem>>, vector<8x1xf32>
    %363 = vector.broadcast %362 : vector<8x1xf32> to vector<8x128xf32>
    %364 = arith.addf %361, %363 : vector<8x128xf32>
    %cst_351 = arith.constant 0.000000e+00 : f32
    %365 = vector.broadcast %cst_351 : f32 to vector<8x128xf32>
    %366 = arith.select %2, %364, %365 : vector<8x128xi1>, vector<8x128xf32>
    %c0_352 = arith.constant 0 : index
    %c0_353 = arith.constant 0 : index
    %c139_354 = arith.constant 139 : index
    %367 = vector.load %arg10[%c0_352, %c0_353, %c139_354] : memref<4x72x384xf32, #tpu.memory_space<vmem>>, vector<1x8x128xf32>
    %368 = vector.shape_cast %367 : vector<1x8x128xf32> to vector<8x128xf32>
    %369 = vector.shape_cast %366 : vector<8x128xf32> to vector<1x8x128xf32>
    tpu.vector_store %arg10[%c0_352, %c0_353, %c139_354], %369 {strides = array<i32>} : memref<4x72x384xf32, #tpu.memory_space<vmem>>, vector<1x8x128xf32>,
    %c0_355 = arith.constant 0 : index
    %c16_356 = arith.constant 16 : index
    %c138_357 = arith.constant 138 : index
    %370 = vector.load %arg10[%c0_355, %c16_356, %c138_357] : memref<4x72x384xf32, #tpu.memory_space<vmem>>, vector<1x8x128xf32>
    %371 = vector.shape_cast %370 : vector<1x8x128xf32> to vector<8x128xf32>
    %372 = vector.shape_cast %366 : vector<8x128xf32> to vector<1x8x128xf32>
    tpu.vector_store %arg10[%c0_355, %c16_356, %c138_357], %372 {strides = array<i32>} : memref<4x72x384xf32, #tpu.memory_space<vmem>>, vector<1x8x128xf32>,
    %c1_358 = arith.constant 1 : index
    %c8_359 = arith.constant 8 : index
    %c138_360 = arith.constant 138 : index
    %373 = vector.load %arg10[%c1_358, %c8_359, %c138_360] : memref<4x72x384xf32, #tpu.memory_space<vmem>>, vector<1x8x128xf32>
    %374 = vector.shape_cast %373 : vector<1x8x128xf32> to vector<8x128xf32>
    %375 = vector.shape_cast %366 : vector<8x128xf32> to vector<1x8x128xf32>
    tpu.vector_store %arg10[%c1_358, %c8_359, %c138_360], %375 {strides = array<i32>} : memref<4x72x384xf32, #tpu.memory_space<vmem>>, vector<1x8x128xf32>,
    %c0_361 = arith.constant 0 : index
    %c48_362 = arith.constant 48 : index
    %c129_363 = arith.constant 129 : index
    %376 = vector.load %arg10[%c0_361, %c48_362, %c129_363] : memref<4x72x384xf32, #tpu.memory_space<vmem>>, vector<1x8x128xf32>
    %377 = vector.shape_cast %376 : vector<1x8x128xf32> to vector<8x128xf32>
    %378 = vector.shape_cast %366 : vector<8x128xf32> to vector<1x8x128xf32>
    tpu.vector_store %arg10[%c0_361, %c48_362, %c129_363], %378 {strides = array<i32>} : memref<4x72x384xf32, #tpu.memory_space<vmem>>, vector<1x8x128xf32>,
    %c0_364 = arith.constant 0 : index
    %c64_365 = arith.constant 64 : index
    %c128_366 = arith.constant 128 : index
    %379 = vector.load %arg10[%c0_364, %c64_365, %c128_366] : memref<4x72x384xf32, #tpu.memory_space<vmem>>, vector<1x8x128xf32>
    %380 = vector.shape_cast %379 : vector<1x8x128xf32> to vector<8x128xf32>
    %381 = vector.shape_cast %366 : vector<8x128xf32> to vector<1x8x128xf32>
    tpu.vector_store %arg10[%c0_364, %c64_365, %c128_366], %381 {strides = array<i32>} : memref<4x72x384xf32, #tpu.memory_space<vmem>>, vector<1x8x128xf32>,
    %c1_367 = arith.constant 1 : index
    %c56_368 = arith.constant 56 : index
    %c128_369 = arith.constant 128 : index
    %382 = vector.load %arg10[%c1_367, %c56_368, %c128_369] : memref<4x72x384xf32, #tpu.memory_space<vmem>>, vector<1x8x128xf32>
    %383 = vector.shape_cast %382 : vector<1x8x128xf32> to vector<8x128xf32>
    %384 = vector.shape_cast %366 : vector<8x128xf32> to vector<1x8x128xf32>
    tpu.vector_store %arg10[%c1_367, %c56_368, %c128_369], %384 {strides = array<i32>} : memref<4x72x384xf32, #tpu.memory_space<vmem>>, vector<1x8x128xf32>,
    %c2_370 = arith.constant 2 : index
    %c24_371 = arith.constant 24 : index
    %c129_372 = arith.constant 129 : index
    %385 = vector.load %arg10[%c2_370, %c24_371, %c129_372] : memref<4x72x384xf32, #tpu.memory_space<vmem>>, vector<1x8x128xf32>
    %386 = vector.shape_cast %385 : vector<1x8x128xf32> to vector<8x128xf32>
    %387 = vector.shape_cast %366 : vector<8x128xf32> to vector<1x8x128xf32>
    tpu.vector_store %arg10[%c2_370, %c24_371, %c129_372], %387 {strides = array<i32>} : memref<4x72x384xf32, #tpu.memory_space<vmem>>, vector<1x8x128xf32>,
    %c2_373 = arith.constant 2 : index
    %c40_374 = arith.constant 40 : index
    %c128_375 = arith.constant 128 : index
    %388 = vector.load %arg10[%c2_373, %c40_374, %c128_375] : memref<4x72x384xf32, #tpu.memory_space<vmem>>, vector<1x8x128xf32>
    %389 = vector.shape_cast %388 : vector<1x8x128xf32> to vector<8x128xf32>
    %390 = vector.shape_cast %366 : vector<8x128xf32> to vector<1x8x128xf32>
    tpu.vector_store %arg10[%c2_373, %c40_374, %c128_375], %390 {strides = array<i32>} : memref<4x72x384xf32, #tpu.memory_space<vmem>>, vector<1x8x128xf32>,
    %c3_376 = arith.constant 3 : index
    %c32_377 = arith.constant 32 : index
    %c128_378 = arith.constant 128 : index
    %391 = vector.load %arg10[%c3_376, %c32_377, %c128_378] : memref<4x72x384xf32, #tpu.memory_space<vmem>>, vector<1x8x128xf32>
    %392 = vector.shape_cast %391 : vector<1x8x128xf32> to vector<8x128xf32>
    %393 = vector.shape_cast %366 : vector<8x128xf32> to vector<1x8x128xf32>
    tpu.vector_store %arg10[%c3_376, %c32_377, %c128_378], %393 {strides = array<i32>} : memref<4x72x384xf32, #tpu.memory_space<vmem>>, vector<1x8x128xf32>,
    %c3_379 = arith.constant 3 : index
    %c0_380 = arith.constant 0 : index
    %c0_381 = arith.constant 0 : index
    %394 = vector.load %arg3[%c3_379, %c0_380, %c0_381] : memref<5x8x72xf32, #tpu.memory_space<vmem>>, vector<1x8x72xf32>
    %395 = vector.shape_cast %394 : vector<1x8x72xf32> to vector<8x72xf32>
    %c0_382 = arith.constant 0 : index
    %c0_383 = arith.constant 0 : index
    %c128_384 = arith.constant 128 : index
    %396 = vector.load %arg10[%c0_382, %c0_383, %c128_384] : memref<4x72x384xf32, #tpu.memory_space<vmem>>, vector<1x72x128xf32>
    %397 = vector.shape_cast %396 : vector<1x72x128xf32> to vector<72x128xf32>
    %cst_385 = arith.constant dense<0.000000e+00> : vector<8x128xf32>
    %398 = tpu.matmul %395, %397, %cst_385 {dimension_numbers = #tpu.dot_dimension_numbers<[1], [0], [0], [1], [0, 0, 1, 1], [], []>} : vector<8x72xf32>, vector<72x128xf32>, vector<8x128xf32> -> vector<8x128xf32>
    %cst_386 = arith.constant 0.000000e+00 : f32
    %399 = vector.broadcast %cst_386 : f32 to vector<8x128xf32>
    %400 = arith.select %2, %398, %399 : vector<8x128xi1>, vector<8x128xf32>
    %c3_387 = arith.constant 3 : index
    %c0_388 = arith.constant 0 : index
    %c0_389 = arith.constant 0 : index
    %401 = vector.load %arg3[%c3_387, %c0_388, %c0_389] : memref<5x8x72xf32, #tpu.memory_space<vmem>>, vector<1x8x72xf32>
    %402 = vector.shape_cast %401 : vector<1x8x72xf32> to vector<8x72xf32>
    %c1_390 = arith.constant 1 : index
    %c0_391 = arith.constant 0 : index
    %c128_392 = arith.constant 128 : index
    %403 = vector.load %arg10[%c1_390, %c0_391, %c128_392] : memref<4x72x384xf32, #tpu.memory_space<vmem>>, vector<1x72x128xf32>
    %404 = vector.shape_cast %403 : vector<1x72x128xf32> to vector<72x128xf32>
    %cst_393 = arith.constant dense<0.000000e+00> : vector<8x128xf32>
    %405 = tpu.matmul %402, %404, %cst_393 {dimension_numbers = #tpu.dot_dimension_numbers<[1], [0], [0], [1], [0, 0, 1, 1], [], []>} : vector<8x72xf32>, vector<72x128xf32>, vector<8x128xf32> -> vector<8x128xf32>
    %cst_394 = arith.constant 0.000000e+00 : f32
    %406 = vector.broadcast %cst_394 : f32 to vector<8x128xf32>
    %407 = arith.select %2, %405, %406 : vector<8x128xi1>, vector<8x128xf32>
    %c3_395 = arith.constant 3 : index
    %c0_396 = arith.constant 0 : index
    %c0_397 = arith.constant 0 : index
    %408 = vector.load %arg3[%c3_395, %c0_396, %c0_397] : memref<5x8x72xf32, #tpu.memory_space<vmem>>, vector<1x8x72xf32>
    %409 = vector.shape_cast %408 : vector<1x8x72xf32> to vector<8x72xf32>
    %c2_398 = arith.constant 2 : index
    %c0_399 = arith.constant 0 : index
    %c128_400 = arith.constant 128 : index
    %410 = vector.load %arg10[%c2_398, %c0_399, %c128_400] : memref<4x72x384xf32, #tpu.memory_space<vmem>>, vector<1x72x128xf32>
    %411 = vector.shape_cast %410 : vector<1x72x128xf32> to vector<72x128xf32>
    %cst_401 = arith.constant dense<0.000000e+00> : vector<8x128xf32>
    %412 = tpu.matmul %409, %411, %cst_401 {dimension_numbers = #tpu.dot_dimension_numbers<[1], [0], [0], [1], [0, 0, 1, 1], [], []>} : vector<8x72xf32>, vector<72x128xf32>, vector<8x128xf32> -> vector<8x128xf32>
    %cst_402 = arith.constant 0.000000e+00 : f32
    %413 = vector.broadcast %cst_402 : f32 to vector<8x128xf32>
    %414 = arith.select %2, %412, %413 : vector<8x128xi1>, vector<8x128xf32>
    %c3_403 = arith.constant 3 : index
    %c0_404 = arith.constant 0 : index
    %c0_405 = arith.constant 0 : index
    %415 = vector.load %arg3[%c3_403, %c0_404, %c0_405] : memref<5x8x72xf32, #tpu.memory_space<vmem>>, vector<1x8x72xf32>
    %416 = vector.shape_cast %415 : vector<1x8x72xf32> to vector<8x72xf32>
    %c3_406 = arith.constant 3 : index
    %c0_407 = arith.constant 0 : index
    %c128_408 = arith.constant 128 : index
    %417 = vector.load %arg10[%c3_406, %c0_407, %c128_408] : memref<4x72x384xf32, #tpu.memory_space<vmem>>, vector<1x72x128xf32>
    %418 = vector.shape_cast %417 : vector<1x72x128xf32> to vector<72x128xf32>
    %cst_409 = arith.constant dense<0.000000e+00> : vector<8x128xf32>
    %419 = tpu.matmul %416, %418, %cst_409 {dimension_numbers = #tpu.dot_dimension_numbers<[1], [0], [0], [1], [0, 0, 1, 1], [], []>} : vector<8x72xf32>, vector<72x128xf32>, vector<8x128xf32> -> vector<8x128xf32>
    %cst_410 = arith.constant 0.000000e+00 : f32
    %420 = vector.broadcast %cst_410 : f32 to vector<8x128xf32>
    %421 = arith.select %2, %419, %420 : vector<8x128xi1>, vector<8x128xf32>
    %c0_411 = arith.constant 0 : index
    %c32_412 = arith.constant 32 : index
    %c128_413 = arith.constant 128 : index
    %422 = vector.load %arg11[%c0_411, %c32_412, %c128_413] : memref<4x72x384xf32, #tpu.memory_space<vmem>>, vector<1x8x128xf32>
    %423 = vector.shape_cast %422 : vector<1x8x128xf32> to vector<8x128xf32>
    %424 = vector.shape_cast %400 : vector<8x128xf32> to vector<1x8x128xf32>
    tpu.vector_store %arg11[%c0_411, %c32_412, %c128_413], %424 {strides = array<i32>} : memref<4x72x384xf32, #tpu.memory_space<vmem>>, vector<1x8x128xf32>,
    %c1_414 = arith.constant 1 : index
    %c24_415 = arith.constant 24 : index
    %c128_416 = arith.constant 128 : index
    %425 = vector.load %arg11[%c1_414, %c24_415, %c128_416] : memref<4x72x384xf32, #tpu.memory_space<vmem>>, vector<1x8x128xf32>
    %426 = vector.shape_cast %425 : vector<1x8x128xf32> to vector<8x128xf32>
    %427 = vector.shape_cast %400 : vector<8x128xf32> to vector<1x8x128xf32>
    tpu.vector_store %arg11[%c1_414, %c24_415, %c128_416], %427 {strides = array<i32>} : memref<4x72x384xf32, #tpu.memory_space<vmem>>, vector<1x8x128xf32>,
    %c1_417 = arith.constant 1 : index
    %c40_418 = arith.constant 40 : index
    %c127_419 = arith.constant 127 : index
    %428 = vector.load %arg11[%c1_417, %c40_418, %c127_419] : memref<4x72x384xf32, #tpu.memory_space<vmem>>, vector<1x8x128xf32>
    %429 = vector.shape_cast %428 : vector<1x8x128xf32> to vector<8x128xf32>
    %430 = vector.shape_cast %400 : vector<8x128xf32> to vector<1x8x128xf32>
    tpu.vector_store %arg11[%c1_417, %c40_418, %c127_419], %430 {strides = array<i32>} : memref<4x72x384xf32, #tpu.memory_space<vmem>>, vector<1x8x128xf32>,
    %c2_420 = arith.constant 2 : index
    %c8_421 = arith.constant 8 : index
    %c128_422 = arith.constant 128 : index
    %431 = vector.load %arg11[%c2_420, %c8_421, %c128_422] : memref<4x72x384xf32, #tpu.memory_space<vmem>>, vector<1x8x128xf32>
    %432 = vector.shape_cast %431 : vector<1x8x128xf32> to vector<8x128xf32>
    %433 = vector.shape_cast %400 : vector<8x128xf32> to vector<1x8x128xf32>
    tpu.vector_store %arg11[%c2_420, %c8_421, %c128_422], %433 {strides = array<i32>} : memref<4x72x384xf32, #tpu.memory_space<vmem>>, vector<1x8x128xf32>,
    %c3_423 = arith.constant 3 : index
    %c0_424 = arith.constant 0 : index
    %c128_425 = arith.constant 128 : index
    %434 = vector.load %arg11[%c3_423, %c0_424, %c128_425] : memref<4x72x384xf32, #tpu.memory_space<vmem>>, vector<1x8x128xf32>
    %435 = vector.shape_cast %434 : vector<1x8x128xf32> to vector<8x128xf32>
    %436 = vector.shape_cast %400 : vector<8x128xf32> to vector<1x8x128xf32>
    tpu.vector_store %arg11[%c3_423, %c0_424, %c128_425], %436 {strides = array<i32>} : memref<4x72x384xf32, #tpu.memory_space<vmem>>, vector<1x8x128xf32>,
    %c3_426 = arith.constant 3 : index
    %c16_427 = arith.constant 16 : index
    %c127_428 = arith.constant 127 : index
    %437 = vector.load %arg11[%c3_426, %c16_427, %c127_428] : memref<4x72x384xf32, #tpu.memory_space<vmem>>, vector<1x8x128xf32>
    %438 = vector.shape_cast %437 : vector<1x8x128xf32> to vector<8x128xf32>
    %439 = vector.shape_cast %400 : vector<8x128xf32> to vector<1x8x128xf32>
    tpu.vector_store %arg11[%c3_426, %c16_427, %c127_428], %439 {strides = array<i32>} : memref<4x72x384xf32, #tpu.memory_space<vmem>>, vector<1x8x128xf32>,
    %c2_429 = arith.constant 2 : index
    %c56_430 = arith.constant 56 : index
    %c118_431 = arith.constant 118 : index
    %440 = vector.load %arg11[%c2_429, %c56_430, %c118_431] : memref<4x72x384xf32, #tpu.memory_space<vmem>>, vector<1x8x128xf32>
    %441 = vector.shape_cast %440 : vector<1x8x128xf32> to vector<8x128xf32>
    %442 = vector.shape_cast %400 : vector<8x128xf32> to vector<1x8x128xf32>
    tpu.vector_store %arg11[%c2_429, %c56_430, %c118_431], %442 {strides = array<i32>} : memref<4x72x384xf32, #tpu.memory_space<vmem>>, vector<1x8x128xf32>,
    %c3_432 = arith.constant 3 : index
    %c48_433 = arith.constant 48 : index
    %c118_434 = arith.constant 118 : index
    %443 = vector.load %arg11[%c3_432, %c48_433, %c118_434] : memref<4x72x384xf32, #tpu.memory_space<vmem>>, vector<1x8x128xf32>
    %444 = vector.shape_cast %443 : vector<1x8x128xf32> to vector<8x128xf32>
    %445 = vector.shape_cast %400 : vector<8x128xf32> to vector<1x8x128xf32>
    tpu.vector_store %arg11[%c3_432, %c48_433, %c118_434], %445 {strides = array<i32>} : memref<4x72x384xf32, #tpu.memory_space<vmem>>, vector<1x8x128xf32>,
    %c3_435 = arith.constant 3 : index
    %c64_436 = arith.constant 64 : index
    %c117_437 = arith.constant 117 : index
    %446 = vector.load %arg11[%c3_435, %c64_436, %c117_437] : memref<4x72x384xf32, #tpu.memory_space<vmem>>, vector<1x8x128xf32>
    %447 = vector.shape_cast %446 : vector<1x8x128xf32> to vector<8x128xf32>
    %448 = vector.shape_cast %400 : vector<8x128xf32> to vector<1x8x128xf32>
    tpu.vector_store %arg11[%c3_435, %c64_436, %c117_437], %448 {strides = array<i32>} : memref<4x72x384xf32, #tpu.memory_space<vmem>>, vector<1x8x128xf32>,
    %c0_438 = arith.constant 0 : index
    %c24_439 = arith.constant 24 : index
    %c129_440 = arith.constant 129 : index
    %449 = vector.load %arg11[%c0_438, %c24_439, %c129_440] : memref<4x72x384xf32, #tpu.memory_space<vmem>>, vector<1x8x128xf32>
    %450 = vector.shape_cast %449 : vector<1x8x128xf32> to vector<8x128xf32>
    %451 = vector.shape_cast %407 : vector<8x128xf32> to vector<1x8x128xf32>
    tpu.vector_store %arg11[%c0_438, %c24_439, %c129_440], %451 {strides = array<i32>} : memref<4x72x384xf32, #tpu.memory_space<vmem>>, vector<1x8x128xf32>,
    %c0_441 = arith.constant 0 : index
    %c40_442 = arith.constant 40 : index
    %c128_443 = arith.constant 128 : index
    %452 = vector.load %arg11[%c0_441, %c40_442, %c128_443] : memref<4x72x384xf32, #tpu.memory_space<vmem>>, vector<1x8x128xf32>
    %453 = vector.shape_cast %452 : vector<1x8x128xf32> to vector<8x128xf32>
    %454 = vector.shape_cast %407 : vector<8x128xf32> to vector<1x8x128xf32>
    tpu.vector_store %arg11[%c0_441, %c40_442, %c128_443], %454 {strides = array<i32>} : memref<4x72x384xf32, #tpu.memory_space<vmem>>, vector<1x8x128xf32>,
    %c1_444 = arith.constant 1 : index
    %c32_445 = arith.constant 32 : index
    %c128_446 = arith.constant 128 : index
    %455 = vector.load %arg11[%c1_444, %c32_445, %c128_446] : memref<4x72x384xf32, #tpu.memory_space<vmem>>, vector<1x8x128xf32>
    %456 = vector.shape_cast %455 : vector<1x8x128xf32> to vector<8x128xf32>
    %457 = vector.shape_cast %407 : vector<8x128xf32> to vector<1x8x128xf32>
    tpu.vector_store %arg11[%c1_444, %c32_445, %c128_446], %457 {strides = array<i32>} : memref<4x72x384xf32, #tpu.memory_space<vmem>>, vector<1x8x128xf32>,
    %c2_447 = arith.constant 2 : index
    %c0_448 = arith.constant 0 : index
    %c129_449 = arith.constant 129 : index
    %458 = vector.load %arg11[%c2_447, %c0_448, %c129_449] : memref<4x72x384xf32, #tpu.memory_space<vmem>>, vector<1x8x128xf32>
    %459 = vector.shape_cast %458 : vector<1x8x128xf32> to vector<8x128xf32>
    %460 = vector.shape_cast %407 : vector<8x128xf32> to vector<1x8x128xf32>
    tpu.vector_store %arg11[%c2_447, %c0_448, %c129_449], %460 {strides = array<i32>} : memref<4x72x384xf32, #tpu.memory_space<vmem>>, vector<1x8x128xf32>,
    %c2_450 = arith.constant 2 : index
    %c16_451 = arith.constant 16 : index
    %c128_452 = arith.constant 128 : index
    %461 = vector.load %arg11[%c2_450, %c16_451, %c128_452] : memref<4x72x384xf32, #tpu.memory_space<vmem>>, vector<1x8x128xf32>
    %462 = vector.shape_cast %461 : vector<1x8x128xf32> to vector<8x128xf32>
    %463 = vector.shape_cast %407 : vector<8x128xf32> to vector<1x8x128xf32>
    tpu.vector_store %arg11[%c2_450, %c16_451, %c128_452], %463 {strides = array<i32>} : memref<4x72x384xf32, #tpu.memory_space<vmem>>, vector<1x8x128xf32>,
    %c3_453 = arith.constant 3 : index
    %c8_454 = arith.constant 8 : index
    %c128_455 = arith.constant 128 : index
    %464 = vector.load %arg11[%c3_453, %c8_454, %c128_455] : memref<4x72x384xf32, #tpu.memory_space<vmem>>, vector<1x8x128xf32>
    %465 = vector.shape_cast %464 : vector<1x8x128xf32> to vector<8x128xf32>
    %466 = vector.shape_cast %407 : vector<8x128xf32> to vector<1x8x128xf32>
    tpu.vector_store %arg11[%c3_453, %c8_454, %c128_455], %466 {strides = array<i32>} : memref<4x72x384xf32, #tpu.memory_space<vmem>>, vector<1x8x128xf32>,
    %c2_456 = arith.constant 2 : index
    %c48_457 = arith.constant 48 : index
    %c119_458 = arith.constant 119 : index
    %467 = vector.load %arg11[%c2_456, %c48_457, %c119_458] : memref<4x72x384xf32, #tpu.memory_space<vmem>>, vector<1x8x128xf32>
    %468 = vector.shape_cast %467 : vector<1x8x128xf32> to vector<8x128xf32>
    %469 = vector.shape_cast %407 : vector<8x128xf32> to vector<1x8x128xf32>
    tpu.vector_store %arg11[%c2_456, %c48_457, %c119_458], %469 {strides = array<i32>} : memref<4x72x384xf32, #tpu.memory_space<vmem>>, vector<1x8x128xf32>,
    %c2_459 = arith.constant 2 : index
    %c64_460 = arith.constant 64 : index
    %c118_461 = arith.constant 118 : index
    %470 = vector.load %arg11[%c2_459, %c64_460, %c118_461] : memref<4x72x384xf32, #tpu.memory_space<vmem>>, vector<1x8x128xf32>
    %471 = vector.shape_cast %470 : vector<1x8x128xf32> to vector<8x128xf32>
    %472 = vector.shape_cast %407 : vector<8x128xf32> to vector<1x8x128xf32>
    tpu.vector_store %arg11[%c2_459, %c64_460, %c118_461], %472 {strides = array<i32>} : memref<4x72x384xf32, #tpu.memory_space<vmem>>, vector<1x8x128xf32>,
    %c3_462 = arith.constant 3 : index
    %c56_463 = arith.constant 56 : index
    %c118_464 = arith.constant 118 : index
    %473 = vector.load %arg11[%c3_462, %c56_463, %c118_464] : memref<4x72x384xf32, #tpu.memory_space<vmem>>, vector<1x8x128xf32>
    %474 = vector.shape_cast %473 : vector<1x8x128xf32> to vector<8x128xf32>
    %475 = vector.shape_cast %407 : vector<8x128xf32> to vector<1x8x128xf32>
    tpu.vector_store %arg11[%c3_462, %c56_463, %c118_464], %475 {strides = array<i32>} : memref<4x72x384xf32, #tpu.memory_space<vmem>>, vector<1x8x128xf32>,
    %c0_465 = arith.constant 0 : index
    %c8_466 = arith.constant 8 : index
    %c138_467 = arith.constant 138 : index
    %476 = vector.load %arg11[%c0_465, %c8_466, %c138_467] : memref<4x72x384xf32, #tpu.memory_space<vmem>>, vector<1x8x128xf32>
    %477 = vector.shape_cast %476 : vector<1x8x128xf32> to vector<8x128xf32>
    %478 = vector.shape_cast %414 : vector<8x128xf32> to vector<1x8x128xf32>
    tpu.vector_store %arg11[%c0_465, %c8_466, %c138_467], %478 {strides = array<i32>} : memref<4x72x384xf32, #tpu.memory_space<vmem>>, vector<1x8x128xf32>,
    %c1_468 = arith.constant 1 : index
    %c0_469 = arith.constant 0 : index
    %c138_470 = arith.constant 138 : index
    %479 = vector.load %arg11[%c1_468, %c0_469, %c138_470] : memref<4x72x384xf32, #tpu.memory_space<vmem>>, vector<1x8x128xf32>
    %480 = vector.shape_cast %479 : vector<1x8x128xf32> to vector<8x128xf32>
    %481 = vector.shape_cast %414 : vector<8x128xf32> to vector<1x8x128xf32>
    tpu.vector_store %arg11[%c1_468, %c0_469, %c138_470], %481 {strides = array<i32>} : memref<4x72x384xf32, #tpu.memory_space<vmem>>, vector<1x8x128xf32>,
    %c1_471 = arith.constant 1 : index
    %c16_472 = arith.constant 16 : index
    %c137_473 = arith.constant 137 : index
    %482 = vector.load %arg11[%c1_471, %c16_472, %c137_473] : memref<4x72x384xf32, #tpu.memory_space<vmem>>, vector<1x8x128xf32>
    %483 = vector.shape_cast %482 : vector<1x8x128xf32> to vector<8x128xf32>
    %484 = vector.shape_cast %414 : vector<8x128xf32> to vector<1x8x128xf32>
    tpu.vector_store %arg11[%c1_471, %c16_472, %c137_473], %484 {strides = array<i32>} : memref<4x72x384xf32, #tpu.memory_space<vmem>>, vector<1x8x128xf32>,
    %c0_474 = arith.constant 0 : index
    %c56_475 = arith.constant 56 : index
    %c128_476 = arith.constant 128 : index
    %485 = vector.load %arg11[%c0_474, %c56_475, %c128_476] : memref<4x72x384xf32, #tpu.memory_space<vmem>>, vector<1x8x128xf32>
    %486 = vector.shape_cast %485 : vector<1x8x128xf32> to vector<8x128xf32>
    %487 = vector.shape_cast %414 : vector<8x128xf32> to vector<1x8x128xf32>
    tpu.vector_store %arg11[%c0_474, %c56_475, %c128_476], %487 {strides = array<i32>} : memref<4x72x384xf32, #tpu.memory_space<vmem>>, vector<1x8x128xf32>,
    %c1_477 = arith.constant 1 : index
    %c48_478 = arith.constant 48 : index
    %c128_479 = arith.constant 128 : index
    %488 = vector.load %arg11[%c1_477, %c48_478, %c128_479] : memref<4x72x384xf32, #tpu.memory_space<vmem>>, vector<1x8x128xf32>
    %489 = vector.shape_cast %488 : vector<1x8x128xf32> to vector<8x128xf32>
    %490 = vector.shape_cast %414 : vector<8x128xf32> to vector<1x8x128xf32>
    tpu.vector_store %arg11[%c1_477, %c48_478, %c128_479], %490 {strides = array<i32>} : memref<4x72x384xf32, #tpu.memory_space<vmem>>, vector<1x8x128xf32>,
    %c1_480 = arith.constant 1 : index
    %c64_481 = arith.constant 64 : index
    %c127_482 = arith.constant 127 : index
    %491 = vector.load %arg11[%c1_480, %c64_481, %c127_482] : memref<4x72x384xf32, #tpu.memory_space<vmem>>, vector<1x8x128xf32>
    %492 = vector.shape_cast %491 : vector<1x8x128xf32> to vector<8x128xf32>
    %493 = vector.shape_cast %414 : vector<8x128xf32> to vector<1x8x128xf32>
    tpu.vector_store %arg11[%c1_480, %c64_481, %c127_482], %493 {strides = array<i32>} : memref<4x72x384xf32, #tpu.memory_space<vmem>>, vector<1x8x128xf32>,
    %c2_483 = arith.constant 2 : index
    %c32_484 = arith.constant 32 : index
    %c128_485 = arith.constant 128 : index
    %494 = vector.load %arg11[%c2_483, %c32_484, %c128_485] : memref<4x72x384xf32, #tpu.memory_space<vmem>>, vector<1x8x128xf32>
    %495 = vector.shape_cast %494 : vector<1x8x128xf32> to vector<8x128xf32>
    %496 = vector.shape_cast %414 : vector<8x128xf32> to vector<1x8x128xf32>
    tpu.vector_store %arg11[%c2_483, %c32_484, %c128_485], %496 {strides = array<i32>} : memref<4x72x384xf32, #tpu.memory_space<vmem>>, vector<1x8x128xf32>,
    %c3_486 = arith.constant 3 : index
    %c24_487 = arith.constant 24 : index
    %c128_488 = arith.constant 128 : index
    %497 = vector.load %arg11[%c3_486, %c24_487, %c128_488] : memref<4x72x384xf32, #tpu.memory_space<vmem>>, vector<1x8x128xf32>
    %498 = vector.shape_cast %497 : vector<1x8x128xf32> to vector<8x128xf32>
    %499 = vector.shape_cast %414 : vector<8x128xf32> to vector<1x8x128xf32>
    tpu.vector_store %arg11[%c3_486, %c24_487, %c128_488], %499 {strides = array<i32>} : memref<4x72x384xf32, #tpu.memory_space<vmem>>, vector<1x8x128xf32>,
    %c3_489 = arith.constant 3 : index
    %c40_490 = arith.constant 40 : index
    %c127_491 = arith.constant 127 : index
    %500 = vector.load %arg11[%c3_489, %c40_490, %c127_491] : memref<4x72x384xf32, #tpu.memory_space<vmem>>, vector<1x8x128xf32>
    %501 = vector.shape_cast %500 : vector<1x8x128xf32> to vector<8x128xf32>
    %502 = vector.shape_cast %414 : vector<8x128xf32> to vector<1x8x128xf32>
    tpu.vector_store %arg11[%c3_489, %c40_490, %c127_491], %502 {strides = array<i32>} : memref<4x72x384xf32, #tpu.memory_space<vmem>>, vector<1x8x128xf32>,
    %c0_492 = arith.constant 0 : index
    %c0_493 = arith.constant 0 : index
    %c139_494 = arith.constant 139 : index
    %503 = vector.load %arg11[%c0_492, %c0_493, %c139_494] : memref<4x72x384xf32, #tpu.memory_space<vmem>>, vector<1x8x128xf32>
    %504 = vector.shape_cast %503 : vector<1x8x128xf32> to vector<8x128xf32>
    %505 = vector.shape_cast %421 : vector<8x128xf32> to vector<1x8x128xf32>
    tpu.vector_store %arg11[%c0_492, %c0_493, %c139_494], %505 {strides = array<i32>} : memref<4x72x384xf32, #tpu.memory_space<vmem>>, vector<1x8x128xf32>,
    %c0_495 = arith.constant 0 : index
    %c16_496 = arith.constant 16 : index
    %c138_497 = arith.constant 138 : index
    %506 = vector.load %arg11[%c0_495, %c16_496, %c138_497] : memref<4x72x384xf32, #tpu.memory_space<vmem>>, vector<1x8x128xf32>
    %507 = vector.shape_cast %506 : vector<1x8x128xf32> to vector<8x128xf32>
    %508 = vector.shape_cast %421 : vector<8x128xf32> to vector<1x8x128xf32>
    tpu.vector_store %arg11[%c0_495, %c16_496, %c138_497], %508 {strides = array<i32>} : memref<4x72x384xf32, #tpu.memory_space<vmem>>, vector<1x8x128xf32>,
    %c1_498 = arith.constant 1 : index
    %c8_499 = arith.constant 8 : index
    %c138_500 = arith.constant 138 : index
    %509 = vector.load %arg11[%c1_498, %c8_499, %c138_500] : memref<4x72x384xf32, #tpu.memory_space<vmem>>, vector<1x8x128xf32>
    %510 = vector.shape_cast %509 : vector<1x8x128xf32> to vector<8x128xf32>
    %511 = vector.shape_cast %421 : vector<8x128xf32> to vector<1x8x128xf32>
    tpu.vector_store %arg11[%c1_498, %c8_499, %c138_500], %511 {strides = array<i32>} : memref<4x72x384xf32, #tpu.memory_space<vmem>>, vector<1x8x128xf32>,
    %c0_501 = arith.constant 0 : index
    %c48_502 = arith.constant 48 : index
    %c129_503 = arith.constant 129 : index
    %512 = vector.load %arg11[%c0_501, %c48_502, %c129_503] : memref<4x72x384xf32, #tpu.memory_space<vmem>>, vector<1x8x128xf32>
    %513 = vector.shape_cast %512 : vector<1x8x128xf32> to vector<8x128xf32>
    %514 = vector.shape_cast %421 : vector<8x128xf32> to vector<1x8x128xf32>
    tpu.vector_store %arg11[%c0_501, %c48_502, %c129_503], %514 {strides = array<i32>} : memref<4x72x384xf32, #tpu.memory_space<vmem>>, vector<1x8x128xf32>,
    %c0_504 = arith.constant 0 : index
    %c64_505 = arith.constant 64 : index
    %c128_506 = arith.constant 128 : index
    %515 = vector.load %arg11[%c0_504, %c64_505, %c128_506] : memref<4x72x384xf32, #tpu.memory_space<vmem>>, vector<1x8x128xf32>
    %516 = vector.shape_cast %515 : vector<1x8x128xf32> to vector<8x128xf32>
    %517 = vector.shape_cast %421 : vector<8x128xf32> to vector<1x8x128xf32>
    tpu.vector_store %arg11[%c0_504, %c64_505, %c128_506], %517 {strides = array<i32>} : memref<4x72x384xf32, #tpu.memory_space<vmem>>, vector<1x8x128xf32>,
    %c1_507 = arith.constant 1 : index
    %c56_508 = arith.constant 56 : index
    %c128_509 = arith.constant 128 : index
    %518 = vector.load %arg11[%c1_507, %c56_508, %c128_509] : memref<4x72x384xf32, #tpu.memory_space<vmem>>, vector<1x8x128xf32>
    %519 = vector.shape_cast %518 : vector<1x8x128xf32> to vector<8x128xf32>
    %520 = vector.shape_cast %421 : vector<8x128xf32> to vector<1x8x128xf32>
    tpu.vector_store %arg11[%c1_507, %c56_508, %c128_509], %520 {strides = array<i32>} : memref<4x72x384xf32, #tpu.memory_space<vmem>>, vector<1x8x128xf32>,
    %c2_510 = arith.constant 2 : index
    %c24_511 = arith.constant 24 : index
    %c129_512 = arith.constant 129 : index
    %521 = vector.load %arg11[%c2_510, %c24_511, %c129_512] : memref<4x72x384xf32, #tpu.memory_space<vmem>>, vector<1x8x128xf32>
    %522 = vector.shape_cast %521 : vector<1x8x128xf32> to vector<8x128xf32>
    %523 = vector.shape_cast %421 : vector<8x128xf32> to vector<1x8x128xf32>
    tpu.vector_store %arg11[%c2_510, %c24_511, %c129_512], %523 {strides = array<i32>} : memref<4x72x384xf32, #tpu.memory_space<vmem>>, vector<1x8x128xf32>,
    %c2_513 = arith.constant 2 : index
    %c40_514 = arith.constant 40 : index
    %c128_515 = arith.constant 128 : index
    %524 = vector.load %arg11[%c2_513, %c40_514, %c128_515] : memref<4x72x384xf32, #tpu.memory_space<vmem>>, vector<1x8x128xf32>
    %525 = vector.shape_cast %524 : vector<1x8x128xf32> to vector<8x128xf32>
    %526 = vector.shape_cast %421 : vector<8x128xf32> to vector<1x8x128xf32>
    tpu.vector_store %arg11[%c2_513, %c40_514, %c128_515], %526 {strides = array<i32>} : memref<4x72x384xf32, #tpu.memory_space<vmem>>, vector<1x8x128xf32>,
    %c3_516 = arith.constant 3 : index
    %c32_517 = arith.constant 32 : index
    %c128_518 = arith.constant 128 : index
    %527 = vector.load %arg11[%c3_516, %c32_517, %c128_518] : memref<4x72x384xf32, #tpu.memory_space<vmem>>, vector<1x8x128xf32>
    %528 = vector.shape_cast %527 : vector<1x8x128xf32> to vector<8x128xf32>
    %529 = vector.shape_cast %421 : vector<8x128xf32> to vector<1x8x128xf32>
    tpu.vector_store %arg11[%c3_516, %c32_517, %c128_518], %529 {strides = array<i32>} : memref<4x72x384xf32, #tpu.memory_space<vmem>>, vector<1x8x128xf32>,
    %c3_519 = arith.constant 3 : index
    %c0_520 = arith.constant 0 : index
    %c0_521 = arith.constant 0 : index
    %530 = vector.load %arg4[%c3_519, %c0_520, %c0_521] : memref<5x8x72xf32, #tpu.memory_space<vmem>>, vector<1x8x72xf32>
    %531 = vector.shape_cast %530 : vector<1x8x72xf32> to vector<8x72xf32>
    %c0_522 = arith.constant 0 : index
    %c0_523 = arith.constant 0 : index
    %c128_524 = arith.constant 128 : index
    %532 = vector.load %arg11[%c0_522, %c0_523, %c128_524] : memref<4x72x384xf32, #tpu.memory_space<vmem>>, vector<1x72x128xf32>
    %533 = vector.shape_cast %532 : vector<1x72x128xf32> to vector<72x128xf32>
    %cst_525 = arith.constant dense<0.000000e+00> : vector<8x128xf32>
    %534 = tpu.matmul %531, %533, %cst_525 {dimension_numbers = #tpu.dot_dimension_numbers<[1], [0], [0], [1], [0, 0, 1, 1], [], []>} : vector<8x72xf32>, vector<72x128xf32>, vector<8x128xf32> -> vector<8x128xf32>
    %c3_526 = arith.constant 3 : index
    %c0_527 = arith.constant 0 : index
    %c0_528 = arith.constant 0 : index
    %c0_529 = arith.constant 0 : index
    %535 = vector.load %arg5[%c3_526, %c0_527, %c0_528, %c0_529] : memref<5x3x8x1xf32, #tpu.memory_space<vmem>>, vector<1x1x8x1xf32>
    %536 = vector.shape_cast %535 : vector<1x1x8x1xf32> to vector<8x1xf32>
    %537 = vector.broadcast %536 : vector<8x1xf32> to vector<8x128xf32>
    %538 = arith.addf %534, %537 : vector<8x128xf32>
    %c3_530 = arith.constant 3 : index
    %c1_531 = arith.constant 1 : index
    %c0_532 = arith.constant 0 : index
    %c0_533 = arith.constant 0 : index
    %539 = vector.load %arg5[%c3_530, %c1_531, %c0_532, %c0_533] : memref<5x3x8x1xf32, #tpu.memory_space<vmem>>, vector<1x1x8x1xf32>
    %540 = vector.shape_cast %539 : vector<1x1x8x1xf32> to vector<8x1xf32>
    %541 = vector.broadcast %540 : vector<8x1xf32> to vector<8x128xf32>
    %542 = arith.mulf %538, %541 : vector<8x128xf32>
    %c3_534 = arith.constant 3 : index
    %c2_535 = arith.constant 2 : index
    %c0_536 = arith.constant 0 : index
    %c0_537 = arith.constant 0 : index
    %543 = vector.load %arg5[%c3_534, %c2_535, %c0_536, %c0_537] : memref<5x3x8x1xf32, #tpu.memory_space<vmem>>, vector<1x1x8x1xf32>
    %544 = vector.shape_cast %543 : vector<1x1x8x1xf32> to vector<8x1xf32>
    %545 = vector.broadcast %544 : vector<8x1xf32> to vector<8x128xf32>
    %546 = arith.addf %542, %545 : vector<8x128xf32>
    %547 = arith.maximumf %400, %546 : vector<8x128xf32>
    %cst_538 = arith.constant 0.000000e+00 : f32
    %548 = vector.broadcast %cst_538 : f32 to vector<8x128xf32>
    %549 = arith.select %2, %547, %548 : vector<8x128xi1>, vector<8x128xf32>
    %c3_539 = arith.constant 3 : index
    %c0_540 = arith.constant 0 : index
    %c0_541 = arith.constant 0 : index
    %550 = vector.load %arg4[%c3_539, %c0_540, %c0_541] : memref<5x8x72xf32, #tpu.memory_space<vmem>>, vector<1x8x72xf32>
    %551 = vector.shape_cast %550 : vector<1x8x72xf32> to vector<8x72xf32>
    %c1_542 = arith.constant 1 : index
    %c0_543 = arith.constant 0 : index
    %c128_544 = arith.constant 128 : index
    %552 = vector.load %arg11[%c1_542, %c0_543, %c128_544] : memref<4x72x384xf32, #tpu.memory_space<vmem>>, vector<1x72x128xf32>
    %553 = vector.shape_cast %552 : vector<1x72x128xf32> to vector<72x128xf32>
    %cst_545 = arith.constant dense<0.000000e+00> : vector<8x128xf32>
    %554 = tpu.matmul %551, %553, %cst_545 {dimension_numbers = #tpu.dot_dimension_numbers<[1], [0], [0], [1], [0, 0, 1, 1], [], []>} : vector<8x72xf32>, vector<72x128xf32>, vector<8x128xf32> -> vector<8x128xf32>
    %c3_546 = arith.constant 3 : index
    %c0_547 = arith.constant 0 : index
    %c0_548 = arith.constant 0 : index
    %c0_549 = arith.constant 0 : index
    %555 = vector.load %arg5[%c3_546, %c0_547, %c0_548, %c0_549] : memref<5x3x8x1xf32, #tpu.memory_space<vmem>>, vector<1x1x8x1xf32>
    %556 = vector.shape_cast %555 : vector<1x1x8x1xf32> to vector<8x1xf32>
    %557 = vector.broadcast %556 : vector<8x1xf32> to vector<8x128xf32>
    %558 = arith.addf %554, %557 : vector<8x128xf32>
    %c3_550 = arith.constant 3 : index
    %c1_551 = arith.constant 1 : index
    %c0_552 = arith.constant 0 : index
    %c0_553 = arith.constant 0 : index
    %559 = vector.load %arg5[%c3_550, %c1_551, %c0_552, %c0_553] : memref<5x3x8x1xf32, #tpu.memory_space<vmem>>, vector<1x1x8x1xf32>
    %560 = vector.shape_cast %559 : vector<1x1x8x1xf32> to vector<8x1xf32>
    %561 = vector.broadcast %560 : vector<8x1xf32> to vector<8x128xf32>
    %562 = arith.mulf %558, %561 : vector<8x128xf32>
    %c3_554 = arith.constant 3 : index
    %c2_555 = arith.constant 2 : index
    %c0_556 = arith.constant 0 : index
    %c0_557 = arith.constant 0 : index
    %563 = vector.load %arg5[%c3_554, %c2_555, %c0_556, %c0_557] : memref<5x3x8x1xf32, #tpu.memory_space<vmem>>, vector<1x1x8x1xf32>
    %564 = vector.shape_cast %563 : vector<1x1x8x1xf32> to vector<8x1xf32>
    %565 = vector.broadcast %564 : vector<8x1xf32> to vector<8x128xf32>
    %566 = arith.addf %562, %565 : vector<8x128xf32>
    %567 = arith.maximumf %407, %566 : vector<8x128xf32>
    %cst_558 = arith.constant 0.000000e+00 : f32
    %568 = vector.broadcast %cst_558 : f32 to vector<8x128xf32>
    %569 = arith.select %2, %567, %568 : vector<8x128xi1>, vector<8x128xf32>
    %c3_559 = arith.constant 3 : index
    %c0_560 = arith.constant 0 : index
    %c0_561 = arith.constant 0 : index
    %570 = vector.load %arg4[%c3_559, %c0_560, %c0_561] : memref<5x8x72xf32, #tpu.memory_space<vmem>>, vector<1x8x72xf32>
    %571 = vector.shape_cast %570 : vector<1x8x72xf32> to vector<8x72xf32>
    %c2_562 = arith.constant 2 : index
    %c0_563 = arith.constant 0 : index
    %c128_564 = arith.constant 128 : index
    %572 = vector.load %arg11[%c2_562, %c0_563, %c128_564] : memref<4x72x384xf32, #tpu.memory_space<vmem>>, vector<1x72x128xf32>
    %573 = vector.shape_cast %572 : vector<1x72x128xf32> to vector<72x128xf32>
    %cst_565 = arith.constant dense<0.000000e+00> : vector<8x128xf32>
    %574 = tpu.matmul %571, %573, %cst_565 {dimension_numbers = #tpu.dot_dimension_numbers<[1], [0], [0], [1], [0, 0, 1, 1], [], []>} : vector<8x72xf32>, vector<72x128xf32>, vector<8x128xf32> -> vector<8x128xf32>
    %c3_566 = arith.constant 3 : index
    %c0_567 = arith.constant 0 : index
    %c0_568 = arith.constant 0 : index
    %c0_569 = arith.constant 0 : index
    %575 = vector.load %arg5[%c3_566, %c0_567, %c0_568, %c0_569] : memref<5x3x8x1xf32, #tpu.memory_space<vmem>>, vector<1x1x8x1xf32>
    %576 = vector.shape_cast %575 : vector<1x1x8x1xf32> to vector<8x1xf32>
    %577 = vector.broadcast %576 : vector<8x1xf32> to vector<8x128xf32>
    %578 = arith.addf %574, %577 : vector<8x128xf32>
    %c3_570 = arith.constant 3 : index
    %c1_571 = arith.constant 1 : index
    %c0_572 = arith.constant 0 : index
    %c0_573 = arith.constant 0 : index
    %579 = vector.load %arg5[%c3_570, %c1_571, %c0_572, %c0_573] : memref<5x3x8x1xf32, #tpu.memory_space<vmem>>, vector<1x1x8x1xf32>
    %580 = vector.shape_cast %579 : vector<1x1x8x1xf32> to vector<8x1xf32>
    %581 = vector.broadcast %580 : vector<8x1xf32> to vector<8x128xf32>
    %582 = arith.mulf %578, %581 : vector<8x128xf32>
    %c3_574 = arith.constant 3 : index
    %c2_575 = arith.constant 2 : index
    %c0_576 = arith.constant 0 : index
    %c0_577 = arith.constant 0 : index
    %583 = vector.load %arg5[%c3_574, %c2_575, %c0_576, %c0_577] : memref<5x3x8x1xf32, #tpu.memory_space<vmem>>, vector<1x1x8x1xf32>
    %584 = vector.shape_cast %583 : vector<1x1x8x1xf32> to vector<8x1xf32>
    %585 = vector.broadcast %584 : vector<8x1xf32> to vector<8x128xf32>
    %586 = arith.addf %582, %585 : vector<8x128xf32>
    %587 = arith.maximumf %414, %586 : vector<8x128xf32>
    %cst_578 = arith.constant 0.000000e+00 : f32
    %588 = vector.broadcast %cst_578 : f32 to vector<8x128xf32>
    %589 = arith.select %2, %587, %588 : vector<8x128xi1>, vector<8x128xf32>
    %c3_579 = arith.constant 3 : index
    %c0_580 = arith.constant 0 : index
    %c0_581 = arith.constant 0 : index
    %590 = vector.load %arg4[%c3_579, %c0_580, %c0_581] : memref<5x8x72xf32, #tpu.memory_space<vmem>>, vector<1x8x72xf32>
    %591 = vector.shape_cast %590 : vector<1x8x72xf32> to vector<8x72xf32>
    %c3_582 = arith.constant 3 : index
    %c0_583 = arith.constant 0 : index
    %c128_584 = arith.constant 128 : index
    %592 = vector.load %arg11[%c3_582, %c0_583, %c128_584] : memref<4x72x384xf32, #tpu.memory_space<vmem>>, vector<1x72x128xf32>
    %593 = vector.shape_cast %592 : vector<1x72x128xf32> to vector<72x128xf32>
    %cst_585 = arith.constant dense<0.000000e+00> : vector<8x128xf32>
    %594 = tpu.matmul %591, %593, %cst_585 {dimension_numbers = #tpu.dot_dimension_numbers<[1], [0], [0], [1], [0, 0, 1, 1], [], []>} : vector<8x72xf32>, vector<72x128xf32>, vector<8x128xf32> -> vector<8x128xf32>
    %c3_586 = arith.constant 3 : index
    %c0_587 = arith.constant 0 : index
    %c0_588 = arith.constant 0 : index
    %c0_589 = arith.constant 0 : index
    %595 = vector.load %arg5[%c3_586, %c0_587, %c0_588, %c0_589] : memref<5x3x8x1xf32, #tpu.memory_space<vmem>>, vector<1x1x8x1xf32>
    %596 = vector.shape_cast %595 : vector<1x1x8x1xf32> to vector<8x1xf32>
    %597 = vector.broadcast %596 : vector<8x1xf32> to vector<8x128xf32>
    %598 = arith.addf %594, %597 : vector<8x128xf32>
    %c3_590 = arith.constant 3 : index
    %c1_591 = arith.constant 1 : index
    %c0_592 = arith.constant 0 : index
    %c0_593 = arith.constant 0 : index
    %599 = vector.load %arg5[%c3_590, %c1_591, %c0_592, %c0_593] : memref<5x3x8x1xf32, #tpu.memory_space<vmem>>, vector<1x1x8x1xf32>
    %600 = vector.shape_cast %599 : vector<1x1x8x1xf32> to vector<8x1xf32>
    %601 = vector.broadcast %600 : vector<8x1xf32> to vector<8x128xf32>
    %602 = arith.mulf %598, %601 : vector<8x128xf32>
    %c3_594 = arith.constant 3 : index
    %c2_595 = arith.constant 2 : index
    %c0_596 = arith.constant 0 : index
    %c0_597 = arith.constant 0 : index
    %603 = vector.load %arg5[%c3_594, %c2_595, %c0_596, %c0_597] : memref<5x3x8x1xf32, #tpu.memory_space<vmem>>, vector<1x1x8x1xf32>
    %604 = vector.shape_cast %603 : vector<1x1x8x1xf32> to vector<8x1xf32>
    %605 = vector.broadcast %604 : vector<8x1xf32> to vector<8x128xf32>
    %606 = arith.addf %602, %605 : vector<8x128xf32>
    %607 = arith.maximumf %421, %606 : vector<8x128xf32>
    %cst_598 = arith.constant 0.000000e+00 : f32
    %608 = vector.broadcast %cst_598 : f32 to vector<8x128xf32>
    %609 = arith.select %2, %607, %608 : vector<8x128xi1>, vector<8x128xf32>
    %c0_599 = arith.constant 0 : index
    %c32_600 = arith.constant 32 : index
    %c128_601 = arith.constant 128 : index
    %610 = vector.load %arg11[%c0_599, %c32_600, %c128_601] : memref<4x72x384xf32, #tpu.memory_space<vmem>>, vector<1x8x128xf32>
    %611 = vector.shape_cast %610 : vector<1x8x128xf32> to vector<8x128xf32>
    %612 = vector.shape_cast %549 : vector<8x128xf32> to vector<1x8x128xf32>
    tpu.vector_store %arg11[%c0_599, %c32_600, %c128_601], %612 {strides = array<i32>} : memref<4x72x384xf32, #tpu.memory_space<vmem>>, vector<1x8x128xf32>,
    %c1_602 = arith.constant 1 : index
    %c24_603 = arith.constant 24 : index
    %c128_604 = arith.constant 128 : index
    %613 = vector.load %arg11[%c1_602, %c24_603, %c128_604] : memref<4x72x384xf32, #tpu.memory_space<vmem>>, vector<1x8x128xf32>
    %614 = vector.shape_cast %613 : vector<1x8x128xf32> to vector<8x128xf32>
    %615 = vector.shape_cast %549 : vector<8x128xf32> to vector<1x8x128xf32>
    tpu.vector_store %arg11[%c1_602, %c24_603, %c128_604], %615 {strides = array<i32>} : memref<4x72x384xf32, #tpu.memory_space<vmem>>, vector<1x8x128xf32>,
    %c1_605 = arith.constant 1 : index
    %c40_606 = arith.constant 40 : index
    %c127_607 = arith.constant 127 : index
    %616 = vector.load %arg11[%c1_605, %c40_606, %c127_607] : memref<4x72x384xf32, #tpu.memory_space<vmem>>, vector<1x8x128xf32>
    %617 = vector.shape_cast %616 : vector<1x8x128xf32> to vector<8x128xf32>
    %618 = vector.shape_cast %549 : vector<8x128xf32> to vector<1x8x128xf32>
    tpu.vector_store %arg11[%c1_605, %c40_606, %c127_607], %618 {strides = array<i32>} : memref<4x72x384xf32, #tpu.memory_space<vmem>>, vector<1x8x128xf32>,
    %c2_608 = arith.constant 2 : index
    %c8_609 = arith.constant 8 : index
    %c128_610 = arith.constant 128 : index
    %619 = vector.load %arg11[%c2_608, %c8_609, %c128_610] : memref<4x72x384xf32, #tpu.memory_space<vmem>>, vector<1x8x128xf32>
    %620 = vector.shape_cast %619 : vector<1x8x128xf32> to vector<8x128xf32>
    %621 = vector.shape_cast %549 : vector<8x128xf32> to vector<1x8x128xf32>
    tpu.vector_store %arg11[%c2_608, %c8_609, %c128_610], %621 {strides = array<i32>} : memref<4x72x384xf32, #tpu.memory_space<vmem>>, vector<1x8x128xf32>,
    %c3_611 = arith.constant 3 : index
    %c0_612 = arith.constant 0 : index
    %c128_613 = arith.constant 128 : index
    %622 = vector.load %arg11[%c3_611, %c0_612, %c128_613] : memref<4x72x384xf32, #tpu.memory_space<vmem>>, vector<1x8x128xf32>
    %623 = vector.shape_cast %622 : vector<1x8x128xf32> to vector<8x128xf32>
    %624 = vector.shape_cast %549 : vector<8x128xf32> to vector<1x8x128xf32>
    tpu.vector_store %arg11[%c3_611, %c0_612, %c128_613], %624 {strides = array<i32>} : memref<4x72x384xf32, #tpu.memory_space<vmem>>, vector<1x8x128xf32>,
    %c3_614 = arith.constant 3 : index
    %c16_615 = arith.constant 16 : index
    %c127_616 = arith.constant 127 : index
    %625 = vector.load %arg11[%c3_614, %c16_615, %c127_616] : memref<4x72x384xf32, #tpu.memory_space<vmem>>, vector<1x8x128xf32>
    %626 = vector.shape_cast %625 : vector<1x8x128xf32> to vector<8x128xf32>
    %627 = vector.shape_cast %549 : vector<8x128xf32> to vector<1x8x128xf32>
    tpu.vector_store %arg11[%c3_614, %c16_615, %c127_616], %627 {strides = array<i32>} : memref<4x72x384xf32, #tpu.memory_space<vmem>>, vector<1x8x128xf32>,
    %c2_617 = arith.constant 2 : index
    %c56_618 = arith.constant 56 : index
    %c118_619 = arith.constant 118 : index
    %628 = vector.load %arg11[%c2_617, %c56_618, %c118_619] : memref<4x72x384xf32, #tpu.memory_space<vmem>>, vector<1x8x128xf32>
    %629 = vector.shape_cast %628 : vector<1x8x128xf32> to vector<8x128xf32>
    %630 = vector.shape_cast %549 : vector<8x128xf32> to vector<1x8x128xf32>
    tpu.vector_store %arg11[%c2_617, %c56_618, %c118_619], %630 {strides = array<i32>} : memref<4x72x384xf32, #tpu.memory_space<vmem>>, vector<1x8x128xf32>,
    %c3_620 = arith.constant 3 : index
    %c48_621 = arith.constant 48 : index
    %c118_622 = arith.constant 118 : index
    %631 = vector.load %arg11[%c3_620, %c48_621, %c118_622] : memref<4x72x384xf32, #tpu.memory_space<vmem>>, vector<1x8x128xf32>
    %632 = vector.shape_cast %631 : vector<1x8x128xf32> to vector<8x128xf32>
    %633 = vector.shape_cast %549 : vector<8x128xf32> to vector<1x8x128xf32>
    tpu.vector_store %arg11[%c3_620, %c48_621, %c118_622], %633 {strides = array<i32>} : memref<4x72x384xf32, #tpu.memory_space<vmem>>, vector<1x8x128xf32>,
    %c3_623 = arith.constant 3 : index
    %c64_624 = arith.constant 64 : index
    %c117_625 = arith.constant 117 : index
    %634 = vector.load %arg11[%c3_623, %c64_624, %c117_625] : memref<4x72x384xf32, #tpu.memory_space<vmem>>, vector<1x8x128xf32>
    %635 = vector.shape_cast %634 : vector<1x8x128xf32> to vector<8x128xf32>
    %636 = vector.shape_cast %549 : vector<8x128xf32> to vector<1x8x128xf32>
    tpu.vector_store %arg11[%c3_623, %c64_624, %c117_625], %636 {strides = array<i32>} : memref<4x72x384xf32, #tpu.memory_space<vmem>>, vector<1x8x128xf32>,
    %c0_626 = arith.constant 0 : index
    %c24_627 = arith.constant 24 : index
    %c129_628 = arith.constant 129 : index
    %637 = vector.load %arg11[%c0_626, %c24_627, %c129_628] : memref<4x72x384xf32, #tpu.memory_space<vmem>>, vector<1x8x128xf32>
    %638 = vector.shape_cast %637 : vector<1x8x128xf32> to vector<8x128xf32>
    %639 = vector.shape_cast %569 : vector<8x128xf32> to vector<1x8x128xf32>
    tpu.vector_store %arg11[%c0_626, %c24_627, %c129_628], %639 {strides = array<i32>} : memref<4x72x384xf32, #tpu.memory_space<vmem>>, vector<1x8x128xf32>,
    %c0_629 = arith.constant 0 : index
    %c40_630 = arith.constant 40 : index
    %c128_631 = arith.constant 128 : index
    %640 = vector.load %arg11[%c0_629, %c40_630, %c128_631] : memref<4x72x384xf32, #tpu.memory_space<vmem>>, vector<1x8x128xf32>
    %641 = vector.shape_cast %640 : vector<1x8x128xf32> to vector<8x128xf32>
    %642 = vector.shape_cast %569 : vector<8x128xf32> to vector<1x8x128xf32>
    tpu.vector_store %arg11[%c0_629, %c40_630, %c128_631], %642 {strides = array<i32>} : memref<4x72x384xf32, #tpu.memory_space<vmem>>, vector<1x8x128xf32>,
    %c1_632 = arith.constant 1 : index
    %c32_633 = arith.constant 32 : index
    %c128_634 = arith.constant 128 : index
    %643 = vector.load %arg11[%c1_632, %c32_633, %c128_634] : memref<4x72x384xf32, #tpu.memory_space<vmem>>, vector<1x8x128xf32>
    %644 = vector.shape_cast %643 : vector<1x8x128xf32> to vector<8x128xf32>
    %645 = vector.shape_cast %569 : vector<8x128xf32> to vector<1x8x128xf32>
    tpu.vector_store %arg11[%c1_632, %c32_633, %c128_634], %645 {strides = array<i32>} : memref<4x72x384xf32, #tpu.memory_space<vmem>>, vector<1x8x128xf32>,
    %c2_635 = arith.constant 2 : index
    %c0_636 = arith.constant 0 : index
    %c129_637 = arith.constant 129 : index
    %646 = vector.load %arg11[%c2_635, %c0_636, %c129_637] : memref<4x72x384xf32, #tpu.memory_space<vmem>>, vector<1x8x128xf32>
    %647 = vector.shape_cast %646 : vector<1x8x128xf32> to vector<8x128xf32>
    %648 = vector.shape_cast %569 : vector<8x128xf32> to vector<1x8x128xf32>
    tpu.vector_store %arg11[%c2_635, %c0_636, %c129_637], %648 {strides = array<i32>} : memref<4x72x384xf32, #tpu.memory_space<vmem>>, vector<1x8x128xf32>,
    %c2_638 = arith.constant 2 : index
    %c16_639 = arith.constant 16 : index
    %c128_640 = arith.constant 128 : index
    %649 = vector.load %arg11[%c2_638, %c16_639, %c128_640] : memref<4x72x384xf32, #tpu.memory_space<vmem>>, vector<1x8x128xf32>
    %650 = vector.shape_cast %649 : vector<1x8x128xf32> to vector<8x128xf32>
    %651 = vector.shape_cast %569 : vector<8x128xf32> to vector<1x8x128xf32>
    tpu.vector_store %arg11[%c2_638, %c16_639, %c128_640], %651 {strides = array<i32>} : memref<4x72x384xf32, #tpu.memory_space<vmem>>, vector<1x8x128xf32>,
    %c3_641 = arith.constant 3 : index
    %c8_642 = arith.constant 8 : index
    %c128_643 = arith.constant 128 : index
    %652 = vector.load %arg11[%c3_641, %c8_642, %c128_643] : memref<4x72x384xf32, #tpu.memory_space<vmem>>, vector<1x8x128xf32>
    %653 = vector.shape_cast %652 : vector<1x8x128xf32> to vector<8x128xf32>
    %654 = vector.shape_cast %569 : vector<8x128xf32> to vector<1x8x128xf32>
    tpu.vector_store %arg11[%c3_641, %c8_642, %c128_643], %654 {strides = array<i32>} : memref<4x72x384xf32, #tpu.memory_space<vmem>>, vector<1x8x128xf32>,
    %c2_644 = arith.constant 2 : index
    %c48_645 = arith.constant 48 : index
    %c119_646 = arith.constant 119 : index
    %655 = vector.load %arg11[%c2_644, %c48_645, %c119_646] : memref<4x72x384xf32, #tpu.memory_space<vmem>>, vector<1x8x128xf32>
    %656 = vector.shape_cast %655 : vector<1x8x128xf32> to vector<8x128xf32>
    %657 = vector.shape_cast %569 : vector<8x128xf32> to vector<1x8x128xf32>
    tpu.vector_store %arg11[%c2_644, %c48_645, %c119_646], %657 {strides = array<i32>} : memref<4x72x384xf32, #tpu.memory_space<vmem>>, vector<1x8x128xf32>,
    %c2_647 = arith.constant 2 : index
    %c64_648 = arith.constant 64 : index
    %c118_649 = arith.constant 118 : index
    %658 = vector.load %arg11[%c2_647, %c64_648, %c118_649] : memref<4x72x384xf32, #tpu.memory_space<vmem>>, vector<1x8x128xf32>
    %659 = vector.shape_cast %658 : vector<1x8x128xf32> to vector<8x128xf32>
    %660 = vector.shape_cast %569 : vector<8x128xf32> to vector<1x8x128xf32>
    tpu.vector_store %arg11[%c2_647, %c64_648, %c118_649], %660 {strides = array<i32>} : memref<4x72x384xf32, #tpu.memory_space<vmem>>, vector<1x8x128xf32>,
    %c3_650 = arith.constant 3 : index
    %c56_651 = arith.constant 56 : index
    %c118_652 = arith.constant 118 : index
    %661 = vector.load %arg11[%c3_650, %c56_651, %c118_652] : memref<4x72x384xf32, #tpu.memory_space<vmem>>, vector<1x8x128xf32>
    %662 = vector.shape_cast %661 : vector<1x8x128xf32> to vector<8x128xf32>
    %663 = vector.shape_cast %569 : vector<8x128xf32> to vector<1x8x128xf32>
    tpu.vector_store %arg11[%c3_650, %c56_651, %c118_652], %663 {strides = array<i32>} : memref<4x72x384xf32, #tpu.memory_space<vmem>>, vector<1x8x128xf32>,
    %c0_653 = arith.constant 0 : index
    %c8_654 = arith.constant 8 : index
    %c138_655 = arith.constant 138 : index
    %664 = vector.load %arg11[%c0_653, %c8_654, %c138_655] : memref<4x72x384xf32, #tpu.memory_space<vmem>>, vector<1x8x128xf32>
    %665 = vector.shape_cast %664 : vector<1x8x128xf32> to vector<8x128xf32>
    %666 = vector.shape_cast %589 : vector<8x128xf32> to vector<1x8x128xf32>
    tpu.vector_store %arg11[%c0_653, %c8_654, %c138_655], %666 {strides = array<i32>} : memref<4x72x384xf32, #tpu.memory_space<vmem>>, vector<1x8x128xf32>,
    %c1_656 = arith.constant 1 : index
    %c0_657 = arith.constant 0 : index
    %c138_658 = arith.constant 138 : index
    %667 = vector.load %arg11[%c1_656, %c0_657, %c138_658] : memref<4x72x384xf32, #tpu.memory_space<vmem>>, vector<1x8x128xf32>
    %668 = vector.shape_cast %667 : vector<1x8x128xf32> to vector<8x128xf32>
    %669 = vector.shape_cast %589 : vector<8x128xf32> to vector<1x8x128xf32>
    tpu.vector_store %arg11[%c1_656, %c0_657, %c138_658], %669 {strides = array<i32>} : memref<4x72x384xf32, #tpu.memory_space<vmem>>, vector<1x8x128xf32>,
    %c1_659 = arith.constant 1 : index
    %c16_660 = arith.constant 16 : index
    %c137_661 = arith.constant 137 : index
    %670 = vector.load %arg11[%c1_659, %c16_660, %c137_661] : memref<4x72x384xf32, #tpu.memory_space<vmem>>, vector<1x8x128xf32>
    %671 = vector.shape_cast %670 : vector<1x8x128xf32> to vector<8x128xf32>
    %672 = vector.shape_cast %589 : vector<8x128xf32> to vector<1x8x128xf32>
    tpu.vector_store %arg11[%c1_659, %c16_660, %c137_661], %672 {strides = array<i32>} : memref<4x72x384xf32, #tpu.memory_space<vmem>>, vector<1x8x128xf32>,
    %c0_662 = arith.constant 0 : index
    %c56_663 = arith.constant 56 : index
    %c128_664 = arith.constant 128 : index
    %673 = vector.load %arg11[%c0_662, %c56_663, %c128_664] : memref<4x72x384xf32, #tpu.memory_space<vmem>>, vector<1x8x128xf32>
    %674 = vector.shape_cast %673 : vector<1x8x128xf32> to vector<8x128xf32>
    %675 = vector.shape_cast %589 : vector<8x128xf32> to vector<1x8x128xf32>
    tpu.vector_store %arg11[%c0_662, %c56_663, %c128_664], %675 {strides = array<i32>} : memref<4x72x384xf32, #tpu.memory_space<vmem>>, vector<1x8x128xf32>,
    %c1_665 = arith.constant 1 : index
    %c48_666 = arith.constant 48 : index
    %c128_667 = arith.constant 128 : index
    %676 = vector.load %arg11[%c1_665, %c48_666, %c128_667] : memref<4x72x384xf32, #tpu.memory_space<vmem>>, vector<1x8x128xf32>
    %677 = vector.shape_cast %676 : vector<1x8x128xf32> to vector<8x128xf32>
    %678 = vector.shape_cast %589 : vector<8x128xf32> to vector<1x8x128xf32>
    tpu.vector_store %arg11[%c1_665, %c48_666, %c128_667], %678 {strides = array<i32>} : memref<4x72x384xf32, #tpu.memory_space<vmem>>, vector<1x8x128xf32>,
    %c1_668 = arith.constant 1 : index
    %c64_669 = arith.constant 64 : index
    %c127_670 = arith.constant 127 : index
    %679 = vector.load %arg11[%c1_668, %c64_669, %c127_670] : memref<4x72x384xf32, #tpu.memory_space<vmem>>, vector<1x8x128xf32>
    %680 = vector.shape_cast %679 : vector<1x8x128xf32> to vector<8x128xf32>
    %681 = vector.shape_cast %589 : vector<8x128xf32> to vector<1x8x128xf32>
    tpu.vector_store %arg11[%c1_668, %c64_669, %c127_670], %681 {strides = array<i32>} : memref<4x72x384xf32, #tpu.memory_space<vmem>>, vector<1x8x128xf32>,
    %c2_671 = arith.constant 2 : index
    %c32_672 = arith.constant 32 : index
    %c128_673 = arith.constant 128 : index
    %682 = vector.load %arg11[%c2_671, %c32_672, %c128_673] : memref<4x72x384xf32, #tpu.memory_space<vmem>>, vector<1x8x128xf32>
    %683 = vector.shape_cast %682 : vector<1x8x128xf32> to vector<8x128xf32>
    %684 = vector.shape_cast %589 : vector<8x128xf32> to vector<1x8x128xf32>
    tpu.vector_store %arg11[%c2_671, %c32_672, %c128_673], %684 {strides = array<i32>} : memref<4x72x384xf32, #tpu.memory_space<vmem>>, vector<1x8x128xf32>,
    %c3_674 = arith.constant 3 : index
    %c24_675 = arith.constant 24 : index
    %c128_676 = arith.constant 128 : index
    %685 = vector.load %arg11[%c3_674, %c24_675, %c128_676] : memref<4x72x384xf32, #tpu.memory_space<vmem>>, vector<1x8x128xf32>
    %686 = vector.shape_cast %685 : vector<1x8x128xf32> to vector<8x128xf32>
    %687 = vector.shape_cast %589 : vector<8x128xf32> to vector<1x8x128xf32>
    tpu.vector_store %arg11[%c3_674, %c24_675, %c128_676], %687 {strides = array<i32>} : memref<4x72x384xf32, #tpu.memory_space<vmem>>, vector<1x8x128xf32>,
    %c3_677 = arith.constant 3 : index
    %c40_678 = arith.constant 40 : index
    %c127_679 = arith.constant 127 : index
    %688 = vector.load %arg11[%c3_677, %c40_678, %c127_679] : memref<4x72x384xf32, #tpu.memory_space<vmem>>, vector<1x8x128xf32>
    %689 = vector.shape_cast %688 : vector<1x8x128xf32> to vector<8x128xf32>
    %690 = vector.shape_cast %589 : vector<8x128xf32> to vector<1x8x128xf32>
    tpu.vector_store %arg11[%c3_677, %c40_678, %c127_679], %690 {strides = array<i32>} : memref<4x72x384xf32, #tpu.memory_space<vmem>>, vector<1x8x128xf32>,
    %c0_680 = arith.constant 0 : index
    %c0_681 = arith.constant 0 : index
    %c139_682 = arith.constant 139 : index
    %691 = vector.load %arg11[%c0_680, %c0_681, %c139_682] : memref<4x72x384xf32, #tpu.memory_space<vmem>>, vector<1x8x128xf32>
    %692 = vector.shape_cast %691 : vector<1x8x128xf32> to vector<8x128xf32>
    %693 = vector.shape_cast %609 : vector<8x128xf32> to vector<1x8x128xf32>
    tpu.vector_store %arg11[%c0_680, %c0_681, %c139_682], %693 {strides = array<i32>} : memref<4x72x384xf32, #tpu.memory_space<vmem>>, vector<1x8x128xf32>,
    %c0_683 = arith.constant 0 : index
    %c16_684 = arith.constant 16 : index
    %c138_685 = arith.constant 138 : index
    %694 = vector.load %arg11[%c0_683, %c16_684, %c138_685] : memref<4x72x384xf32, #tpu.memory_space<vmem>>, vector<1x8x128xf32>
    %695 = vector.shape_cast %694 : vector<1x8x128xf32> to vector<8x128xf32>
    %696 = vector.shape_cast %609 : vector<8x128xf32> to vector<1x8x128xf32>
    tpu.vector_store %arg11[%c0_683, %c16_684, %c138_685], %696 {strides = array<i32>} : memref<4x72x384xf32, #tpu.memory_space<vmem>>, vector<1x8x128xf32>,
    %c1_686 = arith.constant 1 : index
    %c8_687 = arith.constant 8 : index
    %c138_688 = arith.constant 138 : index
    %697 = vector.load %arg11[%c1_686, %c8_687, %c138_688] : memref<4x72x384xf32, #tpu.memory_space<vmem>>, vector<1x8x128xf32>
    %698 = vector.shape_cast %697 : vector<1x8x128xf32> to vector<8x128xf32>
    %699 = vector.shape_cast %609 : vector<8x128xf32> to vector<1x8x128xf32>
    tpu.vector_store %arg11[%c1_686, %c8_687, %c138_688], %699 {strides = array<i32>} : memref<4x72x384xf32, #tpu.memory_space<vmem>>, vector<1x8x128xf32>,
    %c0_689 = arith.constant 0 : index
    %c48_690 = arith.constant 48 : index
    %c129_691 = arith.constant 129 : index
    %700 = vector.load %arg11[%c0_689, %c48_690, %c129_691] : memref<4x72x384xf32, #tpu.memory_space<vmem>>, vector<1x8x128xf32>
    %701 = vector.shape_cast %700 : vector<1x8x128xf32> to vector<8x128xf32>
    %702 = vector.shape_cast %609 : vector<8x128xf32> to vector<1x8x128xf32>
    tpu.vector_store %arg11[%c0_689, %c48_690, %c129_691], %702 {strides = array<i32>} : memref<4x72x384xf32, #tpu.memory_space<vmem>>, vector<1x8x128xf32>,
    %c0_692 = arith.constant 0 : index
    %c64_693 = arith.constant 64 : index
    %c128_694 = arith.constant 128 : index
    %703 = vector.load %arg11[%c0_692, %c64_693, %c128_694] : memref<4x72x384xf32, #tpu.memory_space<vmem>>, vector<1x8x128xf32>
    %704 = vector.shape_cast %703 : vector<1x8x128xf32> to vector<8x128xf32>
    %705 = vector.shape_cast %609 : vector<8x128xf32> to vector<1x8x128xf32>
    tpu.vector_store %arg11[%c0_692, %c64_693, %c128_694], %705 {strides = array<i32>} : memref<4x72x384xf32, #tpu.memory_space<vmem>>, vector<1x8x128xf32>,
    %c1_695 = arith.constant 1 : index
    %c56_696 = arith.constant 56 : index
    %c128_697 = arith.constant 128 : index
    %706 = vector.load %arg11[%c1_695, %c56_696, %c128_697] : memref<4x72x384xf32, #tpu.memory_space<vmem>>, vector<1x8x128xf32>
    %707 = vector.shape_cast %706 : vector<1x8x128xf32> to vector<8x128xf32>
    %708 = vector.shape_cast %609 : vector<8x128xf32> to vector<1x8x128xf32>
    tpu.vector_store %arg11[%c1_695, %c56_696, %c128_697], %708 {strides = array<i32>} : memref<4x72x384xf32, #tpu.memory_space<vmem>>, vector<1x8x128xf32>,
    %c2_698 = arith.constant 2 : index
    %c24_699 = arith.constant 24 : index
    %c129_700 = arith.constant 129 : index
    %709 = vector.load %arg11[%c2_698, %c24_699, %c129_700] : memref<4x72x384xf32, #tpu.memory_space<vmem>>, vector<1x8x128xf32>
    %710 = vector.shape_cast %709 : vector<1x8x128xf32> to vector<8x128xf32>
    %711 = vector.shape_cast %609 : vector<8x128xf32> to vector<1x8x128xf32>
    tpu.vector_store %arg11[%c2_698, %c24_699, %c129_700], %711 {strides = array<i32>} : memref<4x72x384xf32, #tpu.memory_space<vmem>>, vector<1x8x128xf32>,
    %c2_701 = arith.constant 2 : index
    %c40_702 = arith.constant 40 : index
    %c128_703 = arith.constant 128 : index
    %712 = vector.load %arg11[%c2_701, %c40_702, %c128_703] : memref<4x72x384xf32, #tpu.memory_space<vmem>>, vector<1x8x128xf32>
    %713 = vector.shape_cast %712 : vector<1x8x128xf32> to vector<8x128xf32>
    %714 = vector.shape_cast %609 : vector<8x128xf32> to vector<1x8x128xf32>
    tpu.vector_store %arg11[%c2_701, %c40_702, %c128_703], %714 {strides = array<i32>} : memref<4x72x384xf32, #tpu.memory_space<vmem>>, vector<1x8x128xf32>,
    %c3_704 = arith.constant 3 : index
    %c32_705 = arith.constant 32 : index
    %c128_706 = arith.constant 128 : index
    %715 = vector.load %arg11[%c3_704, %c32_705, %c128_706] : memref<4x72x384xf32, #tpu.memory_space<vmem>>, vector<1x8x128xf32>
    %716 = vector.shape_cast %715 : vector<1x8x128xf32> to vector<8x128xf32>
    %717 = vector.shape_cast %609 : vector<8x128xf32> to vector<1x8x128xf32>
    tpu.vector_store %arg11[%c3_704, %c32_705, %c128_706], %717 {strides = array<i32>} : memref<4x72x384xf32, #tpu.memory_space<vmem>>, vector<1x8x128xf32>,
    %c4 = arith.constant 4 : index
    %c0_707 = arith.constant 0 : index
    %c0_708 = arith.constant 0 : index
    %718 = vector.load %arg3[%c4, %c0_707, %c0_708] : memref<5x8x72xf32, #tpu.memory_space<vmem>>, vector<1x8x72xf32>
    %719 = vector.shape_cast %718 : vector<1x8x72xf32> to vector<8x72xf32>
    %c0_709 = arith.constant 0 : index
    %c0_710 = arith.constant 0 : index
    %c128_711 = arith.constant 128 : index
    %720 = vector.load %arg11[%c0_709, %c0_710, %c128_711] : memref<4x72x384xf32, #tpu.memory_space<vmem>>, vector<1x72x128xf32>
    %721 = vector.shape_cast %720 : vector<1x72x128xf32> to vector<72x128xf32>
    %cst_712 = arith.constant dense<0.000000e+00> : vector<8x128xf32>
    %722 = tpu.matmul %719, %721, %cst_712 {dimension_numbers = #tpu.dot_dimension_numbers<[1], [0], [0], [1], [0, 0, 1, 1], [], []>} : vector<8x72xf32>, vector<72x128xf32>, vector<8x128xf32> -> vector<8x128xf32>
    %cst_713 = arith.constant 0.000000e+00 : f32
    %723 = vector.broadcast %cst_713 : f32 to vector<8x128xf32>
    %724 = arith.select %2, %722, %723 : vector<8x128xi1>, vector<8x128xf32>
    %c4_714 = arith.constant 4 : index
    %c0_715 = arith.constant 0 : index
    %c0_716 = arith.constant 0 : index
    %725 = vector.load %arg3[%c4_714, %c0_715, %c0_716] : memref<5x8x72xf32, #tpu.memory_space<vmem>>, vector<1x8x72xf32>
    %726 = vector.shape_cast %725 : vector<1x8x72xf32> to vector<8x72xf32>
    %c1_717 = arith.constant 1 : index
    %c0_718 = arith.constant 0 : index
    %c128_719 = arith.constant 128 : index
    %727 = vector.load %arg11[%c1_717, %c0_718, %c128_719] : memref<4x72x384xf32, #tpu.memory_space<vmem>>, vector<1x72x128xf32>
    %728 = vector.shape_cast %727 : vector<1x72x128xf32> to vector<72x128xf32>
    %cst_720 = arith.constant dense<0.000000e+00> : vector<8x128xf32>
    %729 = tpu.matmul %726, %728, %cst_720 {dimension_numbers = #tpu.dot_dimension_numbers<[1], [0], [0], [1], [0, 0, 1, 1], [], []>} : vector<8x72xf32>, vector<72x128xf32>, vector<8x128xf32> -> vector<8x128xf32>
    %cst_721 = arith.constant 0.000000e+00 : f32
    %730 = vector.broadcast %cst_721 : f32 to vector<8x128xf32>
    %731 = arith.select %2, %729, %730 : vector<8x128xi1>, vector<8x128xf32>
    %c4_722 = arith.constant 4 : index
    %c0_723 = arith.constant 0 : index
    %c0_724 = arith.constant 0 : index
    %732 = vector.load %arg3[%c4_722, %c0_723, %c0_724] : memref<5x8x72xf32, #tpu.memory_space<vmem>>, vector<1x8x72xf32>
    %733 = vector.shape_cast %732 : vector<1x8x72xf32> to vector<8x72xf32>
    %c2_725 = arith.constant 2 : index
    %c0_726 = arith.constant 0 : index
    %c128_727 = arith.constant 128 : index
    %734 = vector.load %arg11[%c2_725, %c0_726, %c128_727] : memref<4x72x384xf32, #tpu.memory_space<vmem>>, vector<1x72x128xf32>
    %735 = vector.shape_cast %734 : vector<1x72x128xf32> to vector<72x128xf32>
    %cst_728 = arith.constant dense<0.000000e+00> : vector<8x128xf32>
    %736 = tpu.matmul %733, %735, %cst_728 {dimension_numbers = #tpu.dot_dimension_numbers<[1], [0], [0], [1], [0, 0, 1, 1], [], []>} : vector<8x72xf32>, vector<72x128xf32>, vector<8x128xf32> -> vector<8x128xf32>
    %cst_729 = arith.constant 0.000000e+00 : f32
    %737 = vector.broadcast %cst_729 : f32 to vector<8x128xf32>
    %738 = arith.select %2, %736, %737 : vector<8x128xi1>, vector<8x128xf32>
    %c4_730 = arith.constant 4 : index
    %c0_731 = arith.constant 0 : index
    %c0_732 = arith.constant 0 : index
    %739 = vector.load %arg3[%c4_730, %c0_731, %c0_732] : memref<5x8x72xf32, #tpu.memory_space<vmem>>, vector<1x8x72xf32>
    %740 = vector.shape_cast %739 : vector<1x8x72xf32> to vector<8x72xf32>
    %c3_733 = arith.constant 3 : index
    %c0_734 = arith.constant 0 : index
    %c128_735 = arith.constant 128 : index
    %741 = vector.load %arg11[%c3_733, %c0_734, %c128_735] : memref<4x72x384xf32, #tpu.memory_space<vmem>>, vector<1x72x128xf32>
    %742 = vector.shape_cast %741 : vector<1x72x128xf32> to vector<72x128xf32>
    %cst_736 = arith.constant dense<0.000000e+00> : vector<8x128xf32>
    %743 = tpu.matmul %740, %742, %cst_736 {dimension_numbers = #tpu.dot_dimension_numbers<[1], [0], [0], [1], [0, 0, 1, 1], [], []>} : vector<8x72xf32>, vector<72x128xf32>, vector<8x128xf32> -> vector<8x128xf32>
    %cst_737 = arith.constant 0.000000e+00 : f32
    %744 = vector.broadcast %cst_737 : f32 to vector<8x128xf32>
    %745 = arith.select %2, %743, %744 : vector<8x128xi1>, vector<8x128xf32>
    %c0_738 = arith.constant 0 : index
    %c32_739 = arith.constant 32 : index
    %c128_740 = arith.constant 128 : index
    %746 = vector.load %arg10[%c0_738, %c32_739, %c128_740] : memref<4x72x384xf32, #tpu.memory_space<vmem>>, vector<1x8x128xf32>
    %747 = vector.shape_cast %746 : vector<1x8x128xf32> to vector<8x128xf32>
    %748 = vector.shape_cast %724 : vector<8x128xf32> to vector<1x8x128xf32>
    tpu.vector_store %arg10[%c0_738, %c32_739, %c128_740], %748 {strides = array<i32>} : memref<4x72x384xf32, #tpu.memory_space<vmem>>, vector<1x8x128xf32>,
    %c1_741 = arith.constant 1 : index
    %c24_742 = arith.constant 24 : index
    %c128_743 = arith.constant 128 : index
    %749 = vector.load %arg10[%c1_741, %c24_742, %c128_743] : memref<4x72x384xf32, #tpu.memory_space<vmem>>, vector<1x8x128xf32>
    %750 = vector.shape_cast %749 : vector<1x8x128xf32> to vector<8x128xf32>
    %751 = vector.shape_cast %724 : vector<8x128xf32> to vector<1x8x128xf32>
    tpu.vector_store %arg10[%c1_741, %c24_742, %c128_743], %751 {strides = array<i32>} : memref<4x72x384xf32, #tpu.memory_space<vmem>>, vector<1x8x128xf32>,
    %c1_744 = arith.constant 1 : index
    %c40_745 = arith.constant 40 : index
    %c127_746 = arith.constant 127 : index
    %752 = vector.load %arg10[%c1_744, %c40_745, %c127_746] : memref<4x72x384xf32, #tpu.memory_space<vmem>>, vector<1x8x128xf32>
    %753 = vector.shape_cast %752 : vector<1x8x128xf32> to vector<8x128xf32>
    %754 = vector.shape_cast %724 : vector<8x128xf32> to vector<1x8x128xf32>
    tpu.vector_store %arg10[%c1_744, %c40_745, %c127_746], %754 {strides = array<i32>} : memref<4x72x384xf32, #tpu.memory_space<vmem>>, vector<1x8x128xf32>,
    %c2_747 = arith.constant 2 : index
    %c8_748 = arith.constant 8 : index
    %c128_749 = arith.constant 128 : index
    %755 = vector.load %arg10[%c2_747, %c8_748, %c128_749] : memref<4x72x384xf32, #tpu.memory_space<vmem>>, vector<1x8x128xf32>
    %756 = vector.shape_cast %755 : vector<1x8x128xf32> to vector<8x128xf32>
    %757 = vector.shape_cast %724 : vector<8x128xf32> to vector<1x8x128xf32>
    tpu.vector_store %arg10[%c2_747, %c8_748, %c128_749], %757 {strides = array<i32>} : memref<4x72x384xf32, #tpu.memory_space<vmem>>, vector<1x8x128xf32>,
    %c3_750 = arith.constant 3 : index
    %c0_751 = arith.constant 0 : index
    %c128_752 = arith.constant 128 : index
    %758 = vector.load %arg10[%c3_750, %c0_751, %c128_752] : memref<4x72x384xf32, #tpu.memory_space<vmem>>, vector<1x8x128xf32>
    %759 = vector.shape_cast %758 : vector<1x8x128xf32> to vector<8x128xf32>
    %760 = vector.shape_cast %724 : vector<8x128xf32> to vector<1x8x128xf32>
    tpu.vector_store %arg10[%c3_750, %c0_751, %c128_752], %760 {strides = array<i32>} : memref<4x72x384xf32, #tpu.memory_space<vmem>>, vector<1x8x128xf32>,
    %c3_753 = arith.constant 3 : index
    %c16_754 = arith.constant 16 : index
    %c127_755 = arith.constant 127 : index
    %761 = vector.load %arg10[%c3_753, %c16_754, %c127_755] : memref<4x72x384xf32, #tpu.memory_space<vmem>>, vector<1x8x128xf32>
    %762 = vector.shape_cast %761 : vector<1x8x128xf32> to vector<8x128xf32>
    %763 = vector.shape_cast %724 : vector<8x128xf32> to vector<1x8x128xf32>
    tpu.vector_store %arg10[%c3_753, %c16_754, %c127_755], %763 {strides = array<i32>} : memref<4x72x384xf32, #tpu.memory_space<vmem>>, vector<1x8x128xf32>,
    %c2_756 = arith.constant 2 : index
    %c56_757 = arith.constant 56 : index
    %c118_758 = arith.constant 118 : index
    %764 = vector.load %arg10[%c2_756, %c56_757, %c118_758] : memref<4x72x384xf32, #tpu.memory_space<vmem>>, vector<1x8x128xf32>
    %765 = vector.shape_cast %764 : vector<1x8x128xf32> to vector<8x128xf32>
    %766 = vector.shape_cast %724 : vector<8x128xf32> to vector<1x8x128xf32>
    tpu.vector_store %arg10[%c2_756, %c56_757, %c118_758], %766 {strides = array<i32>} : memref<4x72x384xf32, #tpu.memory_space<vmem>>, vector<1x8x128xf32>,
    %c3_759 = arith.constant 3 : index
    %c48_760 = arith.constant 48 : index
    %c118_761 = arith.constant 118 : index
    %767 = vector.load %arg10[%c3_759, %c48_760, %c118_761] : memref<4x72x384xf32, #tpu.memory_space<vmem>>, vector<1x8x128xf32>
    %768 = vector.shape_cast %767 : vector<1x8x128xf32> to vector<8x128xf32>
    %769 = vector.shape_cast %724 : vector<8x128xf32> to vector<1x8x128xf32>
    tpu.vector_store %arg10[%c3_759, %c48_760, %c118_761], %769 {strides = array<i32>} : memref<4x72x384xf32, #tpu.memory_space<vmem>>, vector<1x8x128xf32>,
    %c3_762 = arith.constant 3 : index
    %c64_763 = arith.constant 64 : index
    %c117_764 = arith.constant 117 : index
    %770 = vector.load %arg10[%c3_762, %c64_763, %c117_764] : memref<4x72x384xf32, #tpu.memory_space<vmem>>, vector<1x8x128xf32>
    %771 = vector.shape_cast %770 : vector<1x8x128xf32> to vector<8x128xf32>
    %772 = vector.shape_cast %724 : vector<8x128xf32> to vector<1x8x128xf32>
    tpu.vector_store %arg10[%c3_762, %c64_763, %c117_764], %772 {strides = array<i32>} : memref<4x72x384xf32, #tpu.memory_space<vmem>>, vector<1x8x128xf32>,
    %c0_765 = arith.constant 0 : index
    %c24_766 = arith.constant 24 : index
    %c129_767 = arith.constant 129 : index
    %773 = vector.load %arg10[%c0_765, %c24_766, %c129_767] : memref<4x72x384xf32, #tpu.memory_space<vmem>>, vector<1x8x128xf32>
    %774 = vector.shape_cast %773 : vector<1x8x128xf32> to vector<8x128xf32>
    %775 = vector.shape_cast %731 : vector<8x128xf32> to vector<1x8x128xf32>
    tpu.vector_store %arg10[%c0_765, %c24_766, %c129_767], %775 {strides = array<i32>} : memref<4x72x384xf32, #tpu.memory_space<vmem>>, vector<1x8x128xf32>,
    %c0_768 = arith.constant 0 : index
    %c40_769 = arith.constant 40 : index
    %c128_770 = arith.constant 128 : index
    %776 = vector.load %arg10[%c0_768, %c40_769, %c128_770] : memref<4x72x384xf32, #tpu.memory_space<vmem>>, vector<1x8x128xf32>
    %777 = vector.shape_cast %776 : vector<1x8x128xf32> to vector<8x128xf32>
    %778 = vector.shape_cast %731 : vector<8x128xf32> to vector<1x8x128xf32>
    tpu.vector_store %arg10[%c0_768, %c40_769, %c128_770], %778 {strides = array<i32>} : memref<4x72x384xf32, #tpu.memory_space<vmem>>, vector<1x8x128xf32>,
    %c1_771 = arith.constant 1 : index
    %c32_772 = arith.constant 32 : index
    %c128_773 = arith.constant 128 : index
    %779 = vector.load %arg10[%c1_771, %c32_772, %c128_773] : memref<4x72x384xf32, #tpu.memory_space<vmem>>, vector<1x8x128xf32>
    %780 = vector.shape_cast %779 : vector<1x8x128xf32> to vector<8x128xf32>
    %781 = vector.shape_cast %731 : vector<8x128xf32> to vector<1x8x128xf32>
    tpu.vector_store %arg10[%c1_771, %c32_772, %c128_773], %781 {strides = array<i32>} : memref<4x72x384xf32, #tpu.memory_space<vmem>>, vector<1x8x128xf32>,
    %c2_774 = arith.constant 2 : index
    %c0_775 = arith.constant 0 : index
    %c129_776 = arith.constant 129 : index
    %782 = vector.load %arg10[%c2_774, %c0_775, %c129_776] : memref<4x72x384xf32, #tpu.memory_space<vmem>>, vector<1x8x128xf32>
    %783 = vector.shape_cast %782 : vector<1x8x128xf32> to vector<8x128xf32>
    %784 = vector.shape_cast %731 : vector<8x128xf32> to vector<1x8x128xf32>
    tpu.vector_store %arg10[%c2_774, %c0_775, %c129_776], %784 {strides = array<i32>} : memref<4x72x384xf32, #tpu.memory_space<vmem>>, vector<1x8x128xf32>,
    %c2_777 = arith.constant 2 : index
    %c16_778 = arith.constant 16 : index
    %c128_779 = arith.constant 128 : index
    %785 = vector.load %arg10[%c2_777, %c16_778, %c128_779] : memref<4x72x384xf32, #tpu.memory_space<vmem>>, vector<1x8x128xf32>
    %786 = vector.shape_cast %785 : vector<1x8x128xf32> to vector<8x128xf32>
    %787 = vector.shape_cast %731 : vector<8x128xf32> to vector<1x8x128xf32>
    tpu.vector_store %arg10[%c2_777, %c16_778, %c128_779], %787 {strides = array<i32>} : memref<4x72x384xf32, #tpu.memory_space<vmem>>, vector<1x8x128xf32>,
    %c3_780 = arith.constant 3 : index
    %c8_781 = arith.constant 8 : index
    %c128_782 = arith.constant 128 : index
    %788 = vector.load %arg10[%c3_780, %c8_781, %c128_782] : memref<4x72x384xf32, #tpu.memory_space<vmem>>, vector<1x8x128xf32>
    %789 = vector.shape_cast %788 : vector<1x8x128xf32> to vector<8x128xf32>
    %790 = vector.shape_cast %731 : vector<8x128xf32> to vector<1x8x128xf32>
    tpu.vector_store %arg10[%c3_780, %c8_781, %c128_782], %790 {strides = array<i32>} : memref<4x72x384xf32, #tpu.memory_space<vmem>>, vector<1x8x128xf32>,
    %c2_783 = arith.constant 2 : index
    %c48_784 = arith.constant 48 : index
    %c119_785 = arith.constant 119 : index
    %791 = vector.load %arg10[%c2_783, %c48_784, %c119_785] : memref<4x72x384xf32, #tpu.memory_space<vmem>>, vector<1x8x128xf32>
    %792 = vector.shape_cast %791 : vector<1x8x128xf32> to vector<8x128xf32>
    %793 = vector.shape_cast %731 : vector<8x128xf32> to vector<1x8x128xf32>
    tpu.vector_store %arg10[%c2_783, %c48_784, %c119_785], %793 {strides = array<i32>} : memref<4x72x384xf32, #tpu.memory_space<vmem>>, vector<1x8x128xf32>,
    %c2_786 = arith.constant 2 : index
    %c64_787 = arith.constant 64 : index
    %c118_788 = arith.constant 118 : index
    %794 = vector.load %arg10[%c2_786, %c64_787, %c118_788] : memref<4x72x384xf32, #tpu.memory_space<vmem>>, vector<1x8x128xf32>
    %795 = vector.shape_cast %794 : vector<1x8x128xf32> to vector<8x128xf32>
    %796 = vector.shape_cast %731 : vector<8x128xf32> to vector<1x8x128xf32>
    tpu.vector_store %arg10[%c2_786, %c64_787, %c118_788], %796 {strides = array<i32>} : memref<4x72x384xf32, #tpu.memory_space<vmem>>, vector<1x8x128xf32>,
    %c3_789 = arith.constant 3 : index
    %c56_790 = arith.constant 56 : index
    %c118_791 = arith.constant 118 : index
    %797 = vector.load %arg10[%c3_789, %c56_790, %c118_791] : memref<4x72x384xf32, #tpu.memory_space<vmem>>, vector<1x8x128xf32>
    %798 = vector.shape_cast %797 : vector<1x8x128xf32> to vector<8x128xf32>
    %799 = vector.shape_cast %731 : vector<8x128xf32> to vector<1x8x128xf32>
    tpu.vector_store %arg10[%c3_789, %c56_790, %c118_791], %799 {strides = array<i32>} : memref<4x72x384xf32, #tpu.memory_space<vmem>>, vector<1x8x128xf32>,
    %c0_792 = arith.constant 0 : index
    %c8_793 = arith.constant 8 : index
    %c138_794 = arith.constant 138 : index
    %800 = vector.load %arg10[%c0_792, %c8_793, %c138_794] : memref<4x72x384xf32, #tpu.memory_space<vmem>>, vector<1x8x128xf32>
    %801 = vector.shape_cast %800 : vector<1x8x128xf32> to vector<8x128xf32>
    %802 = vector.shape_cast %738 : vector<8x128xf32> to vector<1x8x128xf32>
    tpu.vector_store %arg10[%c0_792, %c8_793, %c138_794], %802 {strides = array<i32>} : memref<4x72x384xf32, #tpu.memory_space<vmem>>, vector<1x8x128xf32>,
    %c1_795 = arith.constant 1 : index
    %c0_796 = arith.constant 0 : index
    %c138_797 = arith.constant 138 : index
    %803 = vector.load %arg10[%c1_795, %c0_796, %c138_797] : memref<4x72x384xf32, #tpu.memory_space<vmem>>, vector<1x8x128xf32>
    %804 = vector.shape_cast %803 : vector<1x8x128xf32> to vector<8x128xf32>
    %805 = vector.shape_cast %738 : vector<8x128xf32> to vector<1x8x128xf32>
    tpu.vector_store %arg10[%c1_795, %c0_796, %c138_797], %805 {strides = array<i32>} : memref<4x72x384xf32, #tpu.memory_space<vmem>>, vector<1x8x128xf32>,
    %c1_798 = arith.constant 1 : index
    %c16_799 = arith.constant 16 : index
    %c137_800 = arith.constant 137 : index
    %806 = vector.load %arg10[%c1_798, %c16_799, %c137_800] : memref<4x72x384xf32, #tpu.memory_space<vmem>>, vector<1x8x128xf32>
    %807 = vector.shape_cast %806 : vector<1x8x128xf32> to vector<8x128xf32>
    %808 = vector.shape_cast %738 : vector<8x128xf32> to vector<1x8x128xf32>
    tpu.vector_store %arg10[%c1_798, %c16_799, %c137_800], %808 {strides = array<i32>} : memref<4x72x384xf32, #tpu.memory_space<vmem>>, vector<1x8x128xf32>,
    %c0_801 = arith.constant 0 : index
    %c56_802 = arith.constant 56 : index
    %c128_803 = arith.constant 128 : index
    %809 = vector.load %arg10[%c0_801, %c56_802, %c128_803] : memref<4x72x384xf32, #tpu.memory_space<vmem>>, vector<1x8x128xf32>
    %810 = vector.shape_cast %809 : vector<1x8x128xf32> to vector<8x128xf32>
    %811 = vector.shape_cast %738 : vector<8x128xf32> to vector<1x8x128xf32>
    tpu.vector_store %arg10[%c0_801, %c56_802, %c128_803], %811 {strides = array<i32>} : memref<4x72x384xf32, #tpu.memory_space<vmem>>, vector<1x8x128xf32>,
    %c1_804 = arith.constant 1 : index
    %c48_805 = arith.constant 48 : index
    %c128_806 = arith.constant 128 : index
    %812 = vector.load %arg10[%c1_804, %c48_805, %c128_806] : memref<4x72x384xf32, #tpu.memory_space<vmem>>, vector<1x8x128xf32>
    %813 = vector.shape_cast %812 : vector<1x8x128xf32> to vector<8x128xf32>
    %814 = vector.shape_cast %738 : vector<8x128xf32> to vector<1x8x128xf32>
    tpu.vector_store %arg10[%c1_804, %c48_805, %c128_806], %814 {strides = array<i32>} : memref<4x72x384xf32, #tpu.memory_space<vmem>>, vector<1x8x128xf32>,
    %c1_807 = arith.constant 1 : index
    %c64_808 = arith.constant 64 : index
    %c127_809 = arith.constant 127 : index
    %815 = vector.load %arg10[%c1_807, %c64_808, %c127_809] : memref<4x72x384xf32, #tpu.memory_space<vmem>>, vector<1x8x128xf32>
    %816 = vector.shape_cast %815 : vector<1x8x128xf32> to vector<8x128xf32>
    %817 = vector.shape_cast %738 : vector<8x128xf32> to vector<1x8x128xf32>
    tpu.vector_store %arg10[%c1_807, %c64_808, %c127_809], %817 {strides = array<i32>} : memref<4x72x384xf32, #tpu.memory_space<vmem>>, vector<1x8x128xf32>,
    %c2_810 = arith.constant 2 : index
    %c32_811 = arith.constant 32 : index
    %c128_812 = arith.constant 128 : index
    %818 = vector.load %arg10[%c2_810, %c32_811, %c128_812] : memref<4x72x384xf32, #tpu.memory_space<vmem>>, vector<1x8x128xf32>
    %819 = vector.shape_cast %818 : vector<1x8x128xf32> to vector<8x128xf32>
    %820 = vector.shape_cast %738 : vector<8x128xf32> to vector<1x8x128xf32>
    tpu.vector_store %arg10[%c2_810, %c32_811, %c128_812], %820 {strides = array<i32>} : memref<4x72x384xf32, #tpu.memory_space<vmem>>, vector<1x8x128xf32>,
    %c3_813 = arith.constant 3 : index
    %c24_814 = arith.constant 24 : index
    %c128_815 = arith.constant 128 : index
    %821 = vector.load %arg10[%c3_813, %c24_814, %c128_815] : memref<4x72x384xf32, #tpu.memory_space<vmem>>, vector<1x8x128xf32>
    %822 = vector.shape_cast %821 : vector<1x8x128xf32> to vector<8x128xf32>
    %823 = vector.shape_cast %738 : vector<8x128xf32> to vector<1x8x128xf32>
    tpu.vector_store %arg10[%c3_813, %c24_814, %c128_815], %823 {strides = array<i32>} : memref<4x72x384xf32, #tpu.memory_space<vmem>>, vector<1x8x128xf32>,
    %c3_816 = arith.constant 3 : index
    %c40_817 = arith.constant 40 : index
    %c127_818 = arith.constant 127 : index
    %824 = vector.load %arg10[%c3_816, %c40_817, %c127_818] : memref<4x72x384xf32, #tpu.memory_space<vmem>>, vector<1x8x128xf32>
    %825 = vector.shape_cast %824 : vector<1x8x128xf32> to vector<8x128xf32>
    %826 = vector.shape_cast %738 : vector<8x128xf32> to vector<1x8x128xf32>
    tpu.vector_store %arg10[%c3_816, %c40_817, %c127_818], %826 {strides = array<i32>} : memref<4x72x384xf32, #tpu.memory_space<vmem>>, vector<1x8x128xf32>,
    %c0_819 = arith.constant 0 : index
    %c0_820 = arith.constant 0 : index
    %c139_821 = arith.constant 139 : index
    %827 = vector.load %arg10[%c0_819, %c0_820, %c139_821] : memref<4x72x384xf32, #tpu.memory_space<vmem>>, vector<1x8x128xf32>
    %828 = vector.shape_cast %827 : vector<1x8x128xf32> to vector<8x128xf32>
    %829 = vector.shape_cast %745 : vector<8x128xf32> to vector<1x8x128xf32>
    tpu.vector_store %arg10[%c0_819, %c0_820, %c139_821], %829 {strides = array<i32>} : memref<4x72x384xf32, #tpu.memory_space<vmem>>, vector<1x8x128xf32>,
    %c0_822 = arith.constant 0 : index
    %c16_823 = arith.constant 16 : index
    %c138_824 = arith.constant 138 : index
    %830 = vector.load %arg10[%c0_822, %c16_823, %c138_824] : memref<4x72x384xf32, #tpu.memory_space<vmem>>, vector<1x8x128xf32>
    %831 = vector.shape_cast %830 : vector<1x8x128xf32> to vector<8x128xf32>
    %832 = vector.shape_cast %745 : vector<8x128xf32> to vector<1x8x128xf32>
    tpu.vector_store %arg10[%c0_822, %c16_823, %c138_824], %832 {strides = array<i32>} : memref<4x72x384xf32, #tpu.memory_space<vmem>>, vector<1x8x128xf32>,
    %c1_825 = arith.constant 1 : index
    %c8_826 = arith.constant 8 : index
    %c138_827 = arith.constant 138 : index
    %833 = vector.load %arg10[%c1_825, %c8_826, %c138_827] : memref<4x72x384xf32, #tpu.memory_space<vmem>>, vector<1x8x128xf32>
    %834 = vector.shape_cast %833 : vector<1x8x128xf32> to vector<8x128xf32>
    %835 = vector.shape_cast %745 : vector<8x128xf32> to vector<1x8x128xf32>
    tpu.vector_store %arg10[%c1_825, %c8_826, %c138_827], %835 {strides = array<i32>} : memref<4x72x384xf32, #tpu.memory_space<vmem>>, vector<1x8x128xf32>,
    %c0_828 = arith.constant 0 : index
    %c48_829 = arith.constant 48 : index
    %c129_830 = arith.constant 129 : index
    %836 = vector.load %arg10[%c0_828, %c48_829, %c129_830] : memref<4x72x384xf32, #tpu.memory_space<vmem>>, vector<1x8x128xf32>
    %837 = vector.shape_cast %836 : vector<1x8x128xf32> to vector<8x128xf32>
    %838 = vector.shape_cast %745 : vector<8x128xf32> to vector<1x8x128xf32>
    tpu.vector_store %arg10[%c0_828, %c48_829, %c129_830], %838 {strides = array<i32>} : memref<4x72x384xf32, #tpu.memory_space<vmem>>, vector<1x8x128xf32>,
    %c0_831 = arith.constant 0 : index
    %c64_832 = arith.constant 64 : index
    %c128_833 = arith.constant 128 : index
    %839 = vector.load %arg10[%c0_831, %c64_832, %c128_833] : memref<4x72x384xf32, #tpu.memory_space<vmem>>, vector<1x8x128xf32>
    %840 = vector.shape_cast %839 : vector<1x8x128xf32> to vector<8x128xf32>
    %841 = vector.shape_cast %745 : vector<8x128xf32> to vector<1x8x128xf32>
    tpu.vector_store %arg10[%c0_831, %c64_832, %c128_833], %841 {strides = array<i32>} : memref<4x72x384xf32, #tpu.memory_space<vmem>>, vector<1x8x128xf32>,
    %c1_834 = arith.constant 1 : index
    %c56_835 = arith.constant 56 : index
    %c128_836 = arith.constant 128 : index
    %842 = vector.load %arg10[%c1_834, %c56_835, %c128_836] : memref<4x72x384xf32, #tpu.memory_space<vmem>>, vector<1x8x128xf32>
    %843 = vector.shape_cast %842 : vector<1x8x128xf32> to vector<8x128xf32>
    %844 = vector.shape_cast %745 : vector<8x128xf32> to vector<1x8x128xf32>
    tpu.vector_store %arg10[%c1_834, %c56_835, %c128_836], %844 {strides = array<i32>} : memref<4x72x384xf32, #tpu.memory_space<vmem>>, vector<1x8x128xf32>,
    %c2_837 = arith.constant 2 : index
    %c24_838 = arith.constant 24 : index
    %c129_839 = arith.constant 129 : index
    %845 = vector.load %arg10[%c2_837, %c24_838, %c129_839] : memref<4x72x384xf32, #tpu.memory_space<vmem>>, vector<1x8x128xf32>
    %846 = vector.shape_cast %845 : vector<1x8x128xf32> to vector<8x128xf32>
    %847 = vector.shape_cast %745 : vector<8x128xf32> to vector<1x8x128xf32>
    tpu.vector_store %arg10[%c2_837, %c24_838, %c129_839], %847 {strides = array<i32>} : memref<4x72x384xf32, #tpu.memory_space<vmem>>, vector<1x8x128xf32>,
    %c2_840 = arith.constant 2 : index
    %c40_841 = arith.constant 40 : index
    %c128_842 = arith.constant 128 : index
    %848 = vector.load %arg10[%c2_840, %c40_841, %c128_842] : memref<4x72x384xf32, #tpu.memory_space<vmem>>, vector<1x8x128xf32>
    %849 = vector.shape_cast %848 : vector<1x8x128xf32> to vector<8x128xf32>
    %850 = vector.shape_cast %745 : vector<8x128xf32> to vector<1x8x128xf32>
    tpu.vector_store %arg10[%c2_840, %c40_841, %c128_842], %850 {strides = array<i32>} : memref<4x72x384xf32, #tpu.memory_space<vmem>>, vector<1x8x128xf32>,
    %c3_843 = arith.constant 3 : index
    %c32_844 = arith.constant 32 : index
    %c128_845 = arith.constant 128 : index
    %851 = vector.load %arg10[%c3_843, %c32_844, %c128_845] : memref<4x72x384xf32, #tpu.memory_space<vmem>>, vector<1x8x128xf32>
    %852 = vector.shape_cast %851 : vector<1x8x128xf32> to vector<8x128xf32>
    %853 = vector.shape_cast %745 : vector<8x128xf32> to vector<1x8x128xf32>
    tpu.vector_store %arg10[%c3_843, %c32_844, %c128_845], %853 {strides = array<i32>} : memref<4x72x384xf32, #tpu.memory_space<vmem>>, vector<1x8x128xf32>,
    %c4_846 = arith.constant 4 : index
    %c0_847 = arith.constant 0 : index
    %c0_848 = arith.constant 0 : index
    %854 = vector.load %arg4[%c4_846, %c0_847, %c0_848] : memref<5x8x72xf32, #tpu.memory_space<vmem>>, vector<1x8x72xf32>
    %855 = vector.shape_cast %854 : vector<1x8x72xf32> to vector<8x72xf32>
    %c0_849 = arith.constant 0 : index
    %c0_850 = arith.constant 0 : index
    %c128_851 = arith.constant 128 : index
    %856 = vector.load %arg10[%c0_849, %c0_850, %c128_851] : memref<4x72x384xf32, #tpu.memory_space<vmem>>, vector<1x72x128xf32>
    %857 = vector.shape_cast %856 : vector<1x72x128xf32> to vector<72x128xf32>
    %cst_852 = arith.constant dense<0.000000e+00> : vector<8x128xf32>
    %858 = tpu.matmul %855, %857, %cst_852 {dimension_numbers = #tpu.dot_dimension_numbers<[1], [0], [0], [1], [0, 0, 1, 1], [], []>} : vector<8x72xf32>, vector<72x128xf32>, vector<8x128xf32> -> vector<8x128xf32>
    %c4_853 = arith.constant 4 : index
    %c0_854 = arith.constant 0 : index
    %c0_855 = arith.constant 0 : index
    %c0_856 = arith.constant 0 : index
    %859 = vector.load %arg5[%c4_853, %c0_854, %c0_855, %c0_856] : memref<5x3x8x1xf32, #tpu.memory_space<vmem>>, vector<1x1x8x1xf32>
    %860 = vector.shape_cast %859 : vector<1x1x8x1xf32> to vector<8x1xf32>
    %861 = vector.broadcast %860 : vector<8x1xf32> to vector<8x128xf32>
    %862 = arith.addf %858, %861 : vector<8x128xf32>
    %c4_857 = arith.constant 4 : index
    %c1_858 = arith.constant 1 : index
    %c0_859 = arith.constant 0 : index
    %c0_860 = arith.constant 0 : index
    %863 = vector.load %arg5[%c4_857, %c1_858, %c0_859, %c0_860] : memref<5x3x8x1xf32, #tpu.memory_space<vmem>>, vector<1x1x8x1xf32>
    %864 = vector.shape_cast %863 : vector<1x1x8x1xf32> to vector<8x1xf32>
    %865 = vector.broadcast %864 : vector<8x1xf32> to vector<8x128xf32>
    %866 = arith.mulf %862, %865 : vector<8x128xf32>
    %c4_861 = arith.constant 4 : index
    %c2_862 = arith.constant 2 : index
    %c0_863 = arith.constant 0 : index
    %c0_864 = arith.constant 0 : index
    %867 = vector.load %arg5[%c4_861, %c2_862, %c0_863, %c0_864] : memref<5x3x8x1xf32, #tpu.memory_space<vmem>>, vector<1x1x8x1xf32>
    %868 = vector.shape_cast %867 : vector<1x1x8x1xf32> to vector<8x1xf32>
    %869 = vector.broadcast %868 : vector<8x1xf32> to vector<8x128xf32>
    %870 = arith.addf %866, %869 : vector<8x128xf32>
    %871 = arith.maximumf %724, %870 : vector<8x128xf32>
    %cst_865 = arith.constant 0.000000e+00 : f32
    %872 = vector.broadcast %cst_865 : f32 to vector<8x128xf32>
    %873 = arith.select %2, %871, %872 : vector<8x128xi1>, vector<8x128xf32>
    %c4_866 = arith.constant 4 : index
    %c0_867 = arith.constant 0 : index
    %c0_868 = arith.constant 0 : index
    %874 = vector.load %arg4[%c4_866, %c0_867, %c0_868] : memref<5x8x72xf32, #tpu.memory_space<vmem>>, vector<1x8x72xf32>
    %875 = vector.shape_cast %874 : vector<1x8x72xf32> to vector<8x72xf32>
    %c1_869 = arith.constant 1 : index
    %c0_870 = arith.constant 0 : index
    %c128_871 = arith.constant 128 : index
    %876 = vector.load %arg10[%c1_869, %c0_870, %c128_871] : memref<4x72x384xf32, #tpu.memory_space<vmem>>, vector<1x72x128xf32>
    %877 = vector.shape_cast %876 : vector<1x72x128xf32> to vector<72x128xf32>
    %cst_872 = arith.constant dense<0.000000e+00> : vector<8x128xf32>
    %878 = tpu.matmul %875, %877, %cst_872 {dimension_numbers = #tpu.dot_dimension_numbers<[1], [0], [0], [1], [0, 0, 1, 1], [], []>} : vector<8x72xf32>, vector<72x128xf32>, vector<8x128xf32> -> vector<8x128xf32>
    %c4_873 = arith.constant 4 : index
    %c0_874 = arith.constant 0 : index
    %c0_875 = arith.constant 0 : index
    %c0_876 = arith.constant 0 : index
    %879 = vector.load %arg5[%c4_873, %c0_874, %c0_875, %c0_876] : memref<5x3x8x1xf32, #tpu.memory_space<vmem>>, vector<1x1x8x1xf32>
    %880 = vector.shape_cast %879 : vector<1x1x8x1xf32> to vector<8x1xf32>
    %881 = vector.broadcast %880 : vector<8x1xf32> to vector<8x128xf32>
    %882 = arith.addf %878, %881 : vector<8x128xf32>
    %c4_877 = arith.constant 4 : index
    %c1_878 = arith.constant 1 : index
    %c0_879 = arith.constant 0 : index
    %c0_880 = arith.constant 0 : index
    %883 = vector.load %arg5[%c4_877, %c1_878, %c0_879, %c0_880] : memref<5x3x8x1xf32, #tpu.memory_space<vmem>>, vector<1x1x8x1xf32>
    %884 = vector.shape_cast %883 : vector<1x1x8x1xf32> to vector<8x1xf32>
    %885 = vector.broadcast %884 : vector<8x1xf32> to vector<8x128xf32>
    %886 = arith.mulf %882, %885 : vector<8x128xf32>
    %c4_881 = arith.constant 4 : index
    %c2_882 = arith.constant 2 : index
    %c0_883 = arith.constant 0 : index
    %c0_884 = arith.constant 0 : index
    %887 = vector.load %arg5[%c4_881, %c2_882, %c0_883, %c0_884] : memref<5x3x8x1xf32, #tpu.memory_space<vmem>>, vector<1x1x8x1xf32>
    %888 = vector.shape_cast %887 : vector<1x1x8x1xf32> to vector<8x1xf32>
    %889 = vector.broadcast %888 : vector<8x1xf32> to vector<8x128xf32>
    %890 = arith.addf %886, %889 : vector<8x128xf32>
    %891 = arith.maximumf %731, %890 : vector<8x128xf32>
    %cst_885 = arith.constant 0.000000e+00 : f32
    %892 = vector.broadcast %cst_885 : f32 to vector<8x128xf32>
    %893 = arith.select %2, %891, %892 : vector<8x128xi1>, vector<8x128xf32>
    %c4_886 = arith.constant 4 : index
    %c0_887 = arith.constant 0 : index
    %c0_888 = arith.constant 0 : index
    %894 = vector.load %arg4[%c4_886, %c0_887, %c0_888] : memref<5x8x72xf32, #tpu.memory_space<vmem>>, vector<1x8x72xf32>
    %895 = vector.shape_cast %894 : vector<1x8x72xf32> to vector<8x72xf32>
    %c2_889 = arith.constant 2 : index
    %c0_890 = arith.constant 0 : index
    %c128_891 = arith.constant 128 : index
    %896 = vector.load %arg10[%c2_889, %c0_890, %c128_891] : memref<4x72x384xf32, #tpu.memory_space<vmem>>, vector<1x72x128xf32>
    %897 = vector.shape_cast %896 : vector<1x72x128xf32> to vector<72x128xf32>
    %cst_892 = arith.constant dense<0.000000e+00> : vector<8x128xf32>
    %898 = tpu.matmul %895, %897, %cst_892 {dimension_numbers = #tpu.dot_dimension_numbers<[1], [0], [0], [1], [0, 0, 1, 1], [], []>} : vector<8x72xf32>, vector<72x128xf32>, vector<8x128xf32> -> vector<8x128xf32>
    %c4_893 = arith.constant 4 : index
    %c0_894 = arith.constant 0 : index
    %c0_895 = arith.constant 0 : index
    %c0_896 = arith.constant 0 : index
    %899 = vector.load %arg5[%c4_893, %c0_894, %c0_895, %c0_896] : memref<5x3x8x1xf32, #tpu.memory_space<vmem>>, vector<1x1x8x1xf32>
    %900 = vector.shape_cast %899 : vector<1x1x8x1xf32> to vector<8x1xf32>
    %901 = vector.broadcast %900 : vector<8x1xf32> to vector<8x128xf32>
    %902 = arith.addf %898, %901 : vector<8x128xf32>
    %c4_897 = arith.constant 4 : index
    %c1_898 = arith.constant 1 : index
    %c0_899 = arith.constant 0 : index
    %c0_900 = arith.constant 0 : index
    %903 = vector.load %arg5[%c4_897, %c1_898, %c0_899, %c0_900] : memref<5x3x8x1xf32, #tpu.memory_space<vmem>>, vector<1x1x8x1xf32>
    %904 = vector.shape_cast %903 : vector<1x1x8x1xf32> to vector<8x1xf32>
    %905 = vector.broadcast %904 : vector<8x1xf32> to vector<8x128xf32>
    %906 = arith.mulf %902, %905 : vector<8x128xf32>
    %c4_901 = arith.constant 4 : index
    %c2_902 = arith.constant 2 : index
    %c0_903 = arith.constant 0 : index
    %c0_904 = arith.constant 0 : index
    %907 = vector.load %arg5[%c4_901, %c2_902, %c0_903, %c0_904] : memref<5x3x8x1xf32, #tpu.memory_space<vmem>>, vector<1x1x8x1xf32>
    %908 = vector.shape_cast %907 : vector<1x1x8x1xf32> to vector<8x1xf32>
    %909 = vector.broadcast %908 : vector<8x1xf32> to vector<8x128xf32>
    %910 = arith.addf %906, %909 : vector<8x128xf32>
    %911 = arith.maximumf %738, %910 : vector<8x128xf32>
    %cst_905 = arith.constant 0.000000e+00 : f32
    %912 = vector.broadcast %cst_905 : f32 to vector<8x128xf32>
    %913 = arith.select %2, %911, %912 : vector<8x128xi1>, vector<8x128xf32>
    %c4_906 = arith.constant 4 : index
    %c0_907 = arith.constant 0 : index
    %c0_908 = arith.constant 0 : index
    %914 = vector.load %arg4[%c4_906, %c0_907, %c0_908] : memref<5x8x72xf32, #tpu.memory_space<vmem>>, vector<1x8x72xf32>
    %915 = vector.shape_cast %914 : vector<1x8x72xf32> to vector<8x72xf32>
    %c3_909 = arith.constant 3 : index
    %c0_910 = arith.constant 0 : index
    %c128_911 = arith.constant 128 : index
    %916 = vector.load %arg10[%c3_909, %c0_910, %c128_911] : memref<4x72x384xf32, #tpu.memory_space<vmem>>, vector<1x72x128xf32>
    %917 = vector.shape_cast %916 : vector<1x72x128xf32> to vector<72x128xf32>
    %cst_912 = arith.constant dense<0.000000e+00> : vector<8x128xf32>
    %918 = tpu.matmul %915, %917, %cst_912 {dimension_numbers = #tpu.dot_dimension_numbers<[1], [0], [0], [1], [0, 0, 1, 1], [], []>} : vector<8x72xf32>, vector<72x128xf32>, vector<8x128xf32> -> vector<8x128xf32>
    %c4_913 = arith.constant 4 : index
    %c0_914 = arith.constant 0 : index
    %c0_915 = arith.constant 0 : index
    %c0_916 = arith.constant 0 : index
    %919 = vector.load %arg5[%c4_913, %c0_914, %c0_915, %c0_916] : memref<5x3x8x1xf32, #tpu.memory_space<vmem>>, vector<1x1x8x1xf32>
    %920 = vector.shape_cast %919 : vector<1x1x8x1xf32> to vector<8x1xf32>
    %921 = vector.broadcast %920 : vector<8x1xf32> to vector<8x128xf32>
    %922 = arith.addf %918, %921 : vector<8x128xf32>
    %c4_917 = arith.constant 4 : index
    %c1_918 = arith.constant 1 : index
    %c0_919 = arith.constant 0 : index
    %c0_920 = arith.constant 0 : index
    %923 = vector.load %arg5[%c4_917, %c1_918, %c0_919, %c0_920] : memref<5x3x8x1xf32, #tpu.memory_space<vmem>>, vector<1x1x8x1xf32>
    %924 = vector.shape_cast %923 : vector<1x1x8x1xf32> to vector<8x1xf32>
    %925 = vector.broadcast %924 : vector<8x1xf32> to vector<8x128xf32>
    %926 = arith.mulf %922, %925 : vector<8x128xf32>
    %c4_921 = arith.constant 4 : index
    %c2_922 = arith.constant 2 : index
    %c0_923 = arith.constant 0 : index
    %c0_924 = arith.constant 0 : index
    %927 = vector.load %arg5[%c4_921, %c2_922, %c0_923, %c0_924] : memref<5x3x8x1xf32, #tpu.memory_space<vmem>>, vector<1x1x8x1xf32>
    %928 = vector.shape_cast %927 : vector<1x1x8x1xf32> to vector<8x1xf32>
    %929 = vector.broadcast %928 : vector<8x1xf32> to vector<8x128xf32>
    %930 = arith.addf %926, %929 : vector<8x128xf32>
    %931 = arith.maximumf %745, %930 : vector<8x128xf32>
    %cst_925 = arith.constant 0.000000e+00 : f32
    %932 = vector.broadcast %cst_925 : f32 to vector<8x128xf32>
    %933 = arith.select %2, %931, %932 : vector<8x128xi1>, vector<8x128xf32>
    %934 = arith.addf %873, %4 : vector<8x128xf32>
    %c0_926 = arith.constant 0 : index
    %c0_927 = arith.constant 0 : index
    %c0_928 = arith.constant 0 : index
    %c0_929 = arith.constant 0 : index
    %935 = vector.load %arg8[%c0_926, %c0_927, %c0_928, %c0_929] : memref<1x4x8x128xf32, #tpu.memory_space<vmem>>, vector<1x1x8x128xf32>
    %936 = vector.shape_cast %935 : vector<1x1x8x128xf32> to vector<8x128xf32>
    %937 = vector.shape_cast %934 : vector<8x128xf32> to vector<1x1x8x128xf32>
    tpu.vector_store %arg8[%c0_926, %c0_927, %c0_928, %c0_929], %937 {strides = array<i32>} : memref<1x4x8x128xf32, #tpu.memory_space<vmem>>, vector<1x1x8x128xf32>,
    %938 = arith.addf %893, %6 : vector<8x128xf32>
    %c0_930 = arith.constant 0 : index
    %c1_931 = arith.constant 1 : index
    %c0_932 = arith.constant 0 : index
    %c0_933 = arith.constant 0 : index
    %939 = vector.load %arg8[%c0_930, %c1_931, %c0_932, %c0_933] : memref<1x4x8x128xf32, #tpu.memory_space<vmem>>, vector<1x1x8x128xf32>
    %940 = vector.shape_cast %939 : vector<1x1x8x128xf32> to vector<8x128xf32>
    %941 = vector.shape_cast %938 : vector<8x128xf32> to vector<1x1x8x128xf32>
    tpu.vector_store %arg8[%c0_930, %c1_931, %c0_932, %c0_933], %941 {strides = array<i32>} : memref<1x4x8x128xf32, #tpu.memory_space<vmem>>, vector<1x1x8x128xf32>,
    %942 = arith.addf %913, %8 : vector<8x128xf32>
    %c0_934 = arith.constant 0 : index
    %c2_935 = arith.constant 2 : index
    %c0_936 = arith.constant 0 : index
    %c0_937 = arith.constant 0 : index
    %943 = vector.load %arg8[%c0_934, %c2_935, %c0_936, %c0_937] : memref<1x4x8x128xf32, #tpu.memory_space<vmem>>, vector<1x1x8x128xf32>
    %944 = vector.shape_cast %943 : vector<1x1x8x128xf32> to vector<8x128xf32>
    %945 = vector.shape_cast %942 : vector<8x128xf32> to vector<1x1x8x128xf32>
    tpu.vector_store %arg8[%c0_934, %c2_935, %c0_936, %c0_937], %945 {strides = array<i32>} : memref<1x4x8x128xf32, #tpu.memory_space<vmem>>, vector<1x1x8x128xf32>,
    %946 = arith.addf %933, %10 : vector<8x128xf32>
    %c0_938 = arith.constant 0 : index
    %c3_939 = arith.constant 3 : index
    %c0_940 = arith.constant 0 : index
    %c0_941 = arith.constant 0 : index
    %947 = vector.load %arg8[%c0_938, %c3_939, %c0_940, %c0_941] : memref<1x4x8x128xf32, #tpu.memory_space<vmem>>, vector<1x1x8x128xf32>
    %948 = vector.shape_cast %947 : vector<1x1x8x128xf32> to vector<8x128xf32>
    %949 = vector.shape_cast %946 : vector<8x128xf32> to vector<1x1x8x128xf32>
    tpu.vector_store %arg8[%c0_938, %c3_939, %c0_940, %c0_941], %949 {strides = array<i32>} : memref<1x4x8x128xf32, #tpu.memory_space<vmem>>, vector<1x1x8x128xf32>,
    return
  }
  func.func @transform_0(%arg0: i32) -> (i32, i32, i32, i32) {
    %c0_i32 = arith.constant 0 : i32
    %c0_i32_0 = arith.constant 0 : i32
    %c0_i32_1 = arith.constant 0 : i32
    %c0_i32_2 = arith.constant 0 : i32
    return %arg0, %c0_i32, %c0_i32_0, %c0_i32_1 : i32, i32, i32, i32
  }
  func.func @transform_1(%arg0: i32) -> (i32, i32) {
    %c0_i32 = arith.constant 0 : i32
    %c0_i32_0 = arith.constant 0 : i32
    %c0_i32_1 = arith.constant 0 : i32
    return %c0_i32, %c0_i32_0 : i32, i32
  }
  func.func @transform_2(%arg0: i32) -> (i32, i32, i32) {
    %c0_i32 = arith.constant 0 : i32
    %c0_i32_0 = arith.constant 0 : i32
    %c0_i32_1 = arith.constant 0 : i32
    %c0_i32_2 = arith.constant 0 : i32
    return %c0_i32, %c0_i32_0, %c0_i32_1 : i32, i32, i32
  }
  func.func @transform_3(%arg0: i32) -> (i32, i32, i32) {
    %c0_i32 = arith.constant 0 : i32
    %c0_i32_0 = arith.constant 0 : i32
    %c0_i32_1 = arith.constant 0 : i32
    %c0_i32_2 = arith.constant 0 : i32
    return %c0_i32, %c0_i32_0, %c0_i32_1 : i32, i32, i32
  }
  func.func @transform_4(%arg0: i32) -> (i32, i32, i32, i32) {
    %c0_i32 = arith.constant 0 : i32
    %c0_i32_0 = arith.constant 0 : i32
    %c0_i32_1 = arith.constant 0 : i32
    %c0_i32_2 = arith.constant 0 : i32
    %c0_i32_3 = arith.constant 0 : i32
    return %c0_i32, %c0_i32_0, %c0_i32_1, %c0_i32_2 : i32, i32, i32, i32
  }
  func.func @transform_5(%arg0: i32) -> (i32, i32, i32) {
    %c0_i32 = arith.constant 0 : i32
    %c0_i32_0 = arith.constant 0 : i32
    %c0_i32_1 = arith.constant 0 : i32
    %c0_i32_2 = arith.constant 0 : i32
    return %c0_i32, %c0_i32_0, %c0_i32_1 : i32, i32, i32
  }
  func.func @transform_6(%arg0: i32) -> (i32, i32) {
    %c0_i32 = arith.constant 0 : i32
    %c0_i32_0 = arith.constant 0 : i32
    %c0_i32_1 = arith.constant 0 : i32
    return %c0_i32, %c0_i32_0 : i32, i32
  }
  func.func @transform_7(%arg0: i32) -> (i32, i32, i32, i32) {
    %c0_i32 = arith.constant 0 : i32
    %c0_i32_0 = arith.constant 0 : i32
    %c0_i32_1 = arith.constant 0 : i32
    %c0_i32_2 = arith.constant 0 : i32
    return %arg0, %c0_i32, %c0_i32_0, %c0_i32_1 : i32, i32, i32, i32
  }
}

</mosaic_0001>

<bundles_post_ra>
// kernel: symmetric_block_forward.1
= control target key start
LH: loop header
LB: loop body
LE: loop exit
PB: predicated region body
PF: predicated region fallthrough
CT: control target
= control target key end

     0   :  { %s4561_s24 = smov 0   ;;  %s5476_s0 = inlined_call_operand.vmem [shape: f32[2,4,8,128], index: 0, kind: input, shape index: {}]   ;;  %s5477_s1 = inlined_call_operand.vmem [shape: f32[8,128], index: 1, kind: input, shape index: {}]   ;;  %s5478_s2 = inlined_call_operand.vmem [shape: f32[5,8,72], index: 2, kind: input, shape index: {}]   ;;  %s5479_s3 = inlined_call_operand.vmem [shape: f32[5,8,72], index: 3, kind: input, shape index: {}]   ;;  %s5480_s4 = inlined_call_operand.vmem [shape: f32[5,3,8,1], index: 4, kind: input, shape index: {}]   ;;  %s5481_s5 = inlined_call_operand.vmem [shape: f32[4,8,8], index: 5, kind: input, shape index: {}]   ;;  %s5482_s6 = inlined_call_operand.vmem [shape: f32[8,1], index: 6, kind: input, shape index: {}]   ;;  %s5483_s7 = inlined_call_operand.vmem [shape: f32[2,4,8,128], index: 7, kind: output, shape index: {}]  }
   0x1 LB: > { %s3278_s25 = sadd.s32 4294967295, %s4506_s24   ;;  %p3282_p0 = scmp.ge.s32.totalorder %s4506_s24, 1  ;;  %s4506_s24 = sphi %s4561_s24, %s17_s24  }
   0x2   : > { %p237_p1 = scmp.lt.s32.totalorder %s4506_s24, 3 }
   0x4   : > { %p238_p2 = pnand %p3282_p0, %p237_p1 }
   0x5   : > { %p269_p3 = scmp.lt.s32.totalorder (!%p238_p2), %s3278_s25, 1  ;;  %v4508_v0 = vmov (!%p238_p2), 0.0|0.0   ;;  %s4509_s30 = smov (!%p238_p2), 10   ;;  %vm4512_vm0 = vmmov (!%p238_p2), 0   ;;  %v4513_v4 = vmov (!%p238_p2), 0.0   ;;  %vm302_vm1 = vcmask (!%p238_p2), 1047632  }
   0x6   : > { %241 = sbr.rel (%p238_p2) target bundleno = 3924 (0xf54), region = 48  ;;  %4062 = vmatprep.subr.bf16.mxu0 (!%p238_p2), %v4508_v0  ;;  %4074 = vmatprep.subr.bf16.mxu1 (!%p238_p2), %v4508_v0  ;;  %s4510_s8 = smov (!%p238_p2), 1   ;;  %vm293_vm2 = vcmask (!%p238_p2), 1047560   ;;  %vm311_vm3 = vcmask (!%p238_p2), 1047640   ;;  %v326_v20 = vld [vmem:[%s5478_s2] sm:$0xff] (!%p238_p2)  ;;  %vm336_vm4 = vcmask (!%p238_p2), 588800  }
   0x7   : > { %s4511_s9 = smov (!%p238_p2), 11   ;;  %3598 = vmatprep.mubr.msk.f32.mxu0 (!%p238_p2), %vm4512_vm0, %v4513_v4  ;;  %3619 = vmatprep.mubr.msk.f32.mxu1 (!%p238_p2), %vm4512_vm0, %v4513_v4  ;;  %v4630_v21 = vld [vmem:[%s5477_s1] sm:$0xff] (!%p238_p2)  ;;  %s4514_s14 = smov (!%p238_p2), 9   ;;  %v3292_v26 = vld [vmem:[%s5480_s4 + $0x8] sm:$0xff] (!%p238_p2)  ;;  %v4519_v27 = vmov (!%p238_p2), 0   ;;  %v3293_v28 = vld [vmem:[%s5480_s4 + $0x10] sm:$0xff] (!%p238_p2) }
   0x8   : > { %vm280_vm5 = vcmp.gt.f32.partialorder (!%p238_p2), %v4630_v21, 0.5  ;;  %s4515_s15 = smov (!%p238_p2), 119   ;;  %s4516_s16 = smov (!%p238_p2), 127   ;;  %v474_v25 = vld [vmem:[%s5480_s4] sm:$0xff] (!%p238_p2)  ;;  %4346 = vset.pattern.permute.xlu1 (!%p238_p2), %v4519_v27  ;;  %4347 = vset.pattern.permute.xlu0 (!%p238_p2), %v4519_v27  ;;  %vm426_vm6 = vcmask (!%p238_p2), 1047624   ;;  %vm448_vm7 = vcmask (!%p238_p2), 973824  }
   0x9   : > { %s4517_s17 = smov (!%p238_p2), 117   ;;  %s4518_s18 = smov (!%p238_p2), 118   ;;  %vm441_vm8 = vcmask (!%p238_p2), 1039360   ;;  %vm462_vm9 = vcmask (!%p238_p2), 957440   ;;  %vm455_vm10 = vcmask (!%p238_p2), 965632   ;;  %vm4520_vm11 = vmmov (!%p238_p2), 1   ;;  %vm4945_vm14 = vmpackc.low (!%p238_p2), %vm280_vm5, %vm280_vm5 }
   0xa   : > { %vm4675_vm12 = vmpackc.low (!%p238_p2), %vm4520_vm11, %vm280_vm5  ;;  %v464_v49 = vld [vmem:[%s5479_s3] sm:$0xff] (!%p238_p2)  ;;  %vm1135_vm13 = vcmask (!%p238_p2), 64512  }
   0xb   : > { %v3299_v27 = vld [vmem:[%s5480_s4 + $0x20] sm:$0xff] (!%p238_p2)  ;;  %vm4956_vm15 = vmpackc.low (!%p238_p2), %vm280_vm5, %vm4520_vm11 }
   0xd   : > { %s5491_s25 = smov (!%p269_p3, %s3278_s25), 1 }
   0xe   : > { %s3350_s26 = sshll.u32 %s5491_s25, 5 }
   0xf   : > { %s4579_s29 = scalar_lea.vmem %s5476_s0, %s3350_s26  ;;  %s278_s11 = scalar_lea.vmem %s5483_s7, %s3350_s26 }
  0x10   : > { %v4582_v1 = vld [vmem:[%s4579_s29 + $0x10] sm:$0xff]  ;;  %v4585_v2 = vld [vmem:[%s4579_s29 + $0x8] sm:$0xff]  ;;  %v4594_v3 = vld [vmem:[%s4579_s29 + $0x18] sm:$0xff] }
  0x11   : > { %299 = vrot.lane.b32.xlu0 %v4582_v1, %s4509_s30  ;;  %306 = vst [vmem:[#allocation2 + $0xb0] sm:$0xff] %v4582_v1  ;;  %290 = vrot.lane.b32.xlu1 %v4585_v2, %s4510_s8  ;;  %297 = vst [vmem:[#allocation2 + $0x80] sm:$0xff] %v4585_v2  ;;  %v281_v15 = vld [vmem:[%s4579_s29] sm:$0xff] }
  0x12   : > { %325 = vst [vmem:[#allocation2 + $0xc8] sm:$0xff] %v4594_v3  ;;  %v4069_v17 = vpack.c.bf16 %v4585_v2, %v281_v15 }
  0x15   : > { %308 = vrot.lane.b32.xlu0 %v4594_v3, %s4511_s9  ;;  %315 = vrot.lane.b32.xlu1 %v4594_v3, %s4509_s30 }
  0x19   : > { %320 = vrot.lane.b32.xlu0 %v4594_v3, %s4510_s8 }
  0x83   : > { %v300_v5 = vpop.permute.xlu0 %299  ;;  %v291_v6 = vpop.permute.xlu1 %290 }
  0x84   : > { %303 = vst.msk [vmem:[#allocation2 + $0x20] sm:$0xff] %vm302_vm1, %v300_v5 }
  0x85   : > { %294 = vst.msk [vmem:[#allocation2 + $0x50] sm:$0xff] %vm293_vm2, %v291_v6 }
  0x87   : > { %v309_v7 = vpop.permute.xlu0 %308  ;;  %v316_v8 = vpop.permute.xlu1 %315 }
  0x88   : > { %312 = vst.msk [vmem:[#allocation2 + $0x8] sm:$0xff] %vm311_vm3, %v309_v7 }
  0x89   : > { %318 = vst.msk [vmem:[#allocation2 + $0x38] sm:$0xff] %vm302_vm1, %v316_v8 }
  0x8b   : > { %v321_v9 = vpop.permute.xlu0 %320  ;;  %v328_v11 = vld [vmem:[#allocation2 + $0x20] sm:$0xff] }
  0x8c   : > { %323 = vst.msk [vmem:[#allocation2 + $0x98] sm:$0xff] %vm293_vm2, %v321_v9  ;;  %v330_v14 = vld [vmem:[#allocation2 + $0x50] sm:$0xff] }
  0x8f   : > { %v327_v10 = vld [vmem:[#allocation2 + $0x8] sm:$0xff] }
  0x90   : > { %v4063_v12 = vpack.c.bf16 %v328_v11, %v327_v10  ;;  %v329_v13 = vld [vmem:[#allocation2 + $0x38] sm:$0xff] }
  0x91   : > { %v4066_v16 = vpack.c.bf16 %v330_v14, %v329_v13 }
  0x92   : > { %4064 = vmatpush3.bf16.msra.mxu0 %v4063_v12 }
  0x93   : > { %4065 = vmatprep.subr.bf16.mxu0 %v4508_v0  ;;  %v333_v18 = vld [vmem:[#allocation2 + $0x98] sm:$0xff] }
  0x94   : > { %v4072_v19 = vpack.c.bf16 %v4582_v1, %v333_v18 }
  0x96   : > { %4067 = vmatpush3.bf16.msra.mxu0 %v4066_v16 }
  0x97   : > { %4068 = vmatprep.subr.bf16.mxu0 %v4508_v0 }
  0x9a   : > { %4070 = vmatpush3.bf16.msra.mxu0 %v4069_v17 }
  0x9b   : > { %4071 = vmatprep.subr.bf16.mxu0 %v4508_v0 }
  0x9e   : > { %4073 = vmatpush3.bf16.msra.mxu0 %v4072_v19 }
  0x9f   : > { %3596 = vmatprep.subr.mxu0 %v4513_v4 }
  0xa2   : > { %3597 = vmatpush3.msra.mxu0 %v4594_v3 }
  0xa3   : > { %3599 = vmatmul.mubr.msk.f32.vlgmr.msra.gmra.mrb[0].mxu0 %vm336_vm4, %v326_v20  ;;  %4086 = vmatprep.subr.bf16.mxu0 %v4508_v0 }
  0xa4   : > { %3640 = vmatprep.mubr.msk.f32.mxu0 %vm4512_vm0, %v4513_v4 }
 0x176   : > { %v406_v22 = vpop.f32.mrb[0].mxu0 }
 0x177   : > { %v4635_v23 = vsel %vm280_vm5, %v406_v22, 0.0  ;;  %v3600_v24 = vpop.f32.mrb[1].mxu0 }
 0x178   : > { %418 = vrot.lane.b32.xlu0 %v4635_v23, %s4509_s30  ;;  %412 = vrot.lane.b32.xlu1 %v4635_v23, %s4511_s9 }
 0x17c   : > { %430 = vrot.lane.b32.xlu0 %v4635_v23, %s4510_s8  ;;  %423 = vrot.lane.b32.xlu1 %v4635_v23, %s4514_s14 }
 0x180   : > { %443 = vrot.lane.b32.xlu0 %v4635_v23, %s4515_s15  ;;  %436 = vrot.lane.b32.xlu1 %v4635_v23, %s4516_s16 }
 0x184   : > { %457 = vrot.lane.b32.xlu0 %v4635_v23, %s4517_s17  ;;  %450 = vrot.lane.b32.xlu1 %v4635_v23, %s4518_s18 }
 0x188   : > { %477 = vperm.xlu1 %4346, %v474_v25   ;;  %557 = vperm.xlu0 %4347, %v3292_v26  }
 0x18c   : > { %565 = vperm.xlu1 %4346, %v3293_v28   ;;  %v3297_v28 = vld [vmem:[%s5480_s4 + $0x18] sm:$0xff] }
 0x1ea   : > { %v419_v29 = vpop.permute.xlu0 %418  ;;  %v413_v30 = vpop.permute.xlu1 %412 }
 0x1eb   : > { %421 = vst.msk [vmem:[#allocation2 + $0xf8] sm:$0xff] %vm302_vm1, %v419_v29  ;;  %v3300_v29 = vld [vmem:[%s5480_s4 + $0x28] sm:$0xff] }
 0x1ec   : > { %416 = vst.msk [vmem:[#allocation2 + $0xe0] sm:$0xff] %vm311_vm3, %v413_v30 }
 0x1ee   : > { %v431_v31 = vpop.permute.xlu0 %430  ;;  %v424_v32 = vpop.permute.xlu1 %423 }
 0x1ef   : > { %433 = vst.msk [vmem:[#allocation2 + $0x128] sm:$0xff] %vm293_vm2, %v431_v31 }
 0x1f0   : > { %427 = vst.msk [vmem:[#allocation2 + $0x110] sm:$0xff] %vm426_vm6, %v424_v32 }
 0x1f2   : > { %v444_v33 = vpop.permute.xlu0 %443  ;;  %v437_v34 = vpop.permute.xlu1 %436  ;;  %v466_v36 = vld [vmem:[#allocation2 + $0xf8] sm:$0xff] }
 0x1f3   : > { %v465_v35 = vld [vmem:[#allocation2 + $0xe0] sm:$0xff]  ;;  %449 = vst.msk [vmem:[#allocation2 + $0x170] sm:$0xff] %vm448_vm7, %v444_v33 }
 0x1f4   : > { %442 = vst.msk [vmem:[#allocation2 + $0x158] sm:$0xff] %vm441_vm8, %v437_v34  ;;  %v4075_v37 = vpack.c.bf16 %v466_v36, %v465_v35 }
 0x1f6   : > { %4076 = vmatpush3.bf16.msra.mxu1 %v4075_v37  ;;  %v458_v38 = vpop.permute.xlu0 %457  ;;  %v451_v39 = vpop.permute.xlu1 %450  ;;  %v468_v41 = vld [vmem:[#allocation2 + $0x128] sm:$0xff] }
 0x1f7   : > { %4077 = vmatprep.subr.bf16.mxu1 %v4508_v0  ;;  %v467_v40 = vld [vmem:[#allocation2 + $0x110] sm:$0xff]  ;;  %463 = vst.msk [vmem:[#allocation2 + $0x1a0] sm:$0xff] %vm462_vm9, %v458_v38 }
 0x1f8   : > { %456 = vst.msk [vmem:[#allocation2 + $0x188] sm:$0xff] %vm455_vm10, %v451_v39  ;;  %v4078_v42 = vpack.c.bf16 %v468_v41, %v467_v40 }
 0x1fa   : > { %4079 = vmatpush3.bf16.msra.mxu1 %v4078_v42  ;;  %v471_v46 = vld [vmem:[#allocation2 + $0x170] sm:$0xff] }
 0x1fb   : > { %4080 = vmatprep.subr.bf16.mxu1 %v4508_v0  ;;  %v470_v43 = vld [vmem:[#allocation2 + $0x158] sm:$0xff] }
 0x1fc   : > { %v4350_v45 = vpack.c.bf16 %v470_v43, %v406_v22  ;;  %v3294_v22 = vld [vmem:[%s5478_s2 + $0x8] sm:$0xff] }
 0x1fe   : > { %4351 = vmatpush3.bf16.msk.msra.mxu1 %vm4675_vm12, %v4350_v45  ;;  %v473_v50 = vld [vmem:[#allocation2 + $0x1a0] sm:$0xff] }
 0x1ff   : > { %4083 = vmatprep.subr.bf16.mxu1 %v4508_v0  ;;  %v472_v47 = vld [vmem:[#allocation2 + $0x188] sm:$0xff] }
 0x200   : > { %v4084_v48 = vpack.c.bf16 %v472_v47, %v471_v46 }
 0x202   : > { %4085 = vmatpush3.bf16.msra.mxu1 %v4084_v48 }
 0x203   : > { %3617 = vmatprep.subr.mxu1 %v4513_v4 }
 0x206   : > { %3618 = vmatpush3.msra.mxu1 %v473_v50  ;;  %v3296_v50 = vld [vmem:[%s5479_s3 + $0x8] sm:$0xff] }
 0x207   : > { %3620 = vmatmul.mubr.msk.f32.vlgmr.msra.gmra.mrb[0].mxu1 %vm336_vm4, %v464_v49  ;;  %4098 = vmatprep.subr.bf16.mxu1 %v4508_v0  ;;  %v478_v51 = vpop.permute.xlu1 %477  ;;  %v558_v53 = vpop.permute.xlu0 %557 }
 0x208   : > { %3661 = vmatprep.mubr.msk.f32.mxu1 %vm4512_vm0, %v4513_v4 }
 0x20b   : > { %v566_v57 = vpop.permute.xlu1 %565 }
 0x2da   : > { %v549_v52 = vpop.f32.mrb[0].mxu1 }
 0x2db   : > { %v550_v54 = vadd.f32 %v549_v52, %v478_v51  ;;  %v3621_v55 = vpop.f32.mrb[1].mxu1 }
 0x2dd   : > { %v560_v56 = vmul.f32 %v558_v53, %v550_v54 }
 0x2df   : > { %v568_v58 = vadd.f32 %v566_v57, %v560_v56 }
 0x2e1   : > { %v569_v59 = vmax.f32 %v4635_v23, %v568_v58 }
 0x2e3   : > { %v570_v60 = vsel %vm280_vm5, %v569_v59, 0.0 }
 0x2e4   : > { %577 = vrot.lane.b32.xlu0 %v570_v60, %s4509_s30  ;;  %572 = vrot.lane.b32.xlu1 %v570_v60, %s4511_s9 }
 0x2e8   : > { %587 = vrot.lane.b32.xlu0 %v570_v60, %s4510_s8  ;;  %582 = vrot.lane.b32.xlu1 %v570_v60, %s4514_s14 }
 0x2ec   : > { %598 = vrot.lane.b32.xlu0 %v570_v60, %s4515_s15  ;;  %593 = vrot.lane.b32.xlu1 %v570_v60, %s4516_s16 }
 0x2f0   : > { %608 = vrot.lane.b32.xlu0 %v570_v60, %s4517_s17  ;;  %603 = vrot.lane.b32.xlu1 %v570_v60, %s4518_s18 }
 0x356   : > { %v578_v61 = vpop.permute.xlu0 %577  ;;  %v573_v62 = vpop.permute.xlu1 %572 }
 0x357   : > { %580 = vst.msk [vmem:[#allocation2 + $0xf8] sm:$0xff] %vm302_vm1, %v578_v61 }
 0x358   : > { %575 = vst.msk [vmem:[#allocation2 + $0xe0] sm:$0xff] %vm311_vm3, %v573_v62 }
 0x35a   : > { %v588_v63 = vpop.permute.xlu0 %587  ;;  %v583_v5 = vpop.permute.xlu1 %582 }
 0x35b   : > { %590 = vst.msk [vmem:[#allocation2 + $0x128] sm:$0xff] %vm293_vm2, %v588_v63 }
 0x35c   : > { %585 = vst.msk [vmem:[#allocation2 + $0x110] sm:$0xff] %vm426_vm6, %v583_v5 }
 0x35e   : > { %v599_v6 = vpop.permute.xlu0 %598  ;;  %v594_v7 = vpop.permute.xlu1 %593  ;;  %v616_v9 = vld [vmem:[#allocation2 + $0xf8] sm:$0xff] }
 0x35f   : > { %v615_v8 = vld [vmem:[#allocation2 + $0xe0] sm:$0xff]  ;;  %602 = vst.msk [vmem:[#allocation2 + $0x170] sm:$0xff] %vm448_vm7, %v599_v6 }
 0x360   : > { %597 = vst.msk [vmem:[#allocation2 + $0x158] sm:$0xff] %vm441_vm8, %v594_v7  ;;  %v4087_v10 = vpack.c.bf16 %v616_v9, %v615_v8 }
 0x362   : > { %4088 = vmatpush3.bf16.msra.mxu0 %v4087_v10  ;;  %v609_v11 = vpop.permute.xlu0 %608  ;;  %v604_v12 = vpop.permute.xlu1 %603  ;;  %v618_v14 = vld [vmem:[#allocation2 + $0x128] sm:$0xff] }
 0x363   : > { %4089 = vmatprep.subr.bf16.mxu0 %v4508_v0  ;;  %v617_v13 = vld [vmem:[#allocation2 + $0x110] sm:$0xff]  ;;  %612 = vst.msk [vmem:[#allocation2 + $0x1a0] sm:$0xff] %vm462_vm9, %v609_v11 }
 0x364   : > { %607 = vst.msk [vmem:[#allocation2 + $0x188] sm:$0xff] %vm455_vm10, %v604_v12  ;;  %v4090_v15 = vpack.c.bf16 %v618_v14, %v617_v13 }
 0x366   : > { %4091 = vmatpush3.bf16.msra.mxu0 %v4090_v15  ;;  %v621_v18 = vld [vmem:[#allocation2 + $0x170] sm:$0xff] }
 0x367   : > { %4092 = vmatprep.subr.bf16.mxu0 %v4508_v0  ;;  %v620_v16 = vld [vmem:[#allocation2 + $0x158] sm:$0xff] }
 0x368   : > { %v4353_v17 = vpack.c.bf16 %v620_v16, %v569_v59 }
 0x36a   : > { %4354 = vmatpush3.bf16.msk.msra.mxu0 %vm4675_vm12, %v4353_v17  ;;  %v623_v23 = vld [vmem:[#allocation2 + $0x1a0] sm:$0xff] }
 0x36b   : > { %4095 = vmatprep.subr.bf16.mxu0 %v4508_v0  ;;  %v622_v19 = vld [vmem:[#allocation2 + $0x188] sm:$0xff] }
 0x36c   : > { %v4096_v20 = vpack.c.bf16 %v622_v19, %v621_v18 }
 0x36e   : > { %4097 = vmatpush3.bf16.msra.mxu0 %v4096_v20 }
 0x36f   : > { %3638 = vmatprep.subr.mxu0 %v4513_v4 }
 0x372   : > { %3639 = vmatpush3.msra.mxu0 %v623_v23  ;;  %v3301_v23 = vld [vmem:[%s5478_s2 + $0x10] sm:$0xff] }
 0x373   : > { %3641 = vmatmul.mubr.msk.f32.vlgmr.msra.gmra.mrb[2].mxu0 %vm336_vm4, %v3294_v22  ;;  %4110 = vmatprep.subr.bf16.mxu0 %v4508_v0 }
 0x374   : > { %3682 = vmatprep.mubr.msk.f32.mxu0 %vm4512_vm0, %v4513_v4 }
 0x446   : > { %v693_v24 = vpop.f32.mrb[2].mxu0 }
 0x447   : > { %v4724_v25 = vsel %vm280_vm5, %v693_v24, 0.0  ;;  %v3642_v26 = vpop.f32.mrb[3].mxu0 }
 0x448   : > { %705 = vrot.lane.b32.xlu0 %v4724_v25, %s4509_s30  ;;  %699 = vrot.lane.b32.xlu1 %v4724_v25, %s4511_s9 }
 0x44c   : > { %715 = vrot.lane.b32.xlu0 %v4724_v25, %s4510_s8  ;;  %710 = vrot.lane.b32.xlu1 %v4724_v25, %s4514_s14 }
 0x450   : > { %726 = vrot.lane.b32.xlu0 %v4724_v25, %s4515_s15  ;;  %721 = vrot.lane.b32.xlu1 %v4724_v25, %s4516_s16 }
 0x454   : > { %736 = vrot.lane.b32.xlu0 %v4724_v25, %s4517_s17  ;;  %731 = vrot.lane.b32.xlu1 %v4724_v25, %s4518_s18 }
 0x458   : > { %836 = vperm.xlu0 %4347, %v3299_v27   ;;  %756 = vperm.xlu1 %4346, %v3297_v28   ;;  %v3306_v28 = vld [vmem:[%s5480_s4 + $0x38] sm:$0xff] }
 0x45c   : > { %844 = vperm.xlu1 %4346, %v3300_v29   ;;  %v3304_v29 = vld [vmem:[%s5480_s4 + $0x30] sm:$0xff] }
 0x4ba   : > { %v706_v30 = vpop.permute.xlu0 %705  ;;  %v700_v31 = vpop.permute.xlu1 %699 }
 0x4bb   : > { %708 = vst.msk [vmem:[#allocation2 + $0x1d0] sm:$0xff] %vm302_vm1, %v706_v30  ;;  %v1345_v30 = vld [vmem:[%s5482_s6] sm:$0xff] }
 0x4bc   : > { %703 = vst.msk [vmem:[#allocation2 + $0x1b8] sm:$0xff] %vm311_vm3, %v700_v31  ;;  %v3307_v31 = vld [vmem:[%s5480_s4 + $0x40] sm:$0xff] }
 0x4be   : > { %v716_v32 = vpop.permute.xlu0 %715  ;;  %v711_v33 = vpop.permute.xlu1 %710 }
 0x4bf   : > { %718 = vst.msk [vmem:[#allocation2 + $0x200] sm:$0xff] %vm293_vm2, %v716_v32 }
 0x4c0   : > { %713 = vst.msk [vmem:[#allocation2 + $0x1e8] sm:$0xff] %vm426_vm6, %v711_v33 }
 0x4c2   : > { %v727_v34 = vpop.permute.xlu0 %726  ;;  %v722_v35 = vpop.permute.xlu1 %721  ;;  %v744_v37 = vld [vmem:[#allocation2 + $0x1d0] sm:$0xff] }
 0x4c3   : > { %v743_v36 = vld [vmem:[#allocation2 + $0x1b8] sm:$0xff]  ;;  %730 = vst.msk [vmem:[#allocation2 + $0x248] sm:$0xff] %vm448_vm7, %v727_v34 }
 0x4c4   : > { %725 = vst.msk [vmem:[#allocation2 + $0x230] sm:$0xff] %vm441_vm8, %v722_v35  ;;  %v4099_v38 = vpack.c.bf16 %v744_v37, %v743_v36 }
 0x4c6   : > { %4100 = vmatpush3.bf16.msra.mxu1 %v4099_v38  ;;  %v737_v39 = vpop.permute.xlu0 %736  ;;  %v732_v40 = vpop.permute.xlu1 %731  ;;  %v746_v42 = vld [vmem:[#allocation2 + $0x200] sm:$0xff] }
 0x4c7   : > { %4101 = vmatprep.subr.bf16.mxu1 %v4508_v0  ;;  %v745_v41 = vld [vmem:[#allocation2 + $0x1e8] sm:$0xff]  ;;  %740 = vst.msk [vmem:[#allocation2 + $0x278] sm:$0xff] %vm462_vm9, %v737_v39 }
 0x4c8   : > { %735 = vst.msk [vmem:[#allocation2 + $0x260] sm:$0xff] %vm455_vm10, %v732_v40  ;;  %v4102_v43 = vpack.c.bf16 %v746_v42, %v745_v41 }
 0x4ca   : > { %4103 = vmatpush3.bf16.msra.mxu1 %v4102_v43  ;;  %v749_v47 = vld [vmem:[#allocation2 + $0x248] sm:$0xff] }
 0x4cb   : > { %4104 = vmatprep.subr.bf16.mxu1 %v4508_v0  ;;  %v748_v45 = vld [vmem:[#allocation2 + $0x230] sm:$0xff] }
 0x4cc   : > { %v4356_v46 = vpack.c.bf16 %v748_v45, %v693_v24 }
 0x4ce   : > { %4357 = vmatpush3.bf16.msk.msra.mxu1 %vm4675_vm12, %v4356_v46  ;;  %v751_v51 = vld [vmem:[#allocation2 + $0x278] sm:$0xff] }
 0x4cf   : > { %4107 = vmatprep.subr.bf16.mxu1 %v4508_v0  ;;  %v750_v48 = vld [vmem:[#allocation2 + $0x260] sm:$0xff] }
 0x4d0   : > { %v4108_v49 = vpack.c.bf16 %v750_v48, %v749_v47 }
 0x4d2   : > { %4109 = vmatpush3.bf16.msra.mxu1 %v4108_v49 }
 0x4d3   : > { %3659 = vmatprep.subr.mxu1 %v4513_v4 }
 0x4d6   : > { %3660 = vmatpush3.msra.mxu1 %v751_v51 }
 0x4d7   : > { %3662 = vmatmul.mubr.msk.f32.vlgmr.msra.gmra.mrb[2].mxu1 %vm336_vm4, %v3296_v50  ;;  %4122 = vmatprep.subr.bf16.mxu1 %v4508_v0  ;;  %v757_v52 = vpop.permute.xlu1 %756  ;;  %v837_v56 = vpop.permute.xlu0 %836 }
 0x4d8   : > { %3703 = vmatprep.mubr.msk.f32.mxu1 %vm4512_vm0, %v4513_v4 }
 0x4db   : > { %v845_v58 = vpop.permute.xlu1 %844 }
 0x5aa   : > { %v828_v53 = vpop.f32.mrb[2].mxu1 }
 0x5ab   : > { %v829_v54 = vadd.f32 %v828_v53, %v757_v52  ;;  %v3663_v55 = vpop.f32.mrb[3].mxu1  ;;  %v3303_v52 = vld [vmem:[%s5479_s3 + $0x10] sm:$0xff] }
 0x5ad   : > { %v839_v57 = vmul.f32 %v837_v56, %v829_v54 }
 0x5af   : > { %v847_v59 = vadd.f32 %v845_v58, %v839_v57 }
 0x5b1   : > { %v848_v60 = vmax.f32 %v4724_v25, %v847_v59 }
 0x5b3   : > { %v849_v61 = vsel %vm280_vm5, %v848_v60, 0.0 }
 0x5b4   : > { %856 = vrot.lane.b32.xlu1 %v849_v61, %s4509_s30  ;;  %851 = vrot.lane.b32.xlu0 %v849_v61, %s4511_s9 }
 0x5b8   : > { %866 = vrot.lane.b32.xlu1 %v849_v61, %s4510_s8  ;;  %861 = vrot.lane.b32.xlu0 %v849_v61, %s4514_s14 }
 0x5bc   : > { %877 = vrot.lane.b32.xlu1 %v849_v61, %s4515_s15  ;;  %872 = vrot.lane.b32.xlu0 %v849_v61, %s4516_s16 }
 0x5c0   : > { %887 = vrot.lane.b32.xlu1 %v849_v61, %s4517_s17  ;;  %882 = vrot.lane.b32.xlu0 %v849_v61, %s4518_s18 }
 0x626   : > { %v857_v62 = vpop.permute.xlu1 %856  ;;  %v852_v63 = vpop.permute.xlu0 %851 }
 0x627   : > { %859 = vst.msk [vmem:[#allocation2 + $0x1d0] sm:$0xff] %vm302_vm1, %v857_v62 }
 0x628   : > { %854 = vst.msk [vmem:[#allocation2 + $0x1b8] sm:$0xff] %vm311_vm3, %v852_v63  ;;  %v1128_v63 = vld [vmem:[%s5481_s5] sm:$0xff] }
 0x62a   : > { %v867_v5 = vpop.permute.xlu1 %866  ;;  %v862_v6 = vpop.permute.xlu0 %861 }
 0x62b   : > { %869 = vst.msk [vmem:[#allocation2 + $0x200] sm:$0xff] %vm293_vm2, %v867_v5  ;;  %v3310_v5 = vld [vmem:[%s5481_s5 + $0x8] sm:$0xff] }
 0x62c   : > { %864 = vst.msk [vmem:[#allocation2 + $0x1e8] sm:$0xff] %vm426_vm6, %v862_v6  ;;  %v3313_v6 = vld [vmem:[%s5481_s5 + $0x10] sm:$0xff] }
 0x62e   : > { %v878_v7 = vpop.permute.xlu1 %877  ;;  %v873_v8 = vpop.permute.xlu0 %872  ;;  %v895_v10 = vld [vmem:[#allocation2 + $0x1d0] sm:$0xff] }
 0x62f   : > { %v894_v9 = vld [vmem:[#allocation2 + $0x1b8] sm:$0xff]  ;;  %881 = vst.msk [vmem:[#allocation2 + $0x248] sm:$0xff] %vm448_vm7, %v878_v7 }
 0x630   : > { %876 = vst.msk [vmem:[#allocation2 + $0x230] sm:$0xff] %vm441_vm8, %v873_v8  ;;  %v4111_v11 = vpack.c.bf16 %v895_v10, %v894_v9  ;;  %v3316_v7 = vld [vmem:[%s5481_s5 + $0x18] sm:$0xff] }
 0x632   : > { %4112 = vmatpush3.bf16.msra.mxu0 %v4111_v11  ;;  %v888_v12 = vpop.permute.xlu1 %887  ;;  %v883_v13 = vpop.permute.xlu0 %882  ;;  %v897_v15 = vld [vmem:[#allocation2 + $0x200] sm:$0xff] }
 0x633   : > { %4113 = vmatprep.subr.bf16.mxu0 %v4508_v0  ;;  %v896_v14 = vld [vmem:[#allocation2 + $0x1e8] sm:$0xff]  ;;  %891 = vst.msk [vmem:[#allocation2 + $0x278] sm:$0xff] %vm462_vm9, %v888_v12 }
 0x634   : > { %886 = vst.msk [vmem:[#allocation2 + $0x260] sm:$0xff] %vm455_vm10, %v883_v13  ;;  %v4114_v16 = vpack.c.bf16 %v897_v15, %v896_v14 }
 0x636   : > { %4115 = vmatpush3.bf16.msra.mxu0 %v4114_v16  ;;  %v900_v19 = vld [vmem:[#allocation2 + $0x248] sm:$0xff] }
 0x637   : > { %4116 = vmatprep.subr.bf16.mxu0 %v4508_v0  ;;  %v899_v17 = vld [vmem:[#allocation2 + $0x230] sm:$0xff] }
 0x638   : > { %v4359_v18 = vpack.c.bf16 %v899_v17, %v848_v60 }
 0x63a   : > { %4360 = vmatpush3.bf16.msk.msra.mxu0 %vm4675_vm12, %v4359_v18  ;;  %v902_v24 = vld [vmem:[#allocation2 + $0x278] sm:$0xff] }
 0x63b   : > { %4119 = vmatprep.subr.bf16.mxu0 %v4508_v0  ;;  %v901_v20 = vld [vmem:[#allocation2 + $0x260] sm:$0xff] }
 0x63c   : > { %v4120_v22 = vpack.c.bf16 %v901_v20, %v900_v19 }
 0x63e   : > { %4121 = vmatpush3.bf16.msra.mxu0 %v4120_v22 }
 0x63f   : > { %3680 = vmatprep.subr.mxu0 %v4513_v4 }
 0x642   : > { %3681 = vmatpush3.msra.mxu0 %v902_v24 }
 0x643   : > { %3683 = vmatmul.mubr.msk.f32.vlgmr.msra.gmra.mrb[4].mxu0 %vm336_vm4, %v3301_v23  ;;  %3706 = vmatprep.subr.mxu0 %v4513_v4 }
 0x644   : > { %3708 = vmatprep.mubr.msk.f32.mxu0 %vm4512_vm0, %v4513_v4 }
 0x716   : > { %v972_v25 = vpop.f32.mrb[4].mxu0 }
 0x717   : > { %v4806_v26 = vsel %vm280_vm5, %v972_v25, 0.0  ;;  %v3684_v27 = vpop.f32.mrb[5].mxu0 }
 0x718   : > { %983 = vrot.lane.b32.xlu1 %v4806_v26, %s4509_s30  ;;  %978 = vrot.lane.b32.xlu0 %v4806_v26, %s4511_s9 }
 0x71c   : > { %993 = vrot.lane.b32.xlu1 %v4806_v26, %s4510_s8  ;;  %988 = vrot.lane.b32.xlu0 %v4806_v26, %s4514_s14 }
 0x720   : > { %1004 = vrot.lane.b32.xlu1 %v4806_v26, %s4515_s15  ;;  %999 = vrot.lane.b32.xlu0 %v4806_v26, %s4516_s16 }
 0x724   : > { %1014 = vrot.lane.b32.xlu1 %v4806_v26, %s4517_s17  ;;  %1009 = vrot.lane.b32.xlu0 %v4806_v26, %s4518_s18 }
 0x728   : > { %1114 = vperm.xlu1 %4346, %v3306_v28   ;;  %1034 = vperm.xlu0 %4347, %v3304_v29  }
 0x72c   : > { %1348 = vperm.xlu1 %4346, %v1345_v30   ;;  %1122 = vperm.xlu0 %4347, %v3307_v31  }
 0x730   : > { %1242 = vperm.xlu1 %4346, %v1345_v30   ;;  %1454 = vperm.xlu0 %4347, %v1345_v30  }
 0x734   : > { %1132 = vperm.xlu0 %4347, %v1345_v30  }
 0x78a   : > { %v984_v32 = vpop.permute.xlu1 %983  ;;  %v979_v33 = vpop.permute.xlu0 %978 }
 0x78b   : > { %986 = vst.msk [vmem:[#allocation2 + $0x20] sm:$0xff] %vm302_vm1, %v984_v32 }
 0x78c   : > { %981 = vst.msk [vmem:[#allocation2 + $0x8] sm:$0xff] %vm311_vm3, %v979_v33 }
 0x78e   : > { %v994_v34 = vpop.permute.xlu1 %993  ;;  %v989_v35 = vpop.permute.xlu0 %988 }
 0x78f   : > { %996 = vst.msk [vmem:[#allocation2 + $0x50] sm:$0xff] %vm293_vm2, %v994_v34 }
 0x790   : > { %991 = vst.msk [vmem:[#allocation2 + $0x38] sm:$0xff] %vm426_vm6, %v989_v35 }
 0x792   : > { %v1005_v36 = vpop.permute.xlu1 %1004  ;;  %v1000_v37 = vpop.permute.xlu0 %999  ;;  %v1022_v39 = vld [vmem:[#allocation2 + $0x20] sm:$0xff] }
 0x793   : > { %v1021_v38 = vld [vmem:[#allocation2 + $0x8] sm:$0xff]  ;;  %1008 = vst.msk [vmem:[#allocation2 + $0x98] sm:$0xff] %vm448_vm7, %v1005_v36 }
 0x794   : > { %1003 = vst.msk [vmem:[#allocation2 + $0x80] sm:$0xff] %vm441_vm8, %v1000_v37  ;;  %v4123_v40 = vpack.c.bf16 %v1022_v39, %v1021_v38 }
 0x796   : > { %4124 = vmatpush3.bf16.msra.mxu1 %v4123_v40  ;;  %v1015_v41 = vpop.permute.xlu1 %1014  ;;  %v1010_v42 = vpop.permute.xlu0 %1009  ;;  %v1024_v45 = vld [vmem:[#allocation2 + $0x50] sm:$0xff] }
 0x797   : > { %4125 = vmatprep.subr.bf16.mxu1 %v4508_v0  ;;  %v1023_v43 = vld [vmem:[#allocation2 + $0x38] sm:$0xff]  ;;  %1018 = vst.msk [vmem:[#allocation2 + $0xc8] sm:$0xff] %vm462_vm9, %v1015_v41 }
 0x798   : > { %1013 = vst.msk [vmem:[#allocation2 + $0xb0] sm:$0xff] %vm455_vm10, %v1010_v42  ;;  %v4126_v46 = vpack.c.bf16 %v1024_v45, %v1023_v43 }
 0x79a   : > { %4127 = vmatpush3.bf16.msra.mxu1 %v4126_v46  ;;  %v1027_v49 = vld [vmem:[#allocation2 + $0x98] sm:$0xff] }
 0x79b   : > { %4128 = vmatprep.subr.bf16.mxu1 %v4508_v0  ;;  %v1026_v47 = vld [vmem:[#allocation2 + $0x80] sm:$0xff] }
 0x79c   : > { %v4362_v48 = vpack.c.bf16 %v1026_v47, %v972_v25 }
 0x79e   : > { %4363 = vmatpush3.bf16.msk.msra.mxu1 %vm4675_vm12, %v4362_v48  ;;  %v1029_v53 = vld [vmem:[#allocation2 + $0xc8] sm:$0xff] }
 0x79f   : > { %4131 = vmatprep.subr.bf16.mxu1 %v4508_v0  ;;  %v1028_v50 = vld [vmem:[#allocation2 + $0xb0] sm:$0xff] }
 0x7a0   : > { %v4132_v51 = vpack.c.bf16 %v1028_v50, %v1027_v49 }
 0x7a2   : > { %4133 = vmatpush3.bf16.msra.mxu1 %v4132_v51 }
 0x7a3   : > { %3701 = vmatprep.subr.mxu1 %v4513_v4 }
 0x7a6   : > { %3702 = vmatpush3.msra.mxu1 %v1029_v53 }
 0x7a7   : > { %3704 = vmatmul.mubr.msk.f32.vlgmr.msra.gmra.mrb[4].mxu1 %vm336_vm4, %v3303_v52  ;;  %3711 = vmatprep.subr.mxu1 %v4513_v4  ;;  %v1035_v54 = vpop.permute.xlu0 %1034  ;;  %v1115_v58 = vpop.permute.xlu1 %1114 }
 0x7a8   : > { %3713 = vmatprep.mubr.msk.f32.mxu1 %vm4512_vm0, %v4513_v4 }
 0x7ab   : > { %v1123_v60 = vpop.permute.xlu0 %1122  ;;  %v1349_v8 = vpop.permute.xlu1 %1348 }
 0x7af   : > { %v1455_v13 = vpop.permute.xlu0 %1454  ;;  %v1243_v20 = vpop.permute.xlu1 %1242 }
 0x7b3   : > { %v1133_v25 = vpop.permute.xlu0 %1132 }
 0x87a   : > { %v1106_v55 = vpop.f32.mrb[4].mxu1 }
 0x87b   : > { %v1107_v56 = vadd.f32 %v1106_v55, %v1035_v54  ;;  %v3705_v57 = vpop.f32.mrb[5].mxu1 }
 0x87d   : > { %v1117_v59 = vmul.f32 %v1115_v58, %v1107_v56 }
 0x87f   : > { %v1125_v61 = vadd.f32 %v1123_v60, %v1117_v59 }
 0x881   : > { %v1126_v62 = vmax.f32 %v4806_v26, %v1125_v61  ;;  %v3319_v61 = vld [vmem:[%s5478_s2 + $0x18] sm:$0xff] }
 0x883   : > { %3707 = vmatpush3.msk.msra.mxu0 %vm280_vm5, %v1126_v62  ;;  %3712 = vmatpush3.msk.msra.mxu1 %vm280_vm5, %v1126_v62 }
 0x884   : > { %3709 = vmatmul.mubr.msk.f32.vlgmr.msra.gmra.mrb[6].mxu0 %vm1135_vm13, %v1128_v63  ;;  %3714 = vmatmul.mubr.msk.f32.vlgmr.msra.gmra.mrb[6].mxu1 %vm1135_vm13, %v3310_v5 }
 0x885   : > { %3716 = vmatprep.subr.mxu0 %v4513_v4  ;;  %3721 = vmatprep.subr.mxu1 %v4513_v4 }
 0x886   : > { %3717 = vmatpush3.msk.msra.mxu0 %vm280_vm5, %v1126_v62  ;;  %3722 = vmatpush3.msk.msra.mxu1 %vm280_vm5, %v1126_v62 }
 0x887   : > { %3718 = vmatprep.mubr.msk.f32.mxu0 %vm4512_vm0, %v4513_v4  ;;  %3723 = vmatprep.mubr.msk.f32.mxu1 %vm4512_vm0, %v4513_v4 }
 0x888   : > { %3719 = vmatmul.mubr.msk.f32.vlgmr.msra.gmra.mrb[8].mxu0 %vm1135_vm13, %v3313_v6  ;;  %3724 = vmatmul.mubr.msk.f32.vlgmr.msra.gmra.mrb[8].mxu1 %vm1135_vm13, %v3316_v7 }
 0x889   : > { %4134 = vmatprep.subr.bf16.mxu0 %v4508_v0  ;;  %4146 = vmatprep.subr.bf16.mxu1 %v4508_v0 }
 0x88a   : > { %3744 = vmatprep.mubr.msk.f32.mxu0 %vm4512_vm0, %v4513_v4  ;;  %3765 = vmatprep.mubr.msk.f32.mxu1 %vm4512_vm0, %v4513_v4 }
 0x957   : > { %v1205_v9 = vpop.f32.mrb[6].mxu0  ;;  %v1314_v10 = vpop.f32.mrb[6].mxu1 }
 0x958   : > { %v3710_v11 = vpop.f32.mrb[7].mxu0  ;;  %v3715_v12 = vpop.f32.mrb[7].mxu1  ;;  %v4894_v22 = vadd.f32 %v1314_v10, %v1243_v20  ;;  %v4904_v26 = vadd.f32 %v1205_v9, %v1133_v25 }
 0x95a   : > { %v1318_v27 = vsel %vm280_vm5, %v4894_v22, 0.0  ;;  %v1209_v28 = vsel %vm280_vm5, %v4904_v26, 0.0  ;;  %v4365_v52 = vpack.c.bf16 %v4894_v22, %v4904_v26 }
 0x95b   : > { %v1420_v14 = vpop.f32.mrb[8].mxu0  ;;  %v1526_v15 = vpop.f32.mrb[8].mxu1 }
 0x95c   : > { %v4890_v16 = vadd.f32 %v1420_v14, %v1349_v8  ;;  %v4892_v17 = vadd.f32 %v1526_v15, %v1455_v13  ;;  %v3720_v18 = vpop.f32.mrb[9].mxu0  ;;  %v3725_v19 = vpop.f32.mrb[9].mxu1 }
 0x95e   : > { %v1424_v23 = vsel %vm280_vm5, %v4890_v16, 0.0  ;;  %v1530_v24 = vsel %vm280_vm5, %v4892_v17, 0.0  ;;  %v4378_v62 = vpack.c.bf16 %v4892_v17, %v4890_v16 }
 0x95f   : > { %1532 = vrot.lane.b32.xlu0 %v1530_v24, %s4511_s9  ;;  %1426 = vrot.lane.b32.xlu1 %v1424_v23, %s4509_s30 }
 0x963   : > { %1320 = vrot.lane.b32.xlu0 %v1318_v27, %s4510_s8  ;;  %1537 = vrot.lane.b32.xlu1 %v1530_v24, %s4509_s30 }
 0x967   : > { %1214 = vrot.lane.b32.xlu0 %v1209_v28, %s4516_s16  ;;  %1433 = vrot.lane.b32.xlu1 %v1424_v23, %s4514_s14 }
 0x96b   : > { %1440 = vrot.lane.b32.xlu0 %v1424_v23, %s4516_s16  ;;  %1544 = vrot.lane.b32.xlu1 %v1530_v24, %s4510_s8 }
 0x96f   : > { %1331 = vrot.lane.b32.xlu0 %v1318_v27, %s4515_s15  ;;  %1225 = vrot.lane.b32.xlu1 %v1209_v28, %s4518_s18 }
 0x973   : > { %1232 = vrot.lane.b32.xlu0 %v1209_v28, %s4517_s17  ;;  %1336 = vrot.lane.b32.xlu1 %v1318_v27, %s4518_s18 }
 0x9d1   : > { %v1533_v29 = vpop.permute.xlu0 %1532  ;;  %v1427_v30 = vpop.permute.xlu1 %1426 }
 0x9d2   : > { %1535 = vst.msk [vmem:[#allocation3 + $0x8] sm:$0xff] %vm311_vm3, %v1533_v29 }
 0x9d3   : > { %1429 = vst.msk [vmem:[#allocation3 + $0x20] sm:$0xff] %vm302_vm1, %v1427_v30  ;;  %1431 = vst.msk [vmem:[#allocation3 + $0xe0] sm:$0xff] %vm302_vm1, %v1427_v30 }
 0x9d5   : > { %v1321_v31 = vpop.permute.xlu0 %1320  ;;  %v1538_v32 = vpop.permute.xlu1 %1537 }
 0x9d6   : > { %1323 = vst.msk [vmem:[#allocation3 + $0x50] sm:$0xff] %vm293_vm2, %v1321_v31  ;;  %1327 = vst.msk [vmem:[#allocation3 + $0x1b8] sm:$0xff] %vm293_vm2, %v1321_v31 }
 0x9d7   : > { %1540 = vst.msk [vmem:[#allocation3 + $0x38] sm:$0xff] %vm302_vm1, %v1538_v32  ;;  %1542 = vst.msk [vmem:[#allocation3 + $0xf8] sm:$0xff] %vm302_vm1, %v1538_v32 }
 0x9d9   : > { %v1215_v33 = vpop.permute.xlu0 %1214  ;;  %v1434_v34 = vpop.permute.xlu1 %1433  ;;  %v1557_v35 = vld [vmem:[#allocation3 + $0x8] sm:$0xff] }
 0x9da   : > { %v1558_v36 = vld [vmem:[#allocation3 + $0x20] sm:$0xff]  ;;  %1218 = vst.msk [vmem:[#allocation3 + $0x158] sm:$0xff] %vm441_vm8, %v1215_v33  ;;  %1224 = vst.msk [vmem:[#allocation3 + $0x2c0] sm:$0xff] %vm441_vm8, %v1215_v33 }
 0x9db   : > { %1436 = vst.msk [vmem:[#allocation3 + $0x110] sm:$0xff] %vm426_vm6, %v1434_v34  ;;  %v4135_v37 = vpack.c.bf16 %v1558_v36, %v1557_v35  ;;  %v1640_v38 = vld [vmem:[#allocation3 + $0xe0] sm:$0xff]  ;;  %v3327_v34 = vld [vmem:[%s5480_s4 + $0x50] sm:$0xff]  ;;  %v3328_v35 = vld [vmem:[%s5480_s4 + $0x58] sm:$0xff] }
 0x9dc   : > { %v3325_v33 = vld [vmem:[%s5480_s4 + $0x48] sm:$0xff] }
 0x9dd   : > { %4136 = vmatpush3.bf16.msra.mxu0 %v4135_v37  ;;  %v1441_v39 = vpop.permute.xlu0 %1440  ;;  %v1545_v40 = vpop.permute.xlu1 %1544  ;;  %v1560_v42 = vld [vmem:[#allocation3 + $0x50] sm:$0xff]  ;;  %v1720_v60 = vld [vmem:[#allocation3 + $0x1b8] sm:$0xff] }
 0x9de   : > { %4137 = vmatprep.subr.bf16.mxu0 %v4508_v0  ;;  %v1559_v41 = vld [vmem:[#allocation3 + $0x38] sm:$0xff]  ;;  %1444 = vst.msk [vmem:[#allocation3 + $0x1a0] sm:$0xff] %vm441_vm8, %v1441_v39  ;;  %1448 = vst.msk [vmem:[#allocation3 + $0x308] sm:$0xff] %vm441_vm8, %v1441_v39  ;;  %v4381_v5 = vpack.c.bf16 %v4904_v26, %v1720_v60 }
 0x9df   : > { %v1641_v43 = vld [vmem:[#allocation3 + $0xf8] sm:$0xff]  ;;  %1547 = vst.msk [vmem:[#allocation3 + $0x98] sm:$0xff] %vm293_vm2, %v1545_v40  ;;  %1551 = vst.msk [vmem:[#allocation3 + $0x200] sm:$0xff] %vm293_vm2, %v1545_v40  ;;  %v4138_v45 = vpack.c.bf16 %v1560_v42, %v1559_v41 }
 0x9e0   : > { %v4147_v46 = vpack.c.bf16 %v1641_v43, %v1640_v38 }
 0x9e1   : > { %4139 = vmatpush3.bf16.msra.mxu0 %v4138_v45  ;;  %v1332_v47 = vpop.permute.xlu0 %1331  ;;  %v1226_v48 = vpop.permute.xlu1 %1225  ;;  %v1645_v50 = vld [vmem:[#allocation3 + $0x158] sm:$0xff]  ;;  %v1802_v7 = vld [vmem:[#allocation3 + $0x2c0] sm:$0xff] }
 0x9e2   : > { %4148 = vmatpush3.bf16.msra.mxu1 %v4147_v46  ;;  %4140 = vmatprep.subr.bf16.mxu0 %v4508_v0  ;;  %v1642_v49 = vld [vmem:[#allocation3 + $0x110] sm:$0xff]  ;;  %1335 = vst.msk [vmem:[#allocation3 + $0x248] sm:$0xff] %vm448_vm7, %v1332_v47  ;;  %v4374_v59 = vpack.c.bf16 %v1645_v50, %v4894_v22  ;;  %v4393_v12 = vpack.c.bf16 %v4890_v16, %v1802_v7 }
 0x9e3   : > { %4149 = vmatprep.subr.bf16.mxu1 %v4508_v0  ;;  %1229 = vst.msk [vmem:[#allocation3 + $0x260] sm:$0xff] %vm455_vm10, %v1226_v48  ;;  %1231 = vst.msk [vmem:[#allocation3 + $0x320] sm:$0xff] %vm455_vm10, %v1226_v48  ;;  %v4368_v54 = vpack.c.bf16 %v4904_v26, %v1642_v49 }
 0x9e5   : > { %4366 = vmatpush3.bf16.msk.msra.mxu0 %vm4945_vm14, %v4365_v52  ;;  %v1233_v55 = vpop.permute.xlu0 %1232  ;;  %v1337_v56 = vpop.permute.xlu1 %1336  ;;  %v1648_v6 = vld [vmem:[#allocation3 + $0x1a0] sm:$0xff]  ;;  %v1805_v11 = vld [vmem:[#allocation3 + $0x308] sm:$0xff] }
 0x9e6   : > { %4369 = vmatpush3.bf16.msk.msra.mxu1 %vm4956_vm15, %v4368_v54  ;;  %4143 = vmatprep.subr.bf16.mxu0 %v4508_v0  ;;  %v1563_v57 = vld [vmem:[#allocation3 + $0x98] sm:$0xff]  ;;  %1236 = vst.msk [vmem:[#allocation3 + $0x350] sm:$0xff] %vm462_vm9, %v1233_v55  ;;  %v1723_v63 = vld [vmem:[#allocation3 + $0x200] sm:$0xff]  ;;  %v4396_v15 = vpack.c.bf16 %v1805_v11, %v4892_v17 }
 0x9e7   : > { %4152 = vmatprep.subr.bf16.mxu1 %v4508_v0  ;;  %1340 = vst.msk [vmem:[#allocation3 + $0x278] sm:$0xff] %vm455_vm10, %v1337_v56  ;;  %1342 = vst.msk [vmem:[#allocation3 + $0x338] sm:$0xff] %vm455_vm10, %v1337_v56  ;;  %v4371_v58 = vpack.c.bf16 %v4890_v16, %v1563_v57  ;;  %v4384_v8 = vpack.c.bf16 %v1723_v63, %v4894_v22 }
 0x9e9   : > { %4372 = vmatpush3.bf16.msk.msra.mxu0 %vm4956_vm15, %v4371_v58  ;;  %v1726_v9 = vld [vmem:[#allocation3 + $0x248] sm:$0xff] }
 0x9ea   : > { %4375 = vmatpush3.bf16.msk.msra.mxu1 %vm4675_vm12, %v4374_v59  ;;  %3742 = vmatprep.subr.mxu0 %v4513_v4  ;;  %v1727_v10 = vld [vmem:[#allocation3 + $0x260] sm:$0xff] }
 0x9eb   : > { %4155 = vmatprep.subr.bf16.mxu1 %v4508_v0  ;;  %v4168_v13 = vpack.c.bf16 %v1727_v10, %v1726_v9  ;;  %v1806_v16 = vld [vmem:[#allocation3 + $0x320] sm:$0xff]  ;;  %v3324_v9 = vld [vmem:[%s5479_s3 + $0x18] sm:$0xff] }
 0x9ed   : > { %4376 = vmatpush3.msk.msra.mxu0 %vm280_vm5, %v4892_v17  ;;  %v1808_v17 = vld [vmem:[#allocation3 + $0x350] sm:$0xff] }
 0x9ee   : > { %4379 = vmatpush3.bf16.msk.msra.mxu1 %vm4945_vm14, %v4378_v62  ;;  %4158 = vmatprep.subr.bf16.mxu0 %v4508_v0  ;;  %v1807_v14 = vld [vmem:[#allocation3 + $0x338] sm:$0xff] }
 0x9ef   : > { %3745 = vmatmul.mubr.msk.f32.vlgmr.msra.gmra.mrb[10].mxu0 %vm336_vm4, %v3319_v61  ;;  %3763 = vmatprep.subr.mxu1 %v4513_v4  ;;  %v4180_v18 = vpack.c.bf16 %v1807_v14, %v1806_v16  ;;  %v1728_v19 = vld [vmem:[#allocation3 + $0x278] sm:$0xff] }
 0x9f0   : > { %4382 = vmatpush3.bf16.msk.msra.mxu0 %vm4956_vm15, %v4381_v5  ;;  %3786 = vmatprep.mubr.msk.f32.mxu0 %vm4512_vm0, %v4513_v4 }
 0x9f1   : > { %4161 = vmatprep.subr.bf16.mxu0 %v4508_v0 }
 0x9f2   : > { %3764 = vmatpush3.msra.mxu1 %v1648_v6 }
 0x9f3   : > { %3766 = vmatmul.mubr.msk.f32.vlgmr.msra.gmra.mrb[10].mxu1 %vm336_vm4, %v3319_v61  ;;  %4170 = vmatprep.subr.bf16.mxu1 %v4508_v0 }
 0x9f4   : > { %4385 = vmatpush3.bf16.msk.msra.mxu0 %vm4675_vm12, %v4384_v8  ;;  %4388 = vmatpush3.bf16.msk.msra.mxu1 %vm4945_vm14, %v4365_v52 }
 0x9f5   : > { %4164 = vmatprep.subr.bf16.mxu0 %v4508_v0  ;;  %4173 = vmatprep.subr.bf16.mxu1 %v4508_v0 }
 0x9f6   : > { %3807 = vmatprep.mubr.msk.f32.mxu1 %vm4512_vm0, %v4513_v4 }
 0x9f8   : > { %4391 = vmatpush3.bf16.msk.msra.mxu0 %vm4945_vm14, %v4378_v62  ;;  %4394 = vmatpush3.bf16.msk.msra.mxu1 %vm4956_vm15, %v4393_v12 }
 0x9f9   : > { %4167 = vmatprep.subr.bf16.mxu0 %v4508_v0  ;;  %4176 = vmatprep.subr.bf16.mxu1 %v4508_v0 }
 0x9fc   : > { %4169 = vmatpush3.bf16.msra.mxu0 %v4168_v13  ;;  %4397 = vmatpush3.bf16.msk.msra.mxu1 %vm4675_vm12, %v4396_v15 }
 0x9fd   : > { %3784 = vmatprep.subr.mxu0 %v4513_v4  ;;  %4179 = vmatprep.subr.bf16.mxu1 %v4508_v0 }
 0xa00   : > { %3785 = vmatpush3.msra.mxu0 %v1728_v19  ;;  %4181 = vmatpush3.bf16.msra.mxu1 %v4180_v18 }
 0xa01   : > { %3787 = vmatmul.mubr.msk.f32.vlgmr.msra.gmra.mrb[12].mxu0 %vm336_vm4, %v3319_v61  ;;  %3805 = vmatprep.subr.mxu1 %v4513_v4 }
 0xa02   : > { %4182 = vmatprep.subr.bf16.mxu0 %v4508_v0  ;;  %3828 = vmatprep.mubr.msk.f32.mxu0 %vm4512_vm0, %v4513_v4 }
 0xa04   : > { %3806 = vmatpush3.msra.mxu1 %v1808_v17 }
 0xa05   : > { %3808 = vmatmul.mubr.msk.f32.vlgmr.msra.gmra.mrb[12].mxu1 %vm336_vm4, %v3319_v61  ;;  %4194 = vmatprep.subr.bf16.mxu1 %v4508_v0 }
 0xa06   : > { %3849 = vmatprep.mubr.msk.f32.mxu1 %vm4512_vm0, %v4513_v4 }
 0xac2   : > { %v5027_v20 = vpop.f32.mrb[10].mxu0 }
 0xac3   : > { %v3746_v22 = vpop.f32.mrb[11].mxu0  ;;  %v5063_v32 = vsel %vm280_vm5, %v5027_v20, 0.0 }
 0xac6   : > { %v5029_v23 = vpop.f32.mrb[10].mxu1 }
 0xac7   : > { %v3767_v24 = vpop.f32.mrb[11].mxu1  ;;  %v5054_v31 = vsel %vm280_vm5, %v5029_v23, 0.0  ;;  %v4402_v63 = vpack.c.bf16 %v5029_v23, %v5027_v20 }
 0xad4   : > { %v5031_v25 = vpop.f32.mrb[12].mxu0 }
 0xad5   : > { %v5036_v26 = vsel %vm280_vm5, %v5031_v25, 0.0  ;;  %v3788_v27 = vpop.f32.mrb[13].mxu0 }
 0xad6   : > { %1932 = vrot.lane.b32.xlu1 %v5036_v26, %s4509_s30 }
 0xad8   : > { %v5040_v28 = vpop.f32.mrb[12].mxu1 }
 0xad9   : > { %v5045_v29 = vsel %vm280_vm5, %v5040_v28, 0.0  ;;  %v3809_v30 = vpop.f32.mrb[13].mxu1  ;;  %v4411_v8 = vpack.c.bf16 %v5040_v28, %v5031_v25 }
 0xada   : > { %1956 = vrot.lane.b32.xlu0 %v5045_v29, %s4511_s9  ;;  %1961 = vrot.lane.b32.xlu1 %v5045_v29, %s4509_s30 }
 0xade   : > { %1908 = vrot.lane.b32.xlu0 %v5054_v31, %s4510_s8  ;;  %1939 = vrot.lane.b32.xlu1 %v5036_v26, %s4514_s14 }
 0xae2   : > { %1884 = vrot.lane.b32.xlu0 %v5063_v32, %s4516_s16  ;;  %1968 = vrot.lane.b32.xlu1 %v5045_v29, %s4510_s8 }
 0xae6   : > { %1946 = vrot.lane.b32.xlu0 %v5036_v26, %s4516_s16  ;;  %1895 = vrot.lane.b32.xlu1 %v5063_v32, %s4518_s18 }
 0xaea   : > { %1919 = vrot.lane.b32.xlu0 %v5054_v31, %s4515_s15  ;;  %1924 = vrot.lane.b32.xlu1 %v5054_v31, %s4518_s18 }
 0xaee   : > { %1902 = vrot.lane.b32.xlu0 %v5063_v32, %s4517_s17  ;;  %1994 = vperm.xlu1 %4346, %v3325_v33  }
 0xaf2   : > { %2074 = vperm.xlu0 %4347, %v3327_v34   ;;  %2082 = vperm.xlu1 %4346, %v3328_v35  }
 0xb48   : > { %v1933_v36 = vpop.permute.xlu1 %1932 }
 0xb49   : > { %1935 = vst.msk [vmem:[#allocation4 + $0x20] sm:$0xff] %vm302_vm1, %v1933_v36  ;;  %1937 = vst.msk [vmem:[#allocation4 + $0xe0] sm:$0xff] %vm302_vm1, %v1933_v36 }
 0xb4c   : > { %v1957_v37 = vpop.permute.xlu0 %1956  ;;  %v1962_v38 = vpop.permute.xlu1 %1961 }
 0xb4d   : > { %1959 = vst.msk [vmem:[#allocation4 + $0x8] sm:$0xff] %vm311_vm3, %v1957_v37 }
 0xb4e   : > { %1964 = vst.msk [vmem:[#allocation4 + $0x38] sm:$0xff] %vm302_vm1, %v1962_v38  ;;  %1966 = vst.msk [vmem:[#allocation4 + $0xf8] sm:$0xff] %vm302_vm1, %v1962_v38 }
 0xb50   : > { %v1909_v39 = vpop.permute.xlu0 %1908  ;;  %v1940_v40 = vpop.permute.xlu1 %1939  ;;  %v1982_v41 = vld [vmem:[#allocation4 + $0x20] sm:$0xff] }
 0xb51   : > { %1911 = vst.msk [vmem:[#allocation4 + $0x50] sm:$0xff] %vm293_vm2, %v1909_v39  ;;  %1915 = vst.msk [vmem:[#allocation4 + $0x1b8] sm:$0xff] %vm293_vm2, %v1909_v39  ;;  %v2088_v46 = vld [vmem:[#allocation4 + $0xe0] sm:$0xff] }
 0xb52   : > { %1942 = vst.msk [vmem:[#allocation4 + $0x110] sm:$0xff] %vm426_vm6, %v1940_v40 }
 0xb54   : > { %v1885_v42 = vpop.permute.xlu0 %1884  ;;  %v1969_v43 = vpop.permute.xlu1 %1968  ;;  %v1981_v45 = vld [vmem:[#allocation4 + $0x8] sm:$0xff] }
 0xb55   : > { %v2089_v47 = vld [vmem:[#allocation4 + $0xf8] sm:$0xff]  ;;  %1888 = vst.msk [vmem:[#allocation4 + $0x158] sm:$0xff] %vm441_vm8, %v1885_v42  ;;  %1894 = vst.msk [vmem:[#allocation4 + $0x2c0] sm:$0xff] %vm441_vm8, %v1885_v42  ;;  %v4183_v48 = vpack.c.bf16 %v1982_v41, %v1981_v45 }
 0xb56   : > { %1971 = vst.msk [vmem:[#allocation4 + $0x98] sm:$0xff] %vm293_vm2, %v1969_v43  ;;  %1975 = vst.msk [vmem:[#allocation4 + $0x200] sm:$0xff] %vm293_vm2, %v1969_v43  ;;  %v4195_v49 = vpack.c.bf16 %v2089_v47, %v2088_v46  ;;  %v1983_v54 = vld [vmem:[#allocation4 + $0x38] sm:$0xff] }
 0xb57   : > { %4184 = vmatpush3.bf16.msra.mxu0 %v4183_v48 }
 0xb58   : > { %4196 = vmatpush3.bf16.msra.mxu1 %v4195_v49  ;;  %v1947_v50 = vpop.permute.xlu0 %1946  ;;  %v1896_v52 = vpop.permute.xlu1 %1895  ;;  %4185 = vmatprep.subr.bf16.mxu0 %v4508_v0  ;;  %v1984_v55 = vld [vmem:[#allocation4 + $0x50] sm:$0xff]  ;;  %v2171_v10 = vld [vmem:[#allocation4 + $0x1b8] sm:$0xff] }
 0xb59   : > { %4197 = vmatprep.subr.bf16.mxu1 %v4508_v0  ;;  %v2090_v56 = vld [vmem:[#allocation4 + $0x110] sm:$0xff]  ;;  %1950 = vst.msk [vmem:[#allocation4 + $0x1a0] sm:$0xff] %vm441_vm8, %v1947_v50  ;;  %1954 = vst.msk [vmem:[#allocation4 + $0x308] sm:$0xff] %vm441_vm8, %v1947_v50  ;;  %v4186_v57 = vpack.c.bf16 %v1984_v55, %v1983_v54  ;;  %v4415_v14 = vpack.c.bf16 %v5027_v20, %v2171_v10 }
 0xb5a   : > { %1899 = vst.msk [vmem:[#allocation4 + $0x260] sm:$0xff] %vm455_vm10, %v1896_v52  ;;  %1901 = vst.msk [vmem:[#allocation4 + $0x320] sm:$0xff] %vm455_vm10, %v1896_v52  ;;  %v4399_v58 = vpack.c.bf16 %v5027_v20, %v2090_v56 }
 0xb5b   : > { %4187 = vmatpush3.bf16.msra.mxu0 %v4186_v57 }
 0xb5c   : > { %4400 = vmatpush3.bf16.msk.msra.mxu1 %vm4956_vm15, %v4399_v58  ;;  %v1920_v59 = vpop.permute.xlu0 %1919  ;;  %v1925_v60 = vpop.permute.xlu1 %1924  ;;  %4188 = vmatprep.subr.bf16.mxu0 %v4508_v0  ;;  %v2093_v61 = vld [vmem:[#allocation4 + $0x158] sm:$0xff]  ;;  %v2256_v13 = vld [vmem:[#allocation4 + $0x2c0] sm:$0xff] }
 0xb5d   : > { %4200 = vmatprep.subr.bf16.mxu1 %v4508_v0  ;;  %1923 = vst.msk [vmem:[#allocation4 + $0x248] sm:$0xff] %vm448_vm7, %v1920_v59  ;;  %v1987_v62 = vld [vmem:[#allocation4 + $0x98] sm:$0xff]  ;;  %v4405_v5 = vpack.c.bf16 %v2093_v61, %v5029_v23  ;;  %v2174_v12 = vld [vmem:[#allocation4 + $0x200] sm:$0xff]  ;;  %v4424_v18 = vpack.c.bf16 %v5031_v25, %v2256_v13 }
 0xb5e   : > { %1928 = vst.msk [vmem:[#allocation4 + $0x278] sm:$0xff] %vm455_vm10, %v1925_v60  ;;  %1930 = vst.msk [vmem:[#allocation4 + $0x338] sm:$0xff] %vm455_vm10, %v1925_v60  ;;  %v4408_v7 = vpack.c.bf16 %v5031_v25, %v1987_v62  ;;  %v4421_v16 = vpack.c.bf16 %v2174_v12, %v5029_v23 }
 0xb5f   : > { %4403 = vmatpush3.bf16.msk.msra.mxu0 %vm4945_vm14, %v4402_v63 }
 0xb60   : > { %4406 = vmatpush3.bf16.msk.msra.mxu1 %vm4675_vm12, %v4405_v5  ;;  %v1903_v6 = vpop.permute.xlu0 %1902  ;;  %4191 = vmatprep.subr.bf16.mxu0 %v4508_v0  ;;  %v2096_v11 = vld [vmem:[#allocation4 + $0x1a0] sm:$0xff]  ;;  %v2259_v15 = vld [vmem:[#allocation4 + $0x308] sm:$0xff] }
 0xb61   : > { %4203 = vmatprep.subr.bf16.mxu1 %v4508_v0  ;;  %1906 = vst.msk [vmem:[#allocation4 + $0x350] sm:$0xff] %vm462_vm9, %v1903_v6  ;;  %v4430_v20 = vpack.c.bf16 %v2259_v15, %v5040_v28  ;;  %v2178_v22 = vld [vmem:[#allocation4 + $0x260] sm:$0xff] }
 0xb62   : > { %v2260_v23 = vld [vmem:[#allocation4 + $0x320] sm:$0xff] }
 0xb63   : > { %4409 = vmatpush3.bf16.msk.msra.mxu0 %vm4956_vm15, %v4408_v7 }
 0xb64   : > { %4412 = vmatpush3.bf16.msk.msra.mxu1 %vm4945_vm14, %v4411_v8  ;;  %3826 = vmatprep.subr.mxu0 %v4513_v4  ;;  %v2177_v19 = vld [vmem:[#allocation4 + $0x248] sm:$0xff] }
 0xb65   : > { %3847 = vmatprep.subr.mxu1 %v4513_v4  ;;  %v2261_v17 = vld [vmem:[#allocation4 + $0x338] sm:$0xff]  ;;  %v4216_v24 = vpack.c.bf16 %v2178_v22, %v2177_v19 }
 0xb66   : > { %v4228_v25 = vpack.c.bf16 %v2261_v17, %v2260_v23  ;;  %v2179_v27 = vld [vmem:[#allocation4 + $0x278] sm:$0xff] }
 0xb67   : > { %4413 = vmatpush3.msk.msra.mxu0 %vm280_vm5, %v5040_v28 }
 0xb68   : > { %3848 = vmatpush3.msra.mxu1 %v2096_v11  ;;  %3829 = vmatmul.mubr.msk.f32.vlgmr.msra.gmra.mrb[14].mxu0 %vm336_vm4, %v3324_v9  ;;  %v2262_v30 = vld [vmem:[#allocation4 + $0x350] sm:$0xff] }
 0xb69   : > { %3850 = vmatmul.mubr.msk.f32.vlgmr.msra.gmra.mrb[14].mxu1 %vm336_vm4, %v3324_v9  ;;  %4206 = vmatprep.subr.bf16.mxu0 %v4508_v0 }
 0xb6a   : > { %4218 = vmatprep.subr.bf16.mxu1 %v4508_v0  ;;  %4416 = vmatpush3.bf16.msk.msra.mxu0 %vm4956_vm15, %v4415_v14 }
 0xb6b   : > { %4419 = vmatpush3.bf16.msk.msra.mxu1 %vm4945_vm14, %v4402_v63  ;;  %4209 = vmatprep.subr.bf16.mxu0 %v4508_v0 }
 0xb6c   : > { %4221 = vmatprep.subr.bf16.mxu1 %v4508_v0  ;;  %3870 = vmatprep.mubr.msk.f32.mxu0 %vm4512_vm0, %v4513_v4 }
 0xb6d   : > { %3891 = vmatprep.mubr.msk.f32.mxu1 %vm4512_vm0, %v4513_v4  ;;  %v1995_v28 = vpop.permute.xlu1 %1994 }
 0xb6e   : > { %4422 = vmatpush3.bf16.msk.msra.mxu0 %vm4675_vm12, %v4421_v16 }
 0xb6f   : > { %4425 = vmatpush3.bf16.msk.msra.mxu1 %vm4956_vm15, %v4424_v18  ;;  %4212 = vmatprep.subr.bf16.mxu0 %v4508_v0 }
 0xb70   : > { %4224 = vmatprep.subr.bf16.mxu1 %v4508_v0 }
 0xb71   : > { %v2075_v39 = vpop.permute.xlu0 %2074  ;;  %v2083_v42 = vpop.permute.xlu1 %2082 }
 0xb72   : > { %4428 = vmatpush3.bf16.msk.msra.mxu0 %vm4945_vm14, %v4411_v8 }
 0xb73   : > { %4431 = vmatpush3.bf16.msk.msra.mxu1 %vm4675_vm12, %v4430_v20  ;;  %4215 = vmatprep.subr.bf16.mxu0 %v4508_v0 }
 0xb74   : > { %4227 = vmatprep.subr.bf16.mxu1 %v4508_v0 }
 0xb76   : > { %4217 = vmatpush3.bf16.msra.mxu0 %v4216_v24 }
 0xb77   : > { %4229 = vmatpush3.bf16.msra.mxu1 %v4228_v25  ;;  %3868 = vmatprep.subr.mxu0 %v4513_v4 }
 0xb78   : > { %3889 = vmatprep.subr.mxu1 %v4513_v4 }
 0xb7a   : > { %3869 = vmatpush3.msra.mxu0 %v2179_v27 }
 0xb7b   : > { %3890 = vmatpush3.msra.mxu1 %v2262_v30  ;;  %3871 = vmatmul.mubr.msk.f32.vlgmr.msra.gmra.mrb[16].mxu0 %vm336_vm4, %v3324_v9 }
 0xb7c   : > { %3892 = vmatmul.mubr.msk.f32.vlgmr.msra.gmra.mrb[16].mxu1 %vm336_vm4, %v3324_v9  ;;  %4230 = vmatprep.subr.bf16.mxu0 %v4508_v0 }
 0xb7d   : > { %4242 = vmatprep.subr.bf16.mxu1 %v4508_v0  ;;  %3912 = vmatprep.mubr.msk.f32.mxu0 %vm4512_vm0, %v4513_v4 }
 0xb7e   : > { %3933 = vmatprep.mubr.msk.f32.mxu1 %vm4512_vm0, %v4513_v4 }
 0xc3b   : > { %v2066_v33 = vpop.f32.mrb[14].mxu0 }
 0xc3c   : > { %v2163_v34 = vpop.f32.mrb[14].mxu1  ;;  %v2067_v35 = vadd.f32 %v2066_v33, %v1995_v28  ;;  %v3830_v37 = vpop.f32.mrb[15].mxu0 }
 0xc3d   : > { %v2164_v36 = vadd.f32 %v2163_v34, %v1995_v28  ;;  %v3851_v38 = vpop.f32.mrb[15].mxu1  ;;  %v3332_v37 = vld [vmem:[%s5478_s2 + $0x20] sm:$0xff] }
 0xc3e   : > { %v2077_v40 = vmul.f32 %v2075_v39, %v2067_v35 }
 0xc3f   : > { %v2167_v41 = vmul.f32 %v2164_v36, %v2075_v39 }
 0xc40   : > { %v2085_v43 = vadd.f32 %v2083_v42, %v2077_v40 }
 0xc41   : > { %v2168_v45 = vadd.f32 %v2167_v41, %v2083_v42 }
 0xc42   : > { %v5180_v46 = vmax.f32 %v5063_v32, %v2085_v43 }
 0xc43   : > { %v5183_v47 = vmax.f32 %v5054_v31, %v2168_v45 }
 0xc44   : > { %v2087_v48 = vsel %vm280_vm5, %v5180_v46, 0.0 }
 0xc45   : > { %v2170_v49 = vsel %vm280_vm5, %v5183_v47, 0.0  ;;  %v4433_v25 = vpack.c.bf16 %v5183_v47, %v5180_v46 }
 0xc4e   : > { %v2246_v50 = vpop.f32.mrb[16].mxu0 }
 0xc4f   : > { %v2329_v52 = vpop.f32.mrb[16].mxu1  ;;  %v2247_v54 = vadd.f32 %v2246_v50, %v1995_v28  ;;  %v3872_v56 = vpop.f32.mrb[17].mxu0 }
 0xc50   : > { %v2330_v55 = vadd.f32 %v2329_v52, %v1995_v28  ;;  %v3893_v57 = vpop.f32.mrb[17].mxu1 }
 0xc51   : > { %v2250_v58 = vmul.f32 %v2247_v54, %v2075_v39 }
 0xc52   : > { %v2333_v32 = vmul.f32 %v2330_v55, %v2075_v39 }
 0xc53   : > { %v2251_v59 = vadd.f32 %v2250_v58, %v2083_v42 }
 0xc54   : > { %v2334_v60 = vadd.f32 %v2333_v32, %v2083_v42 }
 0xc55   : > { %v5192_v31 = vmax.f32 %v5036_v26, %v2251_v59 }
 0xc56   : > { %v5195_v61 = vmax.f32 %v5045_v29, %v2334_v60 }
 0xc57   : > { %v2253_v62 = vsel %vm280_vm5, %v5192_v31, 0.0 }
 0xc58   : > { %v2336_v63 = vsel %vm280_vm5, %v5195_v61, 0.0  ;;  %2386 = vrot.lane.b32.xlu0 %v2253_v62, %s4509_s30  ;;  %v4446_v38 = vpack.c.bf16 %v5195_v61, %v5192_v31 }
 0xc59   : > { %2410 = vrot.lane.b32.xlu1 %v2336_v63, %s4511_s9 }
 0xc5c   : > { %2415 = vrot.lane.b32.xlu0 %v2336_v63, %s4509_s30 }
 0xc5d   : > { %2362 = vrot.lane.b32.xlu1 %v2170_v49, %s4510_s8 }
 0xc60   : > { %2393 = vrot.lane.b32.xlu0 %v2253_v62, %s4514_s14 }
 0xc61   : > { %2340 = vrot.lane.b32.xlu1 %v2087_v48, %s4516_s16 }
 0xc64   : > { %2422 = vrot.lane.b32.xlu0 %v2336_v63, %s4510_s8 }
 0xc65   : > { %2400 = vrot.lane.b32.xlu1 %v2253_v62, %s4516_s16 }
 0xc68   : > { %2349 = vrot.lane.b32.xlu0 %v2087_v48, %s4518_s18 }
 0xc69   : > { %2373 = vrot.lane.b32.xlu1 %v2170_v49, %s4515_s15 }
 0xc6c   : > { %2378 = vrot.lane.b32.xlu0 %v2170_v49, %s4518_s18 }
 0xc6d   : > { %2356 = vrot.lane.b32.xlu1 %v2087_v48, %s4517_s17 }
 0xcca   : > { %v2387_v29 = vpop.permute.xlu0 %2386 }
 0xccb   : > { %v2411_v26 = vpop.permute.xlu1 %2410  ;;  %2389 = vst.msk [vmem:[#allocation4 + $0x20] sm:$0xff] %vm302_vm1, %v2387_v29  ;;  %2391 = vst.msk [vmem:[#allocation4 + $0xe0] sm:$0xff] %vm302_vm1, %v2387_v29 }
 0xccc   : > { %2413 = vst.msk [vmem:[#allocation4 + $0x8] sm:$0xff] %vm311_vm3, %v2411_v26 }
 0xcce   : > { %v2416_v6 = vpop.permute.xlu0 %2415 }
 0xccf   : > { %v2363_v5 = vpop.permute.xlu1 %2362  ;;  %2418 = vst.msk [vmem:[#allocation4 + $0x38] sm:$0xff] %vm302_vm1, %v2416_v6  ;;  %2420 = vst.msk [vmem:[#allocation4 + $0xf8] sm:$0xff] %vm302_vm1, %v2416_v6 }
 0xcd0   : > { %2365 = vst.msk [vmem:[#allocation4 + $0x50] sm:$0xff] %vm293_vm2, %v2363_v5  ;;  %2369 = vst.msk [vmem:[#allocation4 + $0x1b8] sm:$0xff] %vm293_vm2, %v2363_v5 }
 0xcd2   : > { %v2394_v8 = vpop.permute.xlu0 %2393  ;;  %v2436_v10 = vld [vmem:[#allocation4 + $0x20] sm:$0xff] }
 0xcd3   : > { %v2341_v7 = vpop.permute.xlu1 %2340  ;;  %v2435_v9 = vld [vmem:[#allocation4 + $0x8] sm:$0xff]  ;;  %2396 = vst.msk [vmem:[#allocation4 + $0x110] sm:$0xff] %vm426_vm6, %v2394_v8  ;;  %v2518_v12 = vld [vmem:[#allocation4 + $0xe0] sm:$0xff] }
 0xcd4   : > { %2344 = vst.msk [vmem:[#allocation4 + $0x158] sm:$0xff] %vm441_vm8, %v2341_v7  ;;  %2348 = vst.msk [vmem:[#allocation4 + $0x2c0] sm:$0xff] %vm441_vm8, %v2341_v7  ;;  %v4231_v11 = vpack.c.bf16 %v2436_v10, %v2435_v9  ;;  %v3338_v7 = vld [vmem:[%s5480_s4 + $0x60] sm:$0xff]  ;;  %v3340_v8 = vld [vmem:[%s5480_s4 + $0x68] sm:$0xff] }
 0xcd5   : > { %v3341_v9 = vld [vmem:[%s5480_s4 + $0x70] sm:$0xff] }
 0xcd6   : > { %4232 = vmatpush3.bf16.msra.mxu0 %v4231_v11  ;;  %v2423_v14 = vpop.permute.xlu0 %2422  ;;  %v2437_v15 = vld [vmem:[#allocation4 + $0x38] sm:$0xff] }
 0xcd7   : > { %v2401_v13 = vpop.permute.xlu1 %2400  ;;  %4233 = vmatprep.subr.bf16.mxu0 %v4508_v0  ;;  %v2438_v16 = vld [vmem:[#allocation4 + $0x50] sm:$0xff]  ;;  %v2519_v18 = vld [vmem:[#allocation4 + $0xf8] sm:$0xff]  ;;  %2425 = vst.msk [vmem:[#allocation4 + $0x98] sm:$0xff] %vm293_vm2, %v2423_v14  ;;  %2429 = vst.msk [vmem:[#allocation4 + $0x200] sm:$0xff] %vm293_vm2, %v2423_v14 }
 0xcd8   : > { %2404 = vst.msk [vmem:[#allocation4 + $0x1a0] sm:$0xff] %vm441_vm8, %v2401_v13  ;;  %2408 = vst.msk [vmem:[#allocation4 + $0x308] sm:$0xff] %vm441_vm8, %v2401_v13  ;;  %v4234_v19 = vpack.c.bf16 %v2438_v16, %v2437_v15  ;;  %v4243_v17 = vpack.c.bf16 %v2519_v18, %v2518_v12  ;;  %v2598_v36 = vld [vmem:[#allocation4 + $0x1b8] sm:$0xff] }
 0xcd9   : > { %v4449_v40 = vpack.c.bf16 %v5180_v46, %v2598_v36 }
 0xcda   : > { %4235 = vmatpush3.bf16.msra.mxu0 %v4234_v19  ;;  %4244 = vmatpush3.bf16.msra.mxu1 %v4243_v17  ;;  %v2350_v22 = vpop.permute.xlu0 %2349  ;;  %v2520_v23 = vld [vmem:[#allocation4 + $0x110] sm:$0xff] }
 0xcdb   : > { %v2374_v20 = vpop.permute.xlu1 %2373  ;;  %4236 = vmatprep.subr.bf16.mxu0 %v4508_v0  ;;  %4245 = vmatprep.subr.bf16.mxu1 %v4508_v0  ;;  %2353 = vst.msk [vmem:[#allocation4 + $0x260] sm:$0xff] %vm455_vm10, %v2350_v22  ;;  %2355 = vst.msk [vmem:[#allocation4 + $0x320] sm:$0xff] %vm455_vm10, %v2350_v22  ;;  %v2523_v24 = vld [vmem:[#allocation4 + $0x158] sm:$0xff]  ;;  %v4436_v27 = vpack.c.bf16 %v5180_v46, %v2520_v23  ;;  %v2680_v42 = vld [vmem:[#allocation4 + $0x2c0] sm:$0xff] }
 0xcdc   : > { %2377 = vst.msk [vmem:[#allocation4 + $0x248] sm:$0xff] %vm448_vm7, %v2374_v20  ;;  %v4442_v35 = vpack.c.bf16 %v2523_v24, %v5183_v47 }
 0xcde   : > { %4434 = vmatpush3.bf16.msk.msra.mxu0 %vm4945_vm14, %v4433_v25  ;;  %4437 = vmatpush3.bf16.msk.msra.mxu1 %vm4956_vm15, %v4436_v27  ;;  %v2379_v28 = vpop.permute.xlu0 %2378  ;;  %v2441_v33 = vld [vmem:[#allocation4 + $0x98] sm:$0xff]  ;;  %v2601_v39 = vld [vmem:[#allocation4 + $0x200] sm:$0xff] }
 0xcdf   : > { %v2357_v30 = vpop.permute.xlu1 %2356  ;;  %4239 = vmatprep.subr.bf16.mxu0 %v4508_v0  ;;  %4248 = vmatprep.subr.bf16.mxu1 %v4508_v0  ;;  %2382 = vst.msk [vmem:[#allocation4 + $0x278] sm:$0xff] %vm455_vm10, %v2379_v28  ;;  %2384 = vst.msk [vmem:[#allocation4 + $0x338] sm:$0xff] %vm455_vm10, %v2379_v28  ;;  %v4439_v34 = vpack.c.bf16 %v5192_v31, %v2441_v33  ;;  %v2526_v41 = vld [vmem:[#allocation4 + $0x1a0] sm:$0xff]  ;;  %v4452_v43 = vpack.c.bf16 %v2601_v39, %v5183_v47  ;;  %v2683_v48 = vld [vmem:[#allocation4 + $0x308] sm:$0xff] }
 0xce0   : > { %2360 = vst.msk [vmem:[#allocation4 + $0x350] sm:$0xff] %vm462_vm9, %v2357_v30  ;;  %v4461_v47 = vpack.c.bf16 %v5192_v31, %v2680_v42  ;;  %v4464_v52 = vpack.c.bf16 %v2683_v48, %v5195_v61 }
 0xce2   : > { %4440 = vmatpush3.bf16.msk.msra.mxu0 %vm4956_vm15, %v4439_v34  ;;  %4443 = vmatpush3.bf16.msk.msra.mxu1 %vm4675_vm12, %v4442_v35  ;;  %v2605_v46 = vld [vmem:[#allocation4 + $0x260] sm:$0xff] }
 0xce3   : > { %3910 = vmatprep.subr.mxu0 %v4513_v4  ;;  %4251 = vmatprep.subr.bf16.mxu1 %v4508_v0  ;;  %v2604_v45 = vld [vmem:[#allocation4 + $0x248] sm:$0xff]  ;;  %v2684_v54 = vld [vmem:[#allocation4 + $0x320] sm:$0xff] }
 0xce4   : > { %v4264_v49 = vpack.c.bf16 %v2605_v46, %v2604_v45  ;;  %v3337_v45 = vld [vmem:[%s5479_s3 + $0x20] sm:$0xff] }
 0xce6   : > { %4444 = vmatpush3.msk.msra.mxu0 %vm280_vm5, %v5195_v61  ;;  %4447 = vmatpush3.bf16.msk.msra.mxu1 %vm4945_vm14, %v4446_v38  ;;  %v2685_v50 = vld [vmem:[#allocation4 + $0x338] sm:$0xff] }
 0xce7   : > { %4254 = vmatprep.subr.bf16.mxu0 %v4508_v0  ;;  %3913 = vmatmul.mubr.msk.f32.vlgmr.msra.gmra.mrb[18].mxu0 %vm336_vm4, %v3332_v37  ;;  %v4276_v55 = vpack.c.bf16 %v2685_v50, %v2684_v54  ;;  %v2606_v56 = vld [vmem:[#allocation4 + $0x278] sm:$0xff]  ;;  %v2686_v57 = vld [vmem:[#allocation4 + $0x350] sm:$0xff] }
 0xce8   : > { %4450 = vmatpush3.bf16.msk.msra.mxu0 %vm4956_vm15, %v4449_v40  ;;  %3931 = vmatprep.subr.mxu1 %v4513_v4 }
 0xce9   : > { %4257 = vmatprep.subr.bf16.mxu0 %v4508_v0  ;;  %3954 = vmatprep.mubr.msk.f32.mxu0 %vm4512_vm0, %v4513_v4 }
 0xcea   : > { %3932 = vmatpush3.msra.mxu1 %v2526_v41 }
 0xceb   : > { %3934 = vmatmul.mubr.msk.f32.vlgmr.msra.gmra.mrb[18].mxu1 %vm336_vm4, %v3332_v37  ;;  %4266 = vmatprep.subr.bf16.mxu1 %v4508_v0 }
 0xcec   : > { %4453 = vmatpush3.bf16.msk.msra.mxu0 %vm4675_vm12, %v4452_v43  ;;  %4456 = vmatpush3.bf16.msk.msra.mxu1 %vm4945_vm14, %v4433_v25 }
 0xced   : > { %4260 = vmatprep.subr.bf16.mxu0 %v4508_v0  ;;  %4269 = vmatprep.subr.bf16.mxu1 %v4508_v0 }
 0xcee   : > { %3975 = vmatprep.mubr.msk.f32.mxu1 %vm4512_vm0, %v4513_v4 }
 0xcf0   : > { %4459 = vmatpush3.bf16.msk.msra.mxu0 %vm4945_vm14, %v4446_v38  ;;  %4462 = vmatpush3.bf16.msk.msra.mxu1 %vm4956_vm15, %v4461_v47 }
 0xcf1   : > { %4263 = vmatprep.subr.bf16.mxu0 %v4508_v0  ;;  %4272 = vmatprep.subr.bf16.mxu1 %v4508_v0 }
 0xcf4   : > { %4265 = vmatpush3.bf16.msra.mxu0 %v4264_v49  ;;  %4465 = vmatpush3.bf16.msk.msra.mxu1 %vm4675_vm12, %v4464_v52 }
 0xcf5   : > { %3952 = vmatprep.subr.mxu0 %v4513_v4  ;;  %4275 = vmatprep.subr.bf16.mxu1 %v4508_v0 }
 0xcf8   : > { %3953 = vmatpush3.msra.mxu0 %v2606_v56  ;;  %4277 = vmatpush3.bf16.msra.mxu1 %v4276_v55 }
 0xcf9   : > { %3955 = vmatmul.mubr.msk.f32.vlgmr.msra.gmra.mrb[20].mxu0 %vm336_vm4, %v3332_v37  ;;  %3973 = vmatprep.subr.mxu1 %v4513_v4 }
 0xcfa   : > { %4278 = vmatprep.subr.bf16.mxu0 %v4508_v0  ;;  %3996 = vmatprep.mubr.msk.f32.mxu0 %vm4512_vm0, %v4513_v4 }
 0xcfc   : > { %3974 = vmatpush3.msra.mxu1 %v2686_v57 }
 0xcfd   : > { %3976 = vmatmul.mubr.msk.f32.vlgmr.msra.gmra.mrb[20].mxu1 %vm336_vm4, %v3332_v37  ;;  %4290 = vmatprep.subr.bf16.mxu1 %v4508_v0 }
 0xcfe   : > { %4017 = vmatprep.mubr.msk.f32.mxu1 %vm4512_vm0, %v4513_v4 }
 0xdba   : > { %v5306_v58 = vpop.f32.mrb[18].mxu0 }
 0xdbb   : > { %v5311_v32 = vsel %vm280_vm5, %v5306_v58, 0.0  ;;  %v3914_v59 = vpop.f32.mrb[19].mxu0 }
 0xdbe   : > { %v5313_v60 = vpop.f32.mrb[18].mxu1 }
 0xdbf   : > { %v5318_v31 = vsel %vm280_vm5, %v5313_v60, 0.0  ;;  %v3935_v61 = vpop.f32.mrb[19].mxu1  ;;  %v4470_v39 = vpack.c.bf16 %v5313_v60, %v5306_v58 }
 0xdcc   : > { %v5320_v62 = vpop.f32.mrb[20].mxu0 }
 0xdcd   : > { %v5325_v63 = vsel %vm280_vm5, %v5320_v62, 0.0  ;;  %v3956_v26 = vpop.f32.mrb[21].mxu0 }
 0xdce   : > { %2807 = vrot.lane.b32.xlu0 %v5325_v63, %s4509_s30 }
 0xdd0   : > { %v5329_v29 = vpop.f32.mrb[20].mxu1 }
 0xdd1   : > { %v5334_v5 = vsel %vm280_vm5, %v5329_v29, 0.0  ;;  %v3977_v6 = vpop.f32.mrb[21].mxu1  ;;  %v4479_v43 = vpack.c.bf16 %v5329_v29, %v5320_v62 }
 0xdd2   : > { %2831 = vrot.lane.b32.xlu1 %v5334_v5, %s4511_s9  ;;  %2836 = vrot.lane.b32.xlu0 %v5334_v5, %s4509_s30 }
 0xdd6   : > { %2783 = vrot.lane.b32.xlu1 %v5318_v31, %s4510_s8  ;;  %2814 = vrot.lane.b32.xlu0 %v5325_v63, %s4514_s14 }
 0xdda   : > { %2761 = vrot.lane.b32.xlu1 %v5311_v32, %s4516_s16  ;;  %2843 = vrot.lane.b32.xlu0 %v5334_v5, %s4510_s8 }
 0xdde   : > { %2821 = vrot.lane.b32.xlu1 %v5325_v63, %s4516_s16  ;;  %2770 = vrot.lane.b32.xlu0 %v5311_v32, %s4518_s18 }
 0xde2   : > { %2794 = vrot.lane.b32.xlu1 %v5318_v31, %s4515_s15  ;;  %2799 = vrot.lane.b32.xlu0 %v5318_v31, %s4518_s18 }
 0xde6   : > { %2777 = vrot.lane.b32.xlu1 %v5311_v32, %s4517_s17  ;;  %2869 = vperm.xlu0 %4347, %v3338_v7  }
 0xdea   : > { %2949 = vperm.xlu1 %4346, %v3340_v8   ;;  %2957 = vperm.xlu0 %4347, %v3341_v9  }
 0xe40   : > { %v2808_v10 = vpop.permute.xlu0 %2807 }
 0xe41   : > { %2810 = vst.msk [vmem:[#allocation3 + $0x20] sm:$0xff] %vm302_vm1, %v2808_v10  ;;  %2812 = vst.msk [vmem:[#allocation3 + $0xe0] sm:$0xff] %vm302_vm1, %v2808_v10 }
 0xe44   : > { %v2832_v11 = vpop.permute.xlu1 %2831  ;;  %v2837_v12 = vpop.permute.xlu0 %2836 }
 0xe45   : > { %2834 = vst.msk [vmem:[#allocation3 + $0x8] sm:$0xff] %vm311_vm3, %v2832_v11 }
 0xe46   : > { %2839 = vst.msk [vmem:[#allocation3 + $0x38] sm:$0xff] %vm302_vm1, %v2837_v12  ;;  %2841 = vst.msk [vmem:[#allocation3 + $0xf8] sm:$0xff] %vm302_vm1, %v2837_v12 }
 0xe48   : > { %v2784_v13 = vpop.permute.xlu1 %2783  ;;  %v2815_v14 = vpop.permute.xlu0 %2814  ;;  %v2857_v15 = vld [vmem:[#allocation3 + $0x20] sm:$0xff] }
 0xe49   : > { %2786 = vst.msk [vmem:[#allocation3 + $0x50] sm:$0xff] %vm293_vm2, %v2784_v13  ;;  %2790 = vst.msk [vmem:[#allocation3 + $0x1b8] sm:$0xff] %vm293_vm2, %v2784_v13  ;;  %v2963_v17 = vld [vmem:[#allocation3 + $0xe0] sm:$0xff] }
 0xe4a   : > { %2817 = vst.msk [vmem:[#allocation3 + $0x110] sm:$0xff] %vm426_vm6, %v2815_v14 }
 0xe4c   : > { %v2762_v16 = vpop.permute.xlu1 %2761  ;;  %v2844_v18 = vpop.permute.xlu0 %2843  ;;  %v2856_v19 = vld [vmem:[#allocation3 + $0x8] sm:$0xff] }
 0xe4d   : > { %v2964_v20 = vld [vmem:[#allocation3 + $0xf8] sm:$0xff]  ;;  %2765 = vst.msk [vmem:[#allocation3 + $0x158] sm:$0xff] %vm441_vm8, %v2762_v16  ;;  %2769 = vst.msk [vmem:[#allocation3 + $0x2c0] sm:$0xff] %vm441_vm8, %v2762_v16  ;;  %v4279_v22 = vpack.c.bf16 %v2857_v15, %v2856_v19 }
 0xe4e   : > { %2846 = vst.msk [vmem:[#allocation3 + $0x98] sm:$0xff] %vm293_vm2, %v2844_v18  ;;  %2850 = vst.msk [vmem:[#allocation3 + $0x200] sm:$0xff] %vm293_vm2, %v2844_v18  ;;  %v4291_v23 = vpack.c.bf16 %v2964_v20, %v2963_v17  ;;  %v2858_v27 = vld [vmem:[#allocation3 + $0x38] sm:$0xff] }
 0xe4f   : > { %4280 = vmatpush3.bf16.msra.mxu0 %v4279_v22  ;;  %v4348_v19 = vld [vmem:[%s4579_s29] sm:$0xff] }
 0xe50   : > { %4292 = vmatpush3.bf16.msra.mxu1 %v4291_v23  ;;  %v2822_v24 = vpop.permute.xlu1 %2821  ;;  %v2771_v25 = vpop.permute.xlu0 %2770  ;;  %4281 = vmatprep.subr.bf16.mxu0 %v4508_v0  ;;  %v2859_v30 = vld [vmem:[#allocation3 + $0x50] sm:$0xff]  ;;  %v3046_v46 = vld [vmem:[#allocation3 + $0x1b8] sm:$0xff] }
 0xe51   : > { %4293 = vmatprep.subr.bf16.mxu1 %v4508_v0  ;;  %v2965_v28 = vld [vmem:[#allocation3 + $0x110] sm:$0xff]  ;;  %2825 = vst.msk [vmem:[#allocation3 + $0x1a0] sm:$0xff] %vm441_vm8, %v2822_v24  ;;  %2829 = vst.msk [vmem:[#allocation3 + $0x308] sm:$0xff] %vm441_vm8, %v2822_v24  ;;  %v4282_v33 = vpack.c.bf16 %v2859_v30, %v2858_v27  ;;  %v4483_v50 = vpack.c.bf16 %v5306_v58, %v3046_v46 }
 0xe52   : > { %2774 = vst.msk [vmem:[#allocation3 + $0x260] sm:$0xff] %vm455_vm10, %v2771_v25  ;;  %2776 = vst.msk [vmem:[#allocation3 + $0x320] sm:$0xff] %vm455_vm10, %v2771_v25  ;;  %v4467_v34 = vpack.c.bf16 %v5306_v58, %v2965_v28 }
 0xe53   : > { %4283 = vmatpush3.bf16.msra.mxu0 %v4282_v33 }
 0xe54   : > { %4468 = vmatpush3.bf16.msk.msra.mxu1 %vm4956_vm15, %v4467_v34  ;;  %v2795_v35 = vpop.permute.xlu1 %2794  ;;  %v2800_v36 = vpop.permute.xlu0 %2799  ;;  %4284 = vmatprep.subr.bf16.mxu0 %v4508_v0  ;;  %v2968_v37 = vld [vmem:[#allocation3 + $0x158] sm:$0xff]  ;;  %v3131_v49 = vld [vmem:[#allocation3 + $0x2c0] sm:$0xff] }
 0xe55   : > { %4296 = vmatprep.subr.bf16.mxu1 %v4508_v0  ;;  %2798 = vst.msk [vmem:[#allocation3 + $0x248] sm:$0xff] %vm448_vm7, %v2795_v35  ;;  %v2862_v38 = vld [vmem:[#allocation3 + $0x98] sm:$0xff]  ;;  %v4473_v40 = vpack.c.bf16 %v2968_v37, %v5313_v60  ;;  %v3049_v47 = vld [vmem:[#allocation3 + $0x200] sm:$0xff]  ;;  %v4492_v55 = vpack.c.bf16 %v5320_v62, %v3131_v49 }
 0xe56   : > { %2803 = vst.msk [vmem:[#allocation3 + $0x278] sm:$0xff] %vm455_vm10, %v2800_v36  ;;  %2805 = vst.msk [vmem:[#allocation3 + $0x338] sm:$0xff] %vm455_vm10, %v2800_v36  ;;  %v4476_v42 = vpack.c.bf16 %v5320_v62, %v2862_v38  ;;  %v4489_v54 = vpack.c.bf16 %v3049_v47, %v5313_v60 }
 0xe57   : > { %4471 = vmatpush3.bf16.msk.msra.mxu0 %vm4945_vm14, %v4470_v39 }
 0xe58   : > { %4474 = vmatpush3.bf16.msk.msra.mxu1 %vm4675_vm12, %v4473_v40  ;;  %v2778_v41 = vpop.permute.xlu1 %2777  ;;  %4287 = vmatprep.subr.bf16.mxu0 %v4508_v0  ;;  %v2971_v48 = vld [vmem:[#allocation3 + $0x1a0] sm:$0xff]  ;;  %v3134_v52 = vld [vmem:[#allocation3 + $0x308] sm:$0xff] }
 0xe59   : > { %4299 = vmatprep.subr.bf16.mxu1 %v4508_v0  ;;  %2781 = vst.msk [vmem:[#allocation3 + $0x350] sm:$0xff] %vm462_vm9, %v2778_v41  ;;  %v4498_v58 = vpack.c.bf16 %v3134_v52, %v5329_v29  ;;  %v3053_v53 = vld [vmem:[#allocation3 + $0x260] sm:$0xff] }
 0xe5a   : > { %v3135_v59 = vld [vmem:[#allocation3 + $0x320] sm:$0xff] }
 0xe5b   : > { %4477 = vmatpush3.bf16.msk.msra.mxu0 %vm4956_vm15, %v4476_v42 }
 0xe5c   : > { %4480 = vmatpush3.bf16.msk.msra.mxu1 %vm4945_vm14, %v4479_v43  ;;  %3994 = vmatprep.subr.mxu0 %v4513_v4  ;;  %v3052_v56 = vld [vmem:[#allocation3 + $0x248] sm:$0xff] }
 0xe5d   : > { %4015 = vmatprep.subr.mxu1 %v4513_v4  ;;  %v3136_v57 = vld [vmem:[#allocation3 + $0x338] sm:$0xff]  ;;  %v4312_v60 = vpack.c.bf16 %v3053_v53, %v3052_v56 }
 0xe5e   : > { %v4324_v61 = vpack.c.bf16 %v3136_v57, %v3135_v59  ;;  %v3054_v51 = vld [vmem:[#allocation3 + $0x278] sm:$0xff] }
 0xe5f   : > { %4481 = vmatpush3.msk.msra.mxu0 %vm280_vm5, %v5329_v29 }
 0xe60   : > { %4016 = vmatpush3.msra.mxu1 %v2971_v48  ;;  %3997 = vmatmul.mubr.msk.f32.vlgmr.msra.gmra.mrb[22].mxu0 %vm336_vm4, %v3337_v45  ;;  %v3137_v62 = vld [vmem:[#allocation3 + $0x350] sm:$0xff] }
 0xe61   : > { %4018 = vmatmul.mubr.msk.f32.vlgmr.msra.gmra.mrb[22].mxu1 %vm336_vm4, %v3337_v45  ;;  %4302 = vmatprep.subr.bf16.mxu0 %v4508_v0 }
 0xe62   : > { %4314 = vmatprep.subr.bf16.mxu1 %v4508_v0  ;;  %4484 = vmatpush3.bf16.msk.msra.mxu0 %vm4956_vm15, %v4483_v50 }
 0xe63   : > { %4487 = vmatpush3.bf16.msk.msra.mxu1 %vm4945_vm14, %v4470_v39  ;;  %4305 = vmatprep.subr.bf16.mxu0 %v4508_v0 }
 0xe64   : > { %4317 = vmatprep.subr.bf16.mxu1 %v4508_v0  ;;  %4038 = vmatprep.mubr.msk.f32.mxu0 %vm4512_vm0, %v4513_v4 }
 0xe65   : > { %4059 = vmatprep.mubr.msk.f32.mxu1 %vm4512_vm0, %v4513_v4 }
 0xe66   : > { %4490 = vmatpush3.bf16.msk.msra.mxu0 %vm4675_vm12, %v4489_v54 }
 0xe67   : > { %4493 = vmatpush3.bf16.msk.msra.mxu1 %vm4956_vm15, %v4492_v55  ;;  %4308 = vmatprep.subr.bf16.mxu0 %v4508_v0 }
 0xe68   : > { %4320 = vmatprep.subr.bf16.mxu1 %v4508_v0 }
 0xe69   : > { %v2950_v9 = vpop.permute.xlu1 %2949 }
 0xe6a   : > { %4496 = vmatpush3.bf16.msk.msra.mxu0 %vm4945_vm14, %v4479_v43 }
 0xe6b   : > { %4499 = vmatpush3.bf16.msk.msra.mxu1 %vm4675_vm12, %v4498_v58  ;;  %4311 = vmatprep.subr.bf16.mxu0 %v4508_v0 }
 0xe6c   : > { %4323 = vmatprep.subr.bf16.mxu1 %v4508_v0  ;;  %v2870_v0 = vpop.permute.xlu0 %2869 }
 0xe6e   : > { %4313 = vmatpush3.bf16.msra.mxu0 %v4312_v60 }
 0xe6f   : > { %4325 = vmatpush3.bf16.msra.mxu1 %v4324_v61  ;;  %4036 = vmatprep.subr.mxu0 %v4513_v4 }
 0xe70   : > { %4057 = vmatprep.subr.mxu1 %v4513_v4  ;;  %v2958_v11 = vpop.permute.xlu0 %2957 }
 0xe72   : > { %4037 = vmatpush3.msra.mxu0 %v3054_v51 }
 0xe73   : > { %4058 = vmatpush3.msra.mxu1 %v3137_v62  ;;  %4039 = vmatmul.mubr.msk.f32.vlgmr.msra.gmra.mrb[24].mxu0 %vm336_vm4, %v3337_v45 }
 0xe74   : > { %4060 = vmatmul.mubr.msk.f32.vlgmr.msra.gmra.mrb[24].mxu1 %vm336_vm4, %v3337_v45 }
 0xf33   : > { %v2941_v44 = vpop.f32.mrb[22].mxu0 }
 0xf34   : > { %v3038_v26 = vpop.f32.mrb[22].mxu1  ;;  %v2942_v29 = vadd.f32 %v2941_v44, %v2870_v0  ;;  %v3998_v7 = vpop.f32.mrb[23].mxu0 }
 0xf35   : > { %v3039_v6 = vadd.f32 %v3038_v26, %v2870_v0  ;;  %v4019_v8 = vpop.f32.mrb[23].mxu1 }
 0xf36   : > { %v2952_v10 = vmul.f32 %v2950_v9, %v2942_v29 }
 0xf37   : > { %v3042_v4 = vmul.f32 %v3039_v6, %v2950_v9 }
 0xf38   : > { %v2960_v12 = vadd.f32 %v2958_v11, %v2952_v10 }
 0xf39   : > { %v3043_v13 = vadd.f32 %v3042_v4, %v2958_v11 }
 0xf3a   : > { %v2961_v14 = vmax.f32 %v5311_v32, %v2960_v12 }
 0xf3b   : > { %v3044_v15 = vmax.f32 %v5318_v31, %v3043_v13 }
 0xf3c   : > { %v2962_v16 = vsel %vm280_vm5, %v2961_v14, 0.0 }
 0xf3d   : > { %v3045_v18 = vsel %vm280_vm5, %v3044_v15, 0.0  ;;  %v3212_v17 = vadd.f32 %v4348_v19, %v2962_v16 }
 0xf3e   : > { %v3214_v20 = vadd.f32 %v4585_v2, %v3045_v18 }
 0xf3f   : > { %3213 = vst [vmem:[%s278_s11] sm:$0xff] %v3212_v17 }
 0xf40   : > { %3345 = vst [vmem:[%s278_s11 + $0x8] sm:$0xff] %v3214_v20 }
 0xf46   : > { %v3121_v32 = vpop.f32.mrb[24].mxu0 }
 0xf47   : > { %v3204_v22 = vpop.f32.mrb[24].mxu1  ;;  %v3122_v31 = vadd.f32 %v3121_v32, %v2870_v0  ;;  %v4040_v24 = vpop.f32.mrb[25].mxu0 }
 0xf48   : > { %v3205_v23 = vadd.f32 %v3204_v22, %v2870_v0  ;;  %v4061_v25 = vpop.f32.mrb[25].mxu1 }
 0xf49   : > { %v3125_v27 = vmul.f32 %v3122_v31, %v2950_v9 }
 0xf4a   : > { %v3208_v30 = vmul.f32 %v3205_v23, %v2950_v9 }
 0xf4b   : > { %v3126_v28 = vadd.f32 %v3125_v27, %v2958_v11 }
 0xf4c   : > { %v3209_v33 = vadd.f32 %v3208_v30, %v2958_v11 }
 0xf4d   : > { %v3127_v34 = vmax.f32 %v5325_v63, %v3126_v28 }
 0xf4e   : > { %v3210_v35 = vmax.f32 %v5334_v5, %v3209_v33 }
 0xf4f   : > { %v3128_v36 = vsel %vm280_vm5, %v3127_v34, 0.0 }
 0xf50   : > { %v3211_v2 = vsel %vm280_vm5, %v3210_v35, 0.0  ;;  %v3217_v37 = vadd.f32 %v4582_v1, %v3128_v36 }
 0xf51   : > { %v3220_v38 = vadd.f32 %v4594_v3, %v3211_v2 }
 0xf52   : > { %3346 = vst [vmem:[%s278_s11 + $0x10] sm:$0xff] %v3217_v37 }
 0xf53   : > { %3347 = vst [vmem:[%s278_s11 + $0x18] sm:$0xff] %v3220_v38 }
 0xf54 PF: > { %s17_s24 = sadd.s32 1, %s4506_s24  }
 0xf55   : > { %p14_p4 = scmp.ge.s32.totalorder %s17_s24, 4  }
 0xf57   :  { %16 = sbr.rel (!%p14_p4) target bundleno = 1 (0x1), region = 117 }

</bundles_post_ra>
